<compile_context>
chip_gen: v5e
topology: v5e:2x2
jax: 0.10.0
libtpu: 0.0.40
codegen_flags: <defaults>
</compile_context>

<pallas_src>
import math
from functools import partial

import numpy as np
import jax
import jax.numpy as jnp
from jax.experimental import pallas as pl
from jax.experimental.pallas import tpu as pltpu

# ----------------------------- small config ---------------------------------
NJOINTS = 4
NFEATS = 6                      # rot6d-ish
NFRAMES = 8
BS = 2
LATENT = 32
FF = 64
LAYERS = 2
HEADS = 4
INPUT_FEATS = NJOINTS * NFEATS  # 24
MAX_LEN = 64                    # positional-encoding table length (>= max timestep, >= nframes+1)
LN_EPS = 1e-5
NEG_BIG = -1e30


# ----------------------------- helpers (pure jnp, used in-kernel) -----------
def _layernorm(x, g, b, eps=LN_EPS):
    mu = jnp.mean(x, axis=-1, keepdims=True)
    var = jnp.mean(jnp.square(x - mu), axis=-1, keepdims=True)
    return (x - mu) * jax.lax.rsqrt(var + eps) * g + b


def _gelu_exact(x):
    # torch.nn.functional.gelu default = exact erf form
    return 0.5 * x * (1.0 + jax.lax.erf(x * (1.0 / math.sqrt(2.0))))


# ----------------------------- fused Pallas kernel ---------------------------
def cmdm_fused_kernel(pe_t_ref, xc_pad_ref, pe_seq_ref,
                      emb_sel_ref, head_mask_ref, key_bias_ref,
                      time_w_ref, time_b_ref,
                      in_w_ref, in_b_ref,
                      attn_w_ref, attn_b_ref,
                      ln_g_ref, ln_b_ref,
                      w1_ref, b1_ref, w2_ref, b2_ref,
                      final_w_ref, final_b_ref,
                      o_ref, *, num_heads, num_layers):
    B, Sp, _ = xc_pad_ref.shape
    D = pe_t_ref.shape[1]
    F = final_w_ref.shape[1]
    H = num_heads
    N = B * Sp
    scale = 1.0 / math.sqrt(D // H)

    def mm(a, w):
        # bf16 MXU operands, f32 accumulation; elementwise math stays f32.
        return jnp.dot(a.astype(jnp.bfloat16), w.astype(jnp.bfloat16),
                       preferred_element_type=jnp.float32)

    def bmm(eq, a, b):
        return jnp.einsum(eq, a.astype(jnp.bfloat16), b.astype(jnp.bfloat16),
                          preferred_element_type=jnp.float32)

    # --- TimestepEmbedder: Linear -> SiLU -> Linear -----------------------------------
    t = mm(pe_t_ref[...], time_w_ref[0]) + time_b_ref[0]
    t = t * jax.nn.sigmoid(t)
    emb = mm(t, time_w_ref[1]) + time_b_ref[1]                          # [B, D]

    # --- input_process(x) + cmo_process(cmx), fused (cm_mode == 'add') -----------------
    # xc_pad packs [x_feats | cmotion_feats] along lanes; in_w stacks the two Linear
    # weight matrices along the contraction dim, in_b is the sum of the two biases.
    xc2 = xc_pad_ref[...].reshape(N, 2 * F)                             # Sp mult of 8 -> free
    body = (mm(xc2, in_w_ref[...]) + in_b_ref[...]).reshape(B, Sp, D)

    # --- splice timestep token at position 0; add positional encoding -----------------
    emb_sel = emb_sel_ref[...]                                          # [1, Sp, 1], 1.0 at row 0
    emb_b = jnp.broadcast_to(emb[:, None, :], (B, Sp, D))
    h3 = body * (1.0 - emb_sel) + emb_b * emb_sel + pe_seq_ref[...][None, :, :]
    h2 = h3.reshape(N, D)                                               # [B*Sp, D]

    head_mask = head_mask_ref[...]                                      # [H, 1, D]
    key_bias = key_bias_ref[...]                                        # [1, Sp]  (0 / -1e30)

    for l in range(num_layers):                                         # static unroll (L=2)
        # -------- self-attention (post-LN encoder layer, eval mode) --------
        q = (mm(h2, attn_w_ref[l, 0]) + attn_b_ref[l, 0]).reshape(B, Sp, D)
        k = (mm(h2, attn_w_ref[l, 1]) + attn_b_ref[l, 1]).reshape(B, Sp, D)
        v = (mm(h2, attn_w_ref[l, 2]) + attn_b_ref[l, 2]).reshape(B, Sp, D)

        # heads folded into the batch dim via lane masks (no 8-lane slicing / concat)
        q_s = (q[:, None, :, :] * head_mask[None, :, :, :]).reshape(B * H, Sp, D)
        v_s = (v[:, None, :, :] * head_mask[None, :, :, :]).reshape(B * H, Sp, D)
        k_s = jnp.broadcast_to(k[:, None, :, :], (B, H, Sp, D)).reshape(B * H, Sp, D)

        s = bmm('bsd,btd->bst', q_s, k_s) * scale + key_bias            # [B*H, Sp, Sp]
        s = s - jnp.max(s, axis=-1, keepdims=True)
        p = jnp.exp(s)
        p = p * pl.reciprocal(jnp.sum(p, axis=-1, keepdims=True), approx=True)
        ctx = bmm('bst,btd->bsd', p, v_s)                               # [B*H, Sp, D]

        # recombine heads (lanes already disjoint per head): sum over the head axis
        ctx_r = ctx.reshape(B, H, Sp, D)
        attn = ctx_r[:, 0]
        for hh in range(1, H):
            attn = attn + ctx_r[:, hh]
        attn = mm(attn.reshape(N, D), attn_w_ref[l, 3]) + attn_b_ref[l, 3]   # out_proj

        y = _layernorm(h2 + attn, ln_g_ref[l, 0], ln_b_ref[l, 0])

        # -------- feed-forward (GELU) --------
        ff = mm(_gelu_exact(mm(y, w1_ref[l]) + b1_ref[l]), w2_ref[l]) + b2_ref[l]
        h2 = _layernorm(y + ff, ln_g_ref[l, 1], ln_b_ref[l, 1])

    # --- OutputProcess.poseFinal -------------------------------------------------------
    out = mm(h2, final_w_ref[...]) + final_b_ref[...]                   # [N, F]
    o_ref[...] = out.reshape(B, Sp, F)


# ----------------------------- parameters -----------------------------------
def make_pe(max_len, d):
    position = np.arange(max_len, dtype=np.float32)[:, None]
    div_term = np.exp(np.arange(0, d, 2, dtype=np.float32) * (-np.log(10000.0) / d))
    pe = np.zeros((max_len, d), np.float32)
    pe[:, 0::2] = np.sin(position * div_term)
    pe[:, 1::2] = np.cos(position * div_term)
    return jnp.asarray(pe)                                              # [max_len, D]


def init_params(key):
    D, F, FFD, L = LATENT, INPUT_FEATS, FF, LAYERS
    keys = iter(jax.random.split(key, 64))

    def w(shape, scale=0.05):
        return scale * jax.random.normal(next(keys), shape, jnp.float32)

    # NOTE: PyTorch Linear weights are [out, in]; we store them pre-transposed [in, out].
    # Per-layer / per-role weights are stacked on leading axes (fewer launch DMAs,
    # static in-kernel index -> pure address offsets).
    return {
        'pe': make_pe(MAX_LEN, D),
        # InputProcess.poseEmbedding (rows 0:F) + cmo_process.poseEmbedding (rows F:2F),
        # biases merged (cm_mode == 'add').
        'in_w': w((2 * F, D)), 'in_b': w((1, D)),
        'time_w': w((2, D, D)), 'time_b': w((2, 1, D)),     # TimestepEmbedder MLP (2 Linears)
        'final_w': w((D, F)), 'final_b': w((1, F)),         # OutputProcess.poseFinal
        'attn_w': w((L, 4, D, D)),                          # q, k, v, out_proj
        'attn_b': w((L, 4, 1, D)),
        'ln_g': jnp.ones((L, 2, 1, D), jnp.float32),        # norm1, norm2
        'ln_b': jnp.zeros((L, 2, 1, D), jnp.float32),
        'w1': w((L, D, FFD)), 'b1': w((L, 1, FFD)),
        'w2': w((L, FFD, D)), 'b2': w((L, 1, D)),
    }


# ----------------------------- forward (single fused Pallas call) -----------
@jax.jit
def cmdm_forward_pallas(x, timesteps, cmotion, params):
    """x, cmotion: [bs, njoints, nfeats, nframes]; timesteps: [bs] int32."""
    bs, nj, nf, T = x.shape
    D, F, H = LATENT, INPUT_FEATS, HEADS
    S = T + 1                                   # [timestep token] + frames
    Sp = ((S + 7) // 8) * 8                     # pad sequence to a sublane multiple (9 -> 16)
    pe = params['pe']

    # InputProcess layout glue: features of frame t = x[b, :, :, t].flatten(); frames are
    # placed at sequence positions 1..T of a zero-padded [bs, Sp, 2F] slab (row 0 = timestep
    # token, rows >= S = padding masked in attention). x and cmotion features are packed
    # side-by-side so their two embedding Linears fuse into one matmul in-kernel.
    x_bt = jnp.transpose(x, (0, 3, 1, 2)).reshape(bs, T, F)
    c_bt = jnp.transpose(cmotion, (0, 3, 1, 2)).reshape(bs, T, F)
    xc_bt = jnp.concatenate([x_bt, c_bt], axis=-1)                      # [bs, T, 2F]
    xc_pad = jnp.zeros((bs, Sp, 2 * F), jnp.float32).at[:, 1:T + 1, :].set(xc_bt)

    pe_t = pe[timesteps]                        # [bs, D]  (gather is glue)
    pe_seq = pe[:Sp]                            # [Sp, D]  (rows >= S only touch padded tokens)

    # static masks baked as tiny constant inputs
    emb_sel = jnp.asarray(
        np.eye(Sp, dtype=np.float32)[0].reshape(1, Sp, 1))              # 1.0 at seq position 0
    head_mask = jnp.asarray(
        (np.arange(D)[None, :] // (D // H) == np.arange(H)[:, None])
        .astype(np.float32).reshape(H, 1, D))                           # [H, 1, D]
    key_bias = jnp.asarray(
        np.where(np.arange(Sp) < S, 0.0, NEG_BIG)
        .astype(np.float32).reshape(1, Sp))                             # mask padded keys

    args = (
        pe_t, xc_pad, pe_seq, emb_sel, head_mask, key_bias,
        params['time_w'], params['time_b'],
        params['in_w'], params['in_b'],
        params['attn_w'], params['attn_b'],
        params['ln_g'], params['ln_b'],
        params['w1'], params['b1'], params['w2'], params['b2'],
        params['final_w'], params['final_b'],
    )

    out_full = pl.pallas_call(
        partial(cmdm_fused_kernel, num_heads=H, num_layers=LAYERS),
        out_shape=jax.ShapeDtypeStruct((bs, Sp, F), jnp.float32),
        in_specs=[pl.BlockSpec(memory_space=pltpu.MemorySpace.VMEM) for _ in args],
        out_specs=pl.BlockSpec(memory_space=pltpu.MemorySpace.VMEM),
    )(*args)

    # drop timestep token + padding, OutputProcess reshape/permute (glue)
    out = out_full[:, 1:T + 1, :].reshape(bs, T, nj, nf)
    return jnp.transpose(out, (0, 2, 3, 1))                              # [bs, njoints, nfeats, T]


# ----------------------------- pure-JAX reference (f32) ----------------------
def cmdm_forward_reference(x, timesteps, cmotion, params):
    bs, nj, nf, T = x.shape
    D, F = LATENT, INPUT_FEATS
    pe = params['pe']

    x_bt = jnp.transpose(x, (0, 3, 1, 2)).reshape(bs, T, F)
    c_bt = jnp.transpose(cmotion, (0, 3, 1, 2)).reshape(bs, T, F)

    h = pe[timesteps] @ params['time_w'][0] + params['time_b'][0]
    h = h * jax.nn.sigmoid(h)
    emb = h @ params['time_w'][1] + params['time_b'][1]

    body = x_bt @ params['in_w'][:F] + c_bt @ params['in_w'][F:] + params['in_b']
    hcur = jnp.concatenate([emb[:, None, :], body], axis=1) + pe[:T + 1][None, :, :]

    Dh = D // HEADS
    for l in range(LAYERS):
        S = hcur.shape[1]
        q = hcur @ params['attn_w'][l, 0] + params['attn_b'][l, 0]
        k = hcur @ params['attn_w'][l, 1] + params['attn_b'][l, 1]
        v = hcur @ params['attn_w'][l, 2] + params['attn_b'][l, 2]
        qh = q.reshape(bs, S, HEADS, Dh)
        kh = k.reshape(bs, S, HEADS, Dh)
        vh = v.reshape(bs, S, HEADS, Dh)
        sc = jnp.einsum('bshd,bthd->bhst', qh, kh) / math.sqrt(Dh)
        p = jax.nn.softmax(sc, axis=-1)
        ao = jnp.einsum('bhst,bthd->bshd', p, vh).reshape(bs, S, D)
        ao = ao @ params['attn_w'][l, 3] + params['attn_b'][l, 3]
        y = _layernorm(hcur + ao, params['ln_g'][l, 0], params['ln_b'][l, 0])
        ff = _gelu_exact(y @ params['w1'][l] + params['b1'][l]) @ params['w2'][l] + params['b2'][l]
        hcur = _layernorm(y + ff, params['ln_g'][l, 1], params['ln_b'][l, 1])

    out = hcur[:, 1:, :] @ params['final_w'] + params['final_b']
    out = out.reshape(bs, T, nj, nf)
    return jnp.transpose(out, (0, 2, 3, 1))


# ----------------------------- main ------------------------------------------
if __name__ == "__main__":
    key = jax.random.PRNGKey(0)
    kp, kx, kc, kt = jax.random.split(key, 4)

    params = init_params(kp)
    x = jax.random.normal(kx, (BS, NJOINTS, NFEATS, NFRAMES), jnp.float32)
    cmotion = jax.random.normal(kc, (BS, NJOINTS, NFEATS, NFRAMES), jnp.float32)
    timesteps = jax.random.randint(kt, (BS,), 0, 50)

    out = jax.block_until_ready(cmdm_forward_pallas(x, timesteps, cmotion, params))
    ref = jax.block_until_ready(cmdm_forward_reference(x, timesteps, cmotion, params))

    assert out.shape == (BS, NJOINTS, NFEATS, NFRAMES), out.shape
    err = float(jnp.max(jnp.abs(out - ref)))
    if err > 5e-2:
        raise AssertionError(f"Pallas output mismatch vs reference: max abs err = {err}")
    print("KERNEL_OK")
</pallas_src>

<mosaic_0001>
module attributes {stable_mosaic.version = 11 : i64} {
  func.func @cmdm_fused_kernel(%arg0: memref<2x32xf32, #tpu.memory_space<vmem>>, %arg1: memref<2x16x48xf32, #tpu.memory_space<vmem>>, %arg2: memref<16x32xf32, #tpu.memory_space<vmem>>, %arg3: memref<1x16x1xf32, #tpu.memory_space<vmem>>, %arg4: memref<4x1x32xf32, #tpu.memory_space<vmem>>, %arg5: memref<1x16xf32, #tpu.memory_space<vmem>>, %arg6: memref<2x32x32xf32, #tpu.memory_space<vmem>>, %arg7: memref<2x1x32xf32, #tpu.memory_space<vmem>>, %arg8: memref<48x32xf32, #tpu.memory_space<vmem>>, %arg9: memref<1x32xf32, #tpu.memory_space<vmem>>, %arg10: memref<2x4x32x32xf32, #tpu.memory_space<vmem>>, %arg11: memref<2x4x1x32xf32, #tpu.memory_space<vmem>>, %arg12: memref<2x2x1x32xf32, #tpu.memory_space<vmem>>, %arg13: memref<2x2x1x32xf32, #tpu.memory_space<vmem>>, %arg14: memref<2x32x64xf32, #tpu.memory_space<vmem>>, %arg15: memref<2x1x64xf32, #tpu.memory_space<vmem>>, %arg16: memref<2x64x32xf32, #tpu.memory_space<vmem>>, %arg17: memref<2x1x32xf32, #tpu.memory_space<vmem>>, %arg18: memref<32x24xf32, #tpu.memory_space<vmem>>, %arg19: memref<1x24xf32, #tpu.memory_space<vmem>>, %arg20: memref<2x16x24xf32, #tpu.memory_space<vmem>>) attributes {dimension_semantics = [], scalar_prefetch = 0 : i64, scratch_operands = 0 : i64, tpu.core_type = #tpu.core_type<tc>} {
    %c0 = arith.constant 0 : index
    %c0_0 = arith.constant 0 : index
    %0 = vector.load %arg0[%c0, %c0_0] : memref<2x32xf32, #tpu.memory_space<vmem>>, vector<2x32xf32>
    %c0_1 = arith.constant 0 : index
    %c0_2 = arith.constant 0 : index
    %c0_3 = arith.constant 0 : index
    %1 = vector.load %arg6[%c0_1, %c0_2, %c0_3] : memref<2x32x32xf32, #tpu.memory_space<vmem>>, vector<1x32x32xf32>
    %2 = vector.shape_cast %1 : vector<1x32x32xf32> to vector<32x32xf32>
    %3 = arith.truncf %0 : vector<2x32xf32> to vector<2x32xbf16>
    %4 = arith.truncf %2 : vector<32x32xf32> to vector<32x32xbf16>
    %cst = arith.constant dense<0.000000e+00> : vector<2x32xf32>
    %5 = tpu.matmul %3, %4, %cst {dimension_numbers = #tpu.dot_dimension_numbers<[1], [0], [0], [1], [0, 0, 1, 1], [], []>} : vector<2x32xbf16>, vector<32x32xbf16>, vector<2x32xf32> -> vector<2x32xf32>
    %c0_4 = arith.constant 0 : index
    %c0_5 = arith.constant 0 : index
    %c0_6 = arith.constant 0 : index
    %6 = vector.load %arg7[%c0_4, %c0_5, %c0_6] : memref<2x1x32xf32, #tpu.memory_space<vmem>>, vector<1x1x32xf32>
    %7 = vector.shape_cast %6 : vector<1x1x32xf32> to vector<1x32xf32>
    %8 = vector.broadcast %7 : vector<1x32xf32> to vector<2x32xf32>
    %9 = arith.addf %5, %8 : vector<2x32xf32>
    %10 = arith.negf %9 : vector<2x32xf32>
    %11 = math.exp %10 : vector<2x32xf32>
    %cst_7 = arith.constant 1.000000e+00 : f32
    %12 = vector.broadcast %cst_7 : f32 to vector<2x32xf32>
    %13 = arith.addf %12, %11 : vector<2x32xf32>
    %14 = arith.divf %12, %13 : vector<2x32xf32>
    %15 = arith.mulf %9, %14 : vector<2x32xf32>
    %c1 = arith.constant 1 : index
    %c0_8 = arith.constant 0 : index
    %c0_9 = arith.constant 0 : index
    %16 = vector.load %arg6[%c1, %c0_8, %c0_9] : memref<2x32x32xf32, #tpu.memory_space<vmem>>, vector<1x32x32xf32>
    %17 = vector.shape_cast %16 : vector<1x32x32xf32> to vector<32x32xf32>
    %18 = arith.truncf %15 : vector<2x32xf32> to vector<2x32xbf16>
    %19 = arith.truncf %17 : vector<32x32xf32> to vector<32x32xbf16>
    %cst_10 = arith.constant dense<0.000000e+00> : vector<2x32xf32>
    %20 = tpu.matmul %18, %19, %cst_10 {dimension_numbers = #tpu.dot_dimension_numbers<[1], [0], [0], [1], [0, 0, 1, 1], [], []>} : vector<2x32xbf16>, vector<32x32xbf16>, vector<2x32xf32> -> vector<2x32xf32>
    %c1_11 = arith.constant 1 : index
    %c0_12 = arith.constant 0 : index
    %c0_13 = arith.constant 0 : index
    %21 = vector.load %arg7[%c1_11, %c0_12, %c0_13] : memref<2x1x32xf32, #tpu.memory_space<vmem>>, vector<1x1x32xf32>
    %22 = vector.shape_cast %21 : vector<1x1x32xf32> to vector<1x32xf32>
    %23 = vector.broadcast %22 : vector<1x32xf32> to vector<2x32xf32>
    %24 = arith.addf %20, %23 : vector<2x32xf32>
    %c0_14 = arith.constant 0 : index
    %c0_15 = arith.constant 0 : index
    %c0_16 = arith.constant 0 : index
    %25 = vector.load %arg1[%c0_14, %c0_15, %c0_16] : memref<2x16x48xf32, #tpu.memory_space<vmem>>, vector<2x16x48xf32>
    %26 = vector.shape_cast %25 : vector<2x16x48xf32> to vector<32x48xf32>
    %c0_17 = arith.constant 0 : index
    %c0_18 = arith.constant 0 : index
    %27 = vector.load %arg8[%c0_17, %c0_18] : memref<48x32xf32, #tpu.memory_space<vmem>>, vector<48x32xf32>
    %28 = arith.truncf %26 : vector<32x48xf32> to vector<32x48xbf16>
    %29 = arith.truncf %27 : vector<48x32xf32> to vector<48x32xbf16>
    %cst_19 = arith.constant dense<0.000000e+00> : vector<32x32xf32>
    %30 = tpu.matmul %28, %29, %cst_19 {dimension_numbers = #tpu.dot_dimension_numbers<[1], [0], [0], [1], [0, 0, 1, 1], [], []>} : vector<32x48xbf16>, vector<48x32xbf16>, vector<32x32xf32> -> vector<32x32xf32>
    %c0_20 = arith.constant 0 : index
    %c0_21 = arith.constant 0 : index
    %31 = vector.load %arg9[%c0_20, %c0_21] : memref<1x32xf32, #tpu.memory_space<vmem>>, vector<1x32xf32>
    %32 = vector.broadcast %31 : vector<1x32xf32> to vector<32x32xf32>
    %33 = arith.addf %30, %32 : vector<32x32xf32>
    %34 = vector.shape_cast %33 : vector<32x32xf32> to vector<2x16x32xf32>
    %c0_22 = arith.constant 0 : index
    %c0_23 = arith.constant 0 : index
    %c0_24 = arith.constant 0 : index
    %35 = vector.load %arg3[%c0_22, %c0_23, %c0_24] : memref<1x16x1xf32, #tpu.memory_space<vmem>>, vector<1x16x1xf32>
    %36 = vector.shape_cast %24 : vector<2x32xf32> to vector<2x1x32xf32>
    %37 = vector.shape_cast %36 : vector<2x1x32xf32> to vector<2x1x32xf32>
    %38 = vector.broadcast %37 : vector<2x1x32xf32> to vector<2x16x32xf32>
    %cst_25 = arith.constant 1.000000e+00 : f32
    %39 = vector.broadcast %cst_25 : f32 to vector<1x16x1xf32>
    %40 = arith.subf %39, %35 : vector<1x16x1xf32>
    %41 = vector.broadcast %40 : vector<1x16x1xf32> to vector<2x16x32xf32>
    %42 = arith.mulf %34, %41 : vector<2x16x32xf32>
    %43 = vector.broadcast %35 : vector<1x16x1xf32> to vector<2x16x32xf32>
    %44 = arith.mulf %38, %43 : vector<2x16x32xf32>
    %45 = arith.addf %42, %44 : vector<2x16x32xf32>
    %c0_26 = arith.constant 0 : index
    %c0_27 = arith.constant 0 : index
    %46 = vector.load %arg2[%c0_26, %c0_27] : memref<16x32xf32, #tpu.memory_space<vmem>>, vector<16x32xf32>
    %47 = vector.shape_cast %46 : vector<16x32xf32> to vector<1x16x32xf32>
    %48 = vector.broadcast %47 : vector<1x16x32xf32> to vector<2x16x32xf32>
    %49 = arith.addf %45, %48 : vector<2x16x32xf32>
    %50 = vector.shape_cast %49 : vector<2x16x32xf32> to vector<32x32xf32>
    %c0_28 = arith.constant 0 : index
    %c0_29 = arith.constant 0 : index
    %c0_30 = arith.constant 0 : index
    %51 = vector.load %arg4[%c0_28, %c0_29, %c0_30] : memref<4x1x32xf32, #tpu.memory_space<vmem>>, vector<4x1x32xf32>
    %c0_31 = arith.constant 0 : index
    %c0_32 = arith.constant 0 : index
    %52 = vector.load %arg5[%c0_31, %c0_32] : memref<1x16xf32, #tpu.memory_space<vmem>>, vector<1x16xf32>
    %c0_33 = arith.constant 0 : index
    %c0_34 = arith.constant 0 : index
    %c0_35 = arith.constant 0 : index
    %c0_36 = arith.constant 0 : index
    %53 = vector.load %arg10[%c0_33, %c0_34, %c0_35, %c0_36] : memref<2x4x32x32xf32, #tpu.memory_space<vmem>>, vector<1x1x32x32xf32>
    %54 = vector.shape_cast %53 : vector<1x1x32x32xf32> to vector<32x32xf32>
    %55 = arith.truncf %50 : vector<32x32xf32> to vector<32x32xbf16>
    %56 = arith.truncf %54 : vector<32x32xf32> to vector<32x32xbf16>
    %cst_37 = arith.constant dense<0.000000e+00> : vector<32x32xf32>
    %57 = tpu.matmul %55, %56, %cst_37 {dimension_numbers = #tpu.dot_dimension_numbers<[1], [0], [0], [1], [0, 0, 1, 1], [], []>} : vector<32x32xbf16>, vector<32x32xbf16>, vector<32x32xf32> -> vector<32x32xf32>
    %c0_38 = arith.constant 0 : index
    %c0_39 = arith.constant 0 : index
    %c0_40 = arith.constant 0 : index
    %c0_41 = arith.constant 0 : index
    %58 = vector.load %arg11[%c0_38, %c0_39, %c0_40, %c0_41] : memref<2x4x1x32xf32, #tpu.memory_space<vmem>>, vector<1x1x1x32xf32>
    %59 = vector.shape_cast %58 : vector<1x1x1x32xf32> to vector<1x32xf32>
    %60 = vector.broadcast %59 : vector<1x32xf32> to vector<32x32xf32>
    %61 = arith.addf %57, %60 : vector<32x32xf32>
    %62 = vector.shape_cast %61 : vector<32x32xf32> to vector<2x16x32xf32>
    %c0_42 = arith.constant 0 : index
    %c1_43 = arith.constant 1 : index
    %c0_44 = arith.constant 0 : index
    %c0_45 = arith.constant 0 : index
    %63 = vector.load %arg10[%c0_42, %c1_43, %c0_44, %c0_45] : memref<2x4x32x32xf32, #tpu.memory_space<vmem>>, vector<1x1x32x32xf32>
    %64 = vector.shape_cast %63 : vector<1x1x32x32xf32> to vector<32x32xf32>
    %65 = arith.truncf %50 : vector<32x32xf32> to vector<32x32xbf16>
    %66 = arith.truncf %64 : vector<32x32xf32> to vector<32x32xbf16>
    %cst_46 = arith.constant dense<0.000000e+00> : vector<32x32xf32>
    %67 = tpu.matmul %65, %66, %cst_46 {dimension_numbers = #tpu.dot_dimension_numbers<[1], [0], [0], [1], [0, 0, 1, 1], [], []>} : vector<32x32xbf16>, vector<32x32xbf16>, vector<32x32xf32> -> vector<32x32xf32>
    %c0_47 = arith.constant 0 : index
    %c1_48 = arith.constant 1 : index
    %c0_49 = arith.constant 0 : index
    %c0_50 = arith.constant 0 : index
    %68 = vector.load %arg11[%c0_47, %c1_48, %c0_49, %c0_50] : memref<2x4x1x32xf32, #tpu.memory_space<vmem>>, vector<1x1x1x32xf32>
    %69 = vector.shape_cast %68 : vector<1x1x1x32xf32> to vector<1x32xf32>
    %70 = vector.broadcast %69 : vector<1x32xf32> to vector<32x32xf32>
    %71 = arith.addf %67, %70 : vector<32x32xf32>
    %72 = vector.shape_cast %71 : vector<32x32xf32> to vector<2x16x32xf32>
    %c0_51 = arith.constant 0 : index
    %c2 = arith.constant 2 : index
    %c0_52 = arith.constant 0 : index
    %c0_53 = arith.constant 0 : index
    %73 = vector.load %arg10[%c0_51, %c2, %c0_52, %c0_53] : memref<2x4x32x32xf32, #tpu.memory_space<vmem>>, vector<1x1x32x32xf32>
    %74 = vector.shape_cast %73 : vector<1x1x32x32xf32> to vector<32x32xf32>
    %75 = arith.truncf %50 : vector<32x32xf32> to vector<32x32xbf16>
    %76 = arith.truncf %74 : vector<32x32xf32> to vector<32x32xbf16>
    %cst_54 = arith.constant dense<0.000000e+00> : vector<32x32xf32>
    %77 = tpu.matmul %75, %76, %cst_54 {dimension_numbers = #tpu.dot_dimension_numbers<[1], [0], [0], [1], [0, 0, 1, 1], [], []>} : vector<32x32xbf16>, vector<32x32xbf16>, vector<32x32xf32> -> vector<32x32xf32>
    %c0_55 = arith.constant 0 : index
    %c2_56 = arith.constant 2 : index
    %c0_57 = arith.constant 0 : index
    %c0_58 = arith.constant 0 : index
    %78 = vector.load %arg11[%c0_55, %c2_56, %c0_57, %c0_58] : memref<2x4x1x32xf32, #tpu.memory_space<vmem>>, vector<1x1x1x32xf32>
    %79 = vector.shape_cast %78 : vector<1x1x1x32xf32> to vector<1x32xf32>
    %80 = vector.broadcast %79 : vector<1x32xf32> to vector<32x32xf32>
    %81 = arith.addf %77, %80 : vector<32x32xf32>
    %82 = vector.shape_cast %81 : vector<32x32xf32> to vector<2x16x32xf32>
    %83 = vector.shape_cast %62 : vector<2x16x32xf32> to vector<2x1x16x32xf32>
    %84 = vector.shape_cast %51 : vector<4x1x32xf32> to vector<1x4x1x32xf32>
    %85 = vector.broadcast %83 : vector<2x1x16x32xf32> to vector<2x4x16x32xf32>
    %86 = vector.broadcast %84 : vector<1x4x1x32xf32> to vector<2x4x16x32xf32>
    %87 = arith.mulf %85, %86 : vector<2x4x16x32xf32>
    %88 = vector.shape_cast %87 : vector<2x4x16x32xf32> to vector<8x16x32xf32>
    %89 = vector.shape_cast %82 : vector<2x16x32xf32> to vector<2x1x16x32xf32>
    %90 = vector.shape_cast %51 : vector<4x1x32xf32> to vector<1x4x1x32xf32>
    %91 = vector.broadcast %89 : vector<2x1x16x32xf32> to vector<2x4x16x32xf32>
    %92 = vector.broadcast %90 : vector<1x4x1x32xf32> to vector<2x4x16x32xf32>
    %93 = arith.mulf %91, %92 : vector<2x4x16x32xf32>
    %94 = vector.shape_cast %93 : vector<2x4x16x32xf32> to vector<8x16x32xf32>
    %95 = vector.shape_cast %72 : vector<2x16x32xf32> to vector<2x1x16x32xf32>
    %96 = vector.shape_cast %95 : vector<2x1x16x32xf32> to vector<2x1x16x32xf32>
    %97 = vector.broadcast %96 : vector<2x1x16x32xf32> to vector<2x4x16x32xf32>
    %98 = vector.shape_cast %97 : vector<2x4x16x32xf32> to vector<8x16x32xf32>
    %99 = arith.truncf %88 : vector<8x16x32xf32> to vector<8x16x32xbf16>
    %100 = arith.truncf %98 : vector<8x16x32xf32> to vector<8x16x32xbf16>
    "tpu.trace_start"() <{level = 10 : i32, message = "bsd,btd->bst"}> : () -> ()
    %cst_59 = arith.constant dense<0.000000e+00> : vector<8x16x16xf32>
    %101 = tpu.matmul %99, %100, %cst_59 {dimension_numbers = #tpu.dot_dimension_numbers<[2], [2], [1], [1], [0, 0, 0, 1, 1, 1], [0], [0]>} : vector<8x16x32xbf16>, vector<8x16x32xbf16>, vector<8x16x16xf32> -> vector<8x16x16xf32>
    "tpu.trace_stop"() : () -> ()
    %cst_60 = arith.constant 0.353553385 : f32
    %102 = vector.broadcast %cst_60 : f32 to vector<8x16x16xf32>
    %103 = arith.mulf %101, %102 : vector<8x16x16xf32>
    %104 = vector.shape_cast %52 : vector<1x16xf32> to vector<1x1x16xf32>
    %105 = vector.broadcast %104 : vector<1x1x16xf32> to vector<8x16x16xf32>
    %106 = arith.addf %103, %105 : vector<8x16x16xf32>
    %cst_61 = arith.constant dense<0xFF800000> : vector<8x16xf32>
    %107 = vector.multi_reduction <maximumf>, %106, %cst_61 [2] : vector<8x16x16xf32> to vector<8x16xf32>
    %108 = vector.shape_cast %107 : vector<8x16xf32> to vector<8x16x1xf32>
    %109 = vector.broadcast %108 : vector<8x16x1xf32> to vector<8x16x16xf32>
    %110 = arith.subf %106, %109 : vector<8x16x16xf32>
    %111 = math.exp %110 : vector<8x16x16xf32>
    %cst_62 = arith.constant dense<0.000000e+00> : vector<8x16xf32>
    %112 = vector.multi_reduction <add>, %111, %cst_62 [2] : vector<8x16x16xf32> to vector<8x16xf32>
    %113 = vector.shape_cast %112 : vector<8x16xf32> to vector<8x16x1xf32>
    %114 = tpu.reciprocal %113 {approx = true} : vector<8x16x1xf32> -> vector<8x16x1xf32>
    %115 = vector.broadcast %114 : vector<8x16x1xf32> to vector<8x16x16xf32>
    %116 = arith.mulf %111, %115 : vector<8x16x16xf32>
    %117 = arith.truncf %116 : vector<8x16x16xf32> to vector<8x16x16xbf16>
    %118 = arith.truncf %94 : vector<8x16x32xf32> to vector<8x16x32xbf16>
    "tpu.trace_start"() <{level = 10 : i32, message = "bst,btd->bsd"}> : () -> ()
    %cst_63 = arith.constant dense<0.000000e+00> : vector<8x16x32xf32>
    %119 = tpu.matmul %117, %118, %cst_63 {dimension_numbers = #tpu.dot_dimension_numbers<[2], [1], [1], [2], [0, 0, 0, 1, 1, 2], [0], [0]>} : vector<8x16x16xbf16>, vector<8x16x32xbf16>, vector<8x16x32xf32> -> vector<8x16x32xf32>
    "tpu.trace_stop"() : () -> ()
    %120 = vector.shape_cast %119 : vector<8x16x32xf32> to vector<2x4x16x32xf32>
    %121 = vector.extract_strided_slice %120 {offsets = [0, 0, 0, 0], sizes = [2, 1, 16, 32], strides = [1, 1, 1, 1]} : vector<2x4x16x32xf32> to vector<2x1x16x32xf32>
    %122 = vector.shape_cast %121 : vector<2x1x16x32xf32> to vector<2x16x32xf32>
    %123 = vector.extract_strided_slice %120 {offsets = [0, 1, 0, 0], sizes = [2, 1, 16, 32], strides = [1, 1, 1, 1]} : vector<2x4x16x32xf32> to vector<2x1x16x32xf32>
    %124 = vector.shape_cast %123 : vector<2x1x16x32xf32> to vector<2x16x32xf32>
    %125 = arith.addf %122, %124 : vector<2x16x32xf32>
    %126 = vector.extract_strided_slice %120 {offsets = [0, 2, 0, 0], sizes = [2, 1, 16, 32], strides = [1, 1, 1, 1]} : vector<2x4x16x32xf32> to vector<2x1x16x32xf32>
    %127 = vector.shape_cast %126 : vector<2x1x16x32xf32> to vector<2x16x32xf32>
    %128 = arith.addf %125, %127 : vector<2x16x32xf32>
    %129 = vector.extract_strided_slice %120 {offsets = [0, 3, 0, 0], sizes = [2, 1, 16, 32], strides = [1, 1, 1, 1]} : vector<2x4x16x32xf32> to vector<2x1x16x32xf32>
    %130 = vector.shape_cast %129 : vector<2x1x16x32xf32> to vector<2x16x32xf32>
    %131 = arith.addf %128, %130 : vector<2x16x32xf32>
    %132 = vector.shape_cast %131 : vector<2x16x32xf32> to vector<32x32xf32>
    %c0_64 = arith.constant 0 : index
    %c3 = arith.constant 3 : index
    %c0_65 = arith.constant 0 : index
    %c0_66 = arith.constant 0 : index
    %133 = vector.load %arg10[%c0_64, %c3, %c0_65, %c0_66] : memref<2x4x32x32xf32, #tpu.memory_space<vmem>>, vector<1x1x32x32xf32>
    %134 = vector.shape_cast %133 : vector<1x1x32x32xf32> to vector<32x32xf32>
    %135 = arith.truncf %132 : vector<32x32xf32> to vector<32x32xbf16>
    %136 = arith.truncf %134 : vector<32x32xf32> to vector<32x32xbf16>
    %cst_67 = arith.constant dense<0.000000e+00> : vector<32x32xf32>
    %137 = tpu.matmul %135, %136, %cst_67 {dimension_numbers = #tpu.dot_dimension_numbers<[1], [0], [0], [1], [0, 0, 1, 1], [], []>} : vector<32x32xbf16>, vector<32x32xbf16>, vector<32x32xf32> -> vector<32x32xf32>
    %c0_68 = arith.constant 0 : index
    %c3_69 = arith.constant 3 : index
    %c0_70 = arith.constant 0 : index
    %c0_71 = arith.constant 0 : index
    %138 = vector.load %arg11[%c0_68, %c3_69, %c0_70, %c0_71] : memref<2x4x1x32xf32, #tpu.memory_space<vmem>>, vector<1x1x1x32xf32>
    %139 = vector.shape_cast %138 : vector<1x1x1x32xf32> to vector<1x32xf32>
    %140 = vector.broadcast %139 : vector<1x32xf32> to vector<32x32xf32>
    %141 = arith.addf %137, %140 : vector<32x32xf32>
    %142 = arith.addf %50, %141 : vector<32x32xf32>
    %c0_72 = arith.constant 0 : index
    %c0_73 = arith.constant 0 : index
    %c0_74 = arith.constant 0 : index
    %c0_75 = arith.constant 0 : index
    %143 = vector.load %arg12[%c0_72, %c0_73, %c0_74, %c0_75] : memref<2x2x1x32xf32, #tpu.memory_space<vmem>>, vector<1x1x1x32xf32>
    %144 = vector.shape_cast %143 : vector<1x1x1x32xf32> to vector<1x32xf32>
    %c0_76 = arith.constant 0 : index
    %c0_77 = arith.constant 0 : index
    %c0_78 = arith.constant 0 : index
    %c0_79 = arith.constant 0 : index
    %145 = vector.load %arg13[%c0_76, %c0_77, %c0_78, %c0_79] : memref<2x2x1x32xf32, #tpu.memory_space<vmem>>, vector<1x1x1x32xf32>
    %146 = vector.shape_cast %145 : vector<1x1x1x32xf32> to vector<1x32xf32>
    %cst_80 = arith.constant dense<0.000000e+00> : vector<32xf32>
    %147 = vector.multi_reduction <add>, %142, %cst_80 [1] : vector<32x32xf32> to vector<32xf32>
    %148 = vector.shape_cast %147 : vector<32xf32> to vector<32x1xf32>
    %cst_81 = arith.constant 3.200000e+01 : f32
    %149 = vector.broadcast %cst_81 : f32 to vector<32x1xf32>
    %150 = arith.divf %148, %149 : vector<32x1xf32>
    %151 = vector.broadcast %150 : vector<32x1xf32> to vector<32x32xf32>
    %152 = arith.subf %142, %151 : vector<32x32xf32>
    %153 = arith.mulf %152, %152 : vector<32x32xf32>
    %cst_82 = arith.constant dense<0.000000e+00> : vector<32xf32>
    %154 = vector.multi_reduction <add>, %153, %cst_82 [1] : vector<32x32xf32> to vector<32xf32>
    %155 = vector.shape_cast %154 : vector<32xf32> to vector<32x1xf32>
    %cst_83 = arith.constant 3.200000e+01 : f32
    %156 = vector.broadcast %cst_83 : f32 to vector<32x1xf32>
    %157 = arith.divf %155, %156 : vector<32x1xf32>
    %158 = vector.broadcast %150 : vector<32x1xf32> to vector<32x32xf32>
    %159 = arith.subf %142, %158 : vector<32x32xf32>
    %cst_84 = arith.constant 9.99999974E-6 : f32
    %160 = vector.broadcast %cst_84 : f32 to vector<32x1xf32>
    %161 = arith.addf %157, %160 : vector<32x1xf32>
    %162 = math.rsqrt %161 : vector<32x1xf32>
    %163 = vector.broadcast %162 : vector<32x1xf32> to vector<32x32xf32>
    %164 = arith.mulf %159, %163 : vector<32x32xf32>
    %165 = vector.broadcast %144 : vector<1x32xf32> to vector<32x32xf32>
    %166 = arith.mulf %164, %165 : vector<32x32xf32>
    %167 = vector.broadcast %146 : vector<1x32xf32> to vector<32x32xf32>
    %168 = arith.addf %166, %167 : vector<32x32xf32>
    %c0_85 = arith.constant 0 : index
    %c0_86 = arith.constant 0 : index
    %c0_87 = arith.constant 0 : index
    %169 = vector.load %arg14[%c0_85, %c0_86, %c0_87] : memref<2x32x64xf32, #tpu.memory_space<vmem>>, vector<1x32x64xf32>
    %170 = vector.shape_cast %169 : vector<1x32x64xf32> to vector<32x64xf32>
    %171 = arith.truncf %168 : vector<32x32xf32> to vector<32x32xbf16>
    %172 = arith.truncf %170 : vector<32x64xf32> to vector<32x64xbf16>
    %cst_88 = arith.constant dense<0.000000e+00> : vector<32x64xf32>
    %173 = tpu.matmul %171, %172, %cst_88 {dimension_numbers = #tpu.dot_dimension_numbers<[1], [0], [0], [1], [0, 0, 1, 1], [], []>} : vector<32x32xbf16>, vector<32x64xbf16>, vector<32x64xf32> -> vector<32x64xf32>
    %c0_89 = arith.constant 0 : index
    %c0_90 = arith.constant 0 : index
    %c0_91 = arith.constant 0 : index
    %174 = vector.load %arg15[%c0_89, %c0_90, %c0_91] : memref<2x1x64xf32, #tpu.memory_space<vmem>>, vector<1x1x64xf32>
    %175 = vector.shape_cast %174 : vector<1x1x64xf32> to vector<1x64xf32>
    %176 = vector.broadcast %175 : vector<1x64xf32> to vector<32x64xf32>
    %177 = arith.addf %173, %176 : vector<32x64xf32>
    %cst_92 = arith.constant 5.000000e-01 : f32
    %178 = vector.broadcast %cst_92 : f32 to vector<32x64xf32>
    %179 = arith.mulf %178, %177 : vector<32x64xf32>
    %cst_93 = arith.constant 0.707106769 : f32
    %180 = vector.broadcast %cst_93 : f32 to vector<32x64xf32>
    %181 = arith.mulf %177, %180 : vector<32x64xf32>
    %182 = math.erf %181 : vector<32x64xf32>
    %cst_94 = arith.constant 1.000000e+00 : f32
    %183 = vector.broadcast %cst_94 : f32 to vector<32x64xf32>
    %184 = arith.addf %183, %182 : vector<32x64xf32>
    %185 = arith.mulf %179, %184 : vector<32x64xf32>
    %c0_95 = arith.constant 0 : index
    %c0_96 = arith.constant 0 : index
    %c0_97 = arith.constant 0 : index
    %186 = vector.load %arg16[%c0_95, %c0_96, %c0_97] : memref<2x64x32xf32, #tpu.memory_space<vmem>>, vector<1x64x32xf32>
    %187 = vector.shape_cast %186 : vector<1x64x32xf32> to vector<64x32xf32>
    %188 = arith.truncf %185 : vector<32x64xf32> to vector<32x64xbf16>
    %189 = arith.truncf %187 : vector<64x32xf32> to vector<64x32xbf16>
    %cst_98 = arith.constant dense<0.000000e+00> : vector<32x32xf32>
    %190 = tpu.matmul %188, %189, %cst_98 {dimension_numbers = #tpu.dot_dimension_numbers<[1], [0], [0], [1], [0, 0, 1, 1], [], []>} : vector<32x64xbf16>, vector<64x32xbf16>, vector<32x32xf32> -> vector<32x32xf32>
    %c0_99 = arith.constant 0 : index
    %c0_100 = arith.constant 0 : index
    %c0_101 = arith.constant 0 : index
    %191 = vector.load %arg17[%c0_99, %c0_100, %c0_101] : memref<2x1x32xf32, #tpu.memory_space<vmem>>, vector<1x1x32xf32>
    %192 = vector.shape_cast %191 : vector<1x1x32xf32> to vector<1x32xf32>
    %193 = vector.broadcast %192 : vector<1x32xf32> to vector<32x32xf32>
    %194 = arith.addf %190, %193 : vector<32x32xf32>
    %195 = arith.addf %168, %194 : vector<32x32xf32>
    %c0_102 = arith.constant 0 : index
    %c1_103 = arith.constant 1 : index
    %c0_104 = arith.constant 0 : index
    %c0_105 = arith.constant 0 : index
    %196 = vector.load %arg12[%c0_102, %c1_103, %c0_104, %c0_105] : memref<2x2x1x32xf32, #tpu.memory_space<vmem>>, vector<1x1x1x32xf32>
    %197 = vector.shape_cast %196 : vector<1x1x1x32xf32> to vector<1x32xf32>
    %c0_106 = arith.constant 0 : index
    %c1_107 = arith.constant 1 : index
    %c0_108 = arith.constant 0 : index
    %c0_109 = arith.constant 0 : index
    %198 = vector.load %arg13[%c0_106, %c1_107, %c0_108, %c0_109] : memref<2x2x1x32xf32, #tpu.memory_space<vmem>>, vector<1x1x1x32xf32>
    %199 = vector.shape_cast %198 : vector<1x1x1x32xf32> to vector<1x32xf32>
    %cst_110 = arith.constant dense<0.000000e+00> : vector<32xf32>
    %200 = vector.multi_reduction <add>, %195, %cst_110 [1] : vector<32x32xf32> to vector<32xf32>
    %201 = vector.shape_cast %200 : vector<32xf32> to vector<32x1xf32>
    %cst_111 = arith.constant 3.200000e+01 : f32
    %202 = vector.broadcast %cst_111 : f32 to vector<32x1xf32>
    %203 = arith.divf %201, %202 : vector<32x1xf32>
    %204 = vector.broadcast %203 : vector<32x1xf32> to vector<32x32xf32>
    %205 = arith.subf %195, %204 : vector<32x32xf32>
    %206 = arith.mulf %205, %205 : vector<32x32xf32>
    %cst_112 = arith.constant dense<0.000000e+00> : vector<32xf32>
    %207 = vector.multi_reduction <add>, %206, %cst_112 [1] : vector<32x32xf32> to vector<32xf32>
    %208 = vector.shape_cast %207 : vector<32xf32> to vector<32x1xf32>
    %cst_113 = arith.constant 3.200000e+01 : f32
    %209 = vector.broadcast %cst_113 : f32 to vector<32x1xf32>
    %210 = arith.divf %208, %209 : vector<32x1xf32>
    %211 = vector.broadcast %203 : vector<32x1xf32> to vector<32x32xf32>
    %212 = arith.subf %195, %211 : vector<32x32xf32>
    %cst_114 = arith.constant 9.99999974E-6 : f32
    %213 = vector.broadcast %cst_114 : f32 to vector<32x1xf32>
    %214 = arith.addf %210, %213 : vector<32x1xf32>
    %215 = math.rsqrt %214 : vector<32x1xf32>
    %216 = vector.broadcast %215 : vector<32x1xf32> to vector<32x32xf32>
    %217 = arith.mulf %212, %216 : vector<32x32xf32>
    %218 = vector.broadcast %197 : vector<1x32xf32> to vector<32x32xf32>
    %219 = arith.mulf %217, %218 : vector<32x32xf32>
    %220 = vector.broadcast %199 : vector<1x32xf32> to vector<32x32xf32>
    %221 = arith.addf %219, %220 : vector<32x32xf32>
    %c1_115 = arith.constant 1 : index
    %c0_116 = arith.constant 0 : index
    %c0_117 = arith.constant 0 : index
    %c0_118 = arith.constant 0 : index
    %222 = vector.load %arg10[%c1_115, %c0_116, %c0_117, %c0_118] : memref<2x4x32x32xf32, #tpu.memory_space<vmem>>, vector<1x1x32x32xf32>
    %223 = vector.shape_cast %222 : vector<1x1x32x32xf32> to vector<32x32xf32>
    %224 = arith.truncf %221 : vector<32x32xf32> to vector<32x32xbf16>
    %225 = arith.truncf %223 : vector<32x32xf32> to vector<32x32xbf16>
    %cst_119 = arith.constant dense<0.000000e+00> : vector<32x32xf32>
    %226 = tpu.matmul %224, %225, %cst_119 {dimension_numbers = #tpu.dot_dimension_numbers<[1], [0], [0], [1], [0, 0, 1, 1], [], []>} : vector<32x32xbf16>, vector<32x32xbf16>, vector<32x32xf32> -> vector<32x32xf32>
    %c1_120 = arith.constant 1 : index
    %c0_121 = arith.constant 0 : index
    %c0_122 = arith.constant 0 : index
    %c0_123 = arith.constant 0 : index
    %227 = vector.load %arg11[%c1_120, %c0_121, %c0_122, %c0_123] : memref<2x4x1x32xf32, #tpu.memory_space<vmem>>, vector<1x1x1x32xf32>
    %228 = vector.shape_cast %227 : vector<1x1x1x32xf32> to vector<1x32xf32>
    %229 = vector.broadcast %228 : vector<1x32xf32> to vector<32x32xf32>
    %230 = arith.addf %226, %229 : vector<32x32xf32>
    %231 = vector.shape_cast %230 : vector<32x32xf32> to vector<2x16x32xf32>
    %c1_124 = arith.constant 1 : index
    %c1_125 = arith.constant 1 : index
    %c0_126 = arith.constant 0 : index
    %c0_127 = arith.constant 0 : index
    %232 = vector.load %arg10[%c1_124, %c1_125, %c0_126, %c0_127] : memref<2x4x32x32xf32, #tpu.memory_space<vmem>>, vector<1x1x32x32xf32>
    %233 = vector.shape_cast %232 : vector<1x1x32x32xf32> to vector<32x32xf32>
    %234 = arith.truncf %221 : vector<32x32xf32> to vector<32x32xbf16>
    %235 = arith.truncf %233 : vector<32x32xf32> to vector<32x32xbf16>
    %cst_128 = arith.constant dense<0.000000e+00> : vector<32x32xf32>
    %236 = tpu.matmul %234, %235, %cst_128 {dimension_numbers = #tpu.dot_dimension_numbers<[1], [0], [0], [1], [0, 0, 1, 1], [], []>} : vector<32x32xbf16>, vector<32x32xbf16>, vector<32x32xf32> -> vector<32x32xf32>
    %c1_129 = arith.constant 1 : index
    %c1_130 = arith.constant 1 : index
    %c0_131 = arith.constant 0 : index
    %c0_132 = arith.constant 0 : index
    %237 = vector.load %arg11[%c1_129, %c1_130, %c0_131, %c0_132] : memref<2x4x1x32xf32, #tpu.memory_space<vmem>>, vector<1x1x1x32xf32>
    %238 = vector.shape_cast %237 : vector<1x1x1x32xf32> to vector<1x32xf32>
    %239 = vector.broadcast %238 : vector<1x32xf32> to vector<32x32xf32>
    %240 = arith.addf %236, %239 : vector<32x32xf32>
    %241 = vector.shape_cast %240 : vector<32x32xf32> to vector<2x16x32xf32>
    %c1_133 = arith.constant 1 : index
    %c2_134 = arith.constant 2 : index
    %c0_135 = arith.constant 0 : index
    %c0_136 = arith.constant 0 : index
    %242 = vector.load %arg10[%c1_133, %c2_134, %c0_135, %c0_136] : memref<2x4x32x32xf32, #tpu.memory_space<vmem>>, vector<1x1x32x32xf32>
    %243 = vector.shape_cast %242 : vector<1x1x32x32xf32> to vector<32x32xf32>
    %244 = arith.truncf %221 : vector<32x32xf32> to vector<32x32xbf16>
    %245 = arith.truncf %243 : vector<32x32xf32> to vector<32x32xbf16>
    %cst_137 = arith.constant dense<0.000000e+00> : vector<32x32xf32>
    %246 = tpu.matmul %244, %245, %cst_137 {dimension_numbers = #tpu.dot_dimension_numbers<[1], [0], [0], [1], [0, 0, 1, 1], [], []>} : vector<32x32xbf16>, vector<32x32xbf16>, vector<32x32xf32> -> vector<32x32xf32>
    %c1_138 = arith.constant 1 : index
    %c2_139 = arith.constant 2 : index
    %c0_140 = arith.constant 0 : index
    %c0_141 = arith.constant 0 : index
    %247 = vector.load %arg11[%c1_138, %c2_139, %c0_140, %c0_141] : memref<2x4x1x32xf32, #tpu.memory_space<vmem>>, vector<1x1x1x32xf32>
    %248 = vector.shape_cast %247 : vector<1x1x1x32xf32> to vector<1x32xf32>
    %249 = vector.broadcast %248 : vector<1x32xf32> to vector<32x32xf32>
    %250 = arith.addf %246, %249 : vector<32x32xf32>
    %251 = vector.shape_cast %250 : vector<32x32xf32> to vector<2x16x32xf32>
    %252 = vector.shape_cast %231 : vector<2x16x32xf32> to vector<2x1x16x32xf32>
    %253 = vector.shape_cast %51 : vector<4x1x32xf32> to vector<1x4x1x32xf32>
    %254 = vector.broadcast %252 : vector<2x1x16x32xf32> to vector<2x4x16x32xf32>
    %255 = vector.broadcast %253 : vector<1x4x1x32xf32> to vector<2x4x16x32xf32>
    %256 = arith.mulf %254, %255 : vector<2x4x16x32xf32>
    %257 = vector.shape_cast %256 : vector<2x4x16x32xf32> to vector<8x16x32xf32>
    %258 = vector.shape_cast %251 : vector<2x16x32xf32> to vector<2x1x16x32xf32>
    %259 = vector.shape_cast %51 : vector<4x1x32xf32> to vector<1x4x1x32xf32>
    %260 = vector.broadcast %258 : vector<2x1x16x32xf32> to vector<2x4x16x32xf32>
    %261 = vector.broadcast %259 : vector<1x4x1x32xf32> to vector<2x4x16x32xf32>
    %262 = arith.mulf %260, %261 : vector<2x4x16x32xf32>
    %263 = vector.shape_cast %262 : vector<2x4x16x32xf32> to vector<8x16x32xf32>
    %264 = vector.shape_cast %241 : vector<2x16x32xf32> to vector<2x1x16x32xf32>
    %265 = vector.shape_cast %264 : vector<2x1x16x32xf32> to vector<2x1x16x32xf32>
    %266 = vector.broadcast %265 : vector<2x1x16x32xf32> to vector<2x4x16x32xf32>
    %267 = vector.shape_cast %266 : vector<2x4x16x32xf32> to vector<8x16x32xf32>
    %268 = arith.truncf %257 : vector<8x16x32xf32> to vector<8x16x32xbf16>
    %269 = arith.truncf %267 : vector<8x16x32xf32> to vector<8x16x32xbf16>
    "tpu.trace_start"() <{level = 10 : i32, message = "bsd,btd->bst"}> : () -> ()
    %cst_142 = arith.constant dense<0.000000e+00> : vector<8x16x16xf32>
    %270 = tpu.matmul %268, %269, %cst_142 {dimension_numbers = #tpu.dot_dimension_numbers<[2], [2], [1], [1], [0, 0, 0, 1, 1, 1], [0], [0]>} : vector<8x16x32xbf16>, vector<8x16x32xbf16>, vector<8x16x16xf32> -> vector<8x16x16xf32>
    "tpu.trace_stop"() : () -> ()
    %cst_143 = arith.constant 0.353553385 : f32
    %271 = vector.broadcast %cst_143 : f32 to vector<8x16x16xf32>
    %272 = arith.mulf %270, %271 : vector<8x16x16xf32>
    %273 = vector.shape_cast %52 : vector<1x16xf32> to vector<1x1x16xf32>
    %274 = vector.broadcast %273 : vector<1x1x16xf32> to vector<8x16x16xf32>
    %275 = arith.addf %272, %274 : vector<8x16x16xf32>
    %cst_144 = arith.constant dense<0xFF800000> : vector<8x16xf32>
    %276 = vector.multi_reduction <maximumf>, %275, %cst_144 [2] : vector<8x16x16xf32> to vector<8x16xf32>
    %277 = vector.shape_cast %276 : vector<8x16xf32> to vector<8x16x1xf32>
    %278 = vector.broadcast %277 : vector<8x16x1xf32> to vector<8x16x16xf32>
    %279 = arith.subf %275, %278 : vector<8x16x16xf32>
    %280 = math.exp %279 : vector<8x16x16xf32>
    %cst_145 = arith.constant dense<0.000000e+00> : vector<8x16xf32>
    %281 = vector.multi_reduction <add>, %280, %cst_145 [2] : vector<8x16x16xf32> to vector<8x16xf32>
    %282 = vector.shape_cast %281 : vector<8x16xf32> to vector<8x16x1xf32>
    %283 = tpu.reciprocal %282 {approx = true} : vector<8x16x1xf32> -> vector<8x16x1xf32>
    %284 = vector.broadcast %283 : vector<8x16x1xf32> to vector<8x16x16xf32>
    %285 = arith.mulf %280, %284 : vector<8x16x16xf32>
    %286 = arith.truncf %285 : vector<8x16x16xf32> to vector<8x16x16xbf16>
    %287 = arith.truncf %263 : vector<8x16x32xf32> to vector<8x16x32xbf16>
    "tpu.trace_start"() <{level = 10 : i32, message = "bst,btd->bsd"}> : () -> ()
    %cst_146 = arith.constant dense<0.000000e+00> : vector<8x16x32xf32>
    %288 = tpu.matmul %286, %287, %cst_146 {dimension_numbers = #tpu.dot_dimension_numbers<[2], [1], [1], [2], [0, 0, 0, 1, 1, 2], [0], [0]>} : vector<8x16x16xbf16>, vector<8x16x32xbf16>, vector<8x16x32xf32> -> vector<8x16x32xf32>
    "tpu.trace_stop"() : () -> ()
    %289 = vector.shape_cast %288 : vector<8x16x32xf32> to vector<2x4x16x32xf32>
    %290 = vector.extract_strided_slice %289 {offsets = [0, 0, 0, 0], sizes = [2, 1, 16, 32], strides = [1, 1, 1, 1]} : vector<2x4x16x32xf32> to vector<2x1x16x32xf32>
    %291 = vector.shape_cast %290 : vector<2x1x16x32xf32> to vector<2x16x32xf32>
    %292 = vector.extract_strided_slice %289 {offsets = [0, 1, 0, 0], sizes = [2, 1, 16, 32], strides = [1, 1, 1, 1]} : vector<2x4x16x32xf32> to vector<2x1x16x32xf32>
    %293 = vector.shape_cast %292 : vector<2x1x16x32xf32> to vector<2x16x32xf32>
    %294 = arith.addf %291, %293 : vector<2x16x32xf32>
    %295 = vector.extract_strided_slice %289 {offsets = [0, 2, 0, 0], sizes = [2, 1, 16, 32], strides = [1, 1, 1, 1]} : vector<2x4x16x32xf32> to vector<2x1x16x32xf32>
    %296 = vector.shape_cast %295 : vector<2x1x16x32xf32> to vector<2x16x32xf32>
    %297 = arith.addf %294, %296 : vector<2x16x32xf32>
    %298 = vector.extract_strided_slice %289 {offsets = [0, 3, 0, 0], sizes = [2, 1, 16, 32], strides = [1, 1, 1, 1]} : vector<2x4x16x32xf32> to vector<2x1x16x32xf32>
    %299 = vector.shape_cast %298 : vector<2x1x16x32xf32> to vector<2x16x32xf32>
    %300 = arith.addf %297, %299 : vector<2x16x32xf32>
    %301 = vector.shape_cast %300 : vector<2x16x32xf32> to vector<32x32xf32>
    %c1_147 = arith.constant 1 : index
    %c3_148 = arith.constant 3 : index
    %c0_149 = arith.constant 0 : index
    %c0_150 = arith.constant 0 : index
    %302 = vector.load %arg10[%c1_147, %c3_148, %c0_149, %c0_150] : memref<2x4x32x32xf32, #tpu.memory_space<vmem>>, vector<1x1x32x32xf32>
    %303 = vector.shape_cast %302 : vector<1x1x32x32xf32> to vector<32x32xf32>
    %304 = arith.truncf %301 : vector<32x32xf32> to vector<32x32xbf16>
    %305 = arith.truncf %303 : vector<32x32xf32> to vector<32x32xbf16>
    %cst_151 = arith.constant dense<0.000000e+00> : vector<32x32xf32>
    %306 = tpu.matmul %304, %305, %cst_151 {dimension_numbers = #tpu.dot_dimension_numbers<[1], [0], [0], [1], [0, 0, 1, 1], [], []>} : vector<32x32xbf16>, vector<32x32xbf16>, vector<32x32xf32> -> vector<32x32xf32>
    %c1_152 = arith.constant 1 : index
    %c3_153 = arith.constant 3 : index
    %c0_154 = arith.constant 0 : index
    %c0_155 = arith.constant 0 : index
    %307 = vector.load %arg11[%c1_152, %c3_153, %c0_154, %c0_155] : memref<2x4x1x32xf32, #tpu.memory_space<vmem>>, vector<1x1x1x32xf32>
    %308 = vector.shape_cast %307 : vector<1x1x1x32xf32> to vector<1x32xf32>
    %309 = vector.broadcast %308 : vector<1x32xf32> to vector<32x32xf32>
    %310 = arith.addf %306, %309 : vector<32x32xf32>
    %311 = arith.addf %221, %310 : vector<32x32xf32>
    %c1_156 = arith.constant 1 : index
    %c0_157 = arith.constant 0 : index
    %c0_158 = arith.constant 0 : index
    %c0_159 = arith.constant 0 : index
    %312 = vector.load %arg12[%c1_156, %c0_157, %c0_158, %c0_159] : memref<2x2x1x32xf32, #tpu.memory_space<vmem>>, vector<1x1x1x32xf32>
    %313 = vector.shape_cast %312 : vector<1x1x1x32xf32> to vector<1x32xf32>
    %c1_160 = arith.constant 1 : index
    %c0_161 = arith.constant 0 : index
    %c0_162 = arith.constant 0 : index
    %c0_163 = arith.constant 0 : index
    %314 = vector.load %arg13[%c1_160, %c0_161, %c0_162, %c0_163] : memref<2x2x1x32xf32, #tpu.memory_space<vmem>>, vector<1x1x1x32xf32>
    %315 = vector.shape_cast %314 : vector<1x1x1x32xf32> to vector<1x32xf32>
    %cst_164 = arith.constant dense<0.000000e+00> : vector<32xf32>
    %316 = vector.multi_reduction <add>, %311, %cst_164 [1] : vector<32x32xf32> to vector<32xf32>
    %317 = vector.shape_cast %316 : vector<32xf32> to vector<32x1xf32>
    %cst_165 = arith.constant 3.200000e+01 : f32
    %318 = vector.broadcast %cst_165 : f32 to vector<32x1xf32>
    %319 = arith.divf %317, %318 : vector<32x1xf32>
    %320 = vector.broadcast %319 : vector<32x1xf32> to vector<32x32xf32>
    %321 = arith.subf %311, %320 : vector<32x32xf32>
    %322 = arith.mulf %321, %321 : vector<32x32xf32>
    %cst_166 = arith.constant dense<0.000000e+00> : vector<32xf32>
    %323 = vector.multi_reduction <add>, %322, %cst_166 [1] : vector<32x32xf32> to vector<32xf32>
    %324 = vector.shape_cast %323 : vector<32xf32> to vector<32x1xf32>
    %cst_167 = arith.constant 3.200000e+01 : f32
    %325 = vector.broadcast %cst_167 : f32 to vector<32x1xf32>
    %326 = arith.divf %324, %325 : vector<32x1xf32>
    %327 = vector.broadcast %319 : vector<32x1xf32> to vector<32x32xf32>
    %328 = arith.subf %311, %327 : vector<32x32xf32>
    %cst_168 = arith.constant 9.99999974E-6 : f32
    %329 = vector.broadcast %cst_168 : f32 to vector<32x1xf32>
    %330 = arith.addf %326, %329 : vector<32x1xf32>
    %331 = math.rsqrt %330 : vector<32x1xf32>
    %332 = vector.broadcast %331 : vector<32x1xf32> to vector<32x32xf32>
    %333 = arith.mulf %328, %332 : vector<32x32xf32>
    %334 = vector.broadcast %313 : vector<1x32xf32> to vector<32x32xf32>
    %335 = arith.mulf %333, %334 : vector<32x32xf32>
    %336 = vector.broadcast %315 : vector<1x32xf32> to vector<32x32xf32>
    %337 = arith.addf %335, %336 : vector<32x32xf32>
    %c1_169 = arith.constant 1 : index
    %c0_170 = arith.constant 0 : index
    %c0_171 = arith.constant 0 : index
    %338 = vector.load %arg14[%c1_169, %c0_170, %c0_171] : memref<2x32x64xf32, #tpu.memory_space<vmem>>, vector<1x32x64xf32>
    %339 = vector.shape_cast %338 : vector<1x32x64xf32> to vector<32x64xf32>
    %340 = arith.truncf %337 : vector<32x32xf32> to vector<32x32xbf16>
    %341 = arith.truncf %339 : vector<32x64xf32> to vector<32x64xbf16>
    %cst_172 = arith.constant dense<0.000000e+00> : vector<32x64xf32>
    %342 = tpu.matmul %340, %341, %cst_172 {dimension_numbers = #tpu.dot_dimension_numbers<[1], [0], [0], [1], [0, 0, 1, 1], [], []>} : vector<32x32xbf16>, vector<32x64xbf16>, vector<32x64xf32> -> vector<32x64xf32>
    %c1_173 = arith.constant 1 : index
    %c0_174 = arith.constant 0 : index
    %c0_175 = arith.constant 0 : index
    %343 = vector.load %arg15[%c1_173, %c0_174, %c0_175] : memref<2x1x64xf32, #tpu.memory_space<vmem>>, vector<1x1x64xf32>
    %344 = vector.shape_cast %343 : vector<1x1x64xf32> to vector<1x64xf32>
    %345 = vector.broadcast %344 : vector<1x64xf32> to vector<32x64xf32>
    %346 = arith.addf %342, %345 : vector<32x64xf32>
    %cst_176 = arith.constant 5.000000e-01 : f32
    %347 = vector.broadcast %cst_176 : f32 to vector<32x64xf32>
    %348 = arith.mulf %347, %346 : vector<32x64xf32>
    %cst_177 = arith.constant 0.707106769 : f32
    %349 = vector.broadcast %cst_177 : f32 to vector<32x64xf32>
    %350 = arith.mulf %346, %349 : vector<32x64xf32>
    %351 = math.erf %350 : vector<32x64xf32>
    %cst_178 = arith.constant 1.000000e+00 : f32
    %352 = vector.broadcast %cst_178 : f32 to vector<32x64xf32>
    %353 = arith.addf %352, %351 : vector<32x64xf32>
    %354 = arith.mulf %348, %353 : vector<32x64xf32>
    %c1_179 = arith.constant 1 : index
    %c0_180 = arith.constant 0 : index
    %c0_181 = arith.constant 0 : index
    %355 = vector.load %arg16[%c1_179, %c0_180, %c0_181] : memref<2x64x32xf32, #tpu.memory_space<vmem>>, vector<1x64x32xf32>
    %356 = vector.shape_cast %355 : vector<1x64x32xf32> to vector<64x32xf32>
    %357 = arith.truncf %354 : vector<32x64xf32> to vector<32x64xbf16>
    %358 = arith.truncf %356 : vector<64x32xf32> to vector<64x32xbf16>
    %cst_182 = arith.constant dense<0.000000e+00> : vector<32x32xf32>
    %359 = tpu.matmul %357, %358, %cst_182 {dimension_numbers = #tpu.dot_dimension_numbers<[1], [0], [0], [1], [0, 0, 1, 1], [], []>} : vector<32x64xbf16>, vector<64x32xbf16>, vector<32x32xf32> -> vector<32x32xf32>
    %c1_183 = arith.constant 1 : index
    %c0_184 = arith.constant 0 : index
    %c0_185 = arith.constant 0 : index
    %360 = vector.load %arg17[%c1_183, %c0_184, %c0_185] : memref<2x1x32xf32, #tpu.memory_space<vmem>>, vector<1x1x32xf32>
    %361 = vector.shape_cast %360 : vector<1x1x32xf32> to vector<1x32xf32>
    %362 = vector.broadcast %361 : vector<1x32xf32> to vector<32x32xf32>
    %363 = arith.addf %359, %362 : vector<32x32xf32>
    %364 = arith.addf %337, %363 : vector<32x32xf32>
    %c1_186 = arith.constant 1 : index
    %c1_187 = arith.constant 1 : index
    %c0_188 = arith.constant 0 : index
    %c0_189 = arith.constant 0 : index
    %365 = vector.load %arg12[%c1_186, %c1_187, %c0_188, %c0_189] : memref<2x2x1x32xf32, #tpu.memory_space<vmem>>, vector<1x1x1x32xf32>
    %366 = vector.shape_cast %365 : vector<1x1x1x32xf32> to vector<1x32xf32>
    %c1_190 = arith.constant 1 : index
    %c1_191 = arith.constant 1 : index
    %c0_192 = arith.constant 0 : index
    %c0_193 = arith.constant 0 : index
    %367 = vector.load %arg13[%c1_190, %c1_191, %c0_192, %c0_193] : memref<2x2x1x32xf32, #tpu.memory_space<vmem>>, vector<1x1x1x32xf32>
    %368 = vector.shape_cast %367 : vector<1x1x1x32xf32> to vector<1x32xf32>
    %cst_194 = arith.constant dense<0.000000e+00> : vector<32xf32>
    %369 = vector.multi_reduction <add>, %364, %cst_194 [1] : vector<32x32xf32> to vector<32xf32>
    %370 = vector.shape_cast %369 : vector<32xf32> to vector<32x1xf32>
    %cst_195 = arith.constant 3.200000e+01 : f32
    %371 = vector.broadcast %cst_195 : f32 to vector<32x1xf32>
    %372 = arith.divf %370, %371 : vector<32x1xf32>
    %373 = vector.broadcast %372 : vector<32x1xf32> to vector<32x32xf32>
    %374 = arith.subf %364, %373 : vector<32x32xf32>
    %375 = arith.mulf %374, %374 : vector<32x32xf32>
    %cst_196 = arith.constant dense<0.000000e+00> : vector<32xf32>
    %376 = vector.multi_reduction <add>, %375, %cst_196 [1] : vector<32x32xf32> to vector<32xf32>
    %377 = vector.shape_cast %376 : vector<32xf32> to vector<32x1xf32>
    %cst_197 = arith.constant 3.200000e+01 : f32
    %378 = vector.broadcast %cst_197 : f32 to vector<32x1xf32>
    %379 = arith.divf %377, %378 : vector<32x1xf32>
    %380 = vector.broadcast %372 : vector<32x1xf32> to vector<32x32xf32>
    %381 = arith.subf %364, %380 : vector<32x32xf32>
    %cst_198 = arith.constant 9.99999974E-6 : f32
    %382 = vector.broadcast %cst_198 : f32 to vector<32x1xf32>
    %383 = arith.addf %379, %382 : vector<32x1xf32>
    %384 = math.rsqrt %383 : vector<32x1xf32>
    %385 = vector.broadcast %384 : vector<32x1xf32> to vector<32x32xf32>
    %386 = arith.mulf %381, %385 : vector<32x32xf32>
    %387 = vector.broadcast %366 : vector<1x32xf32> to vector<32x32xf32>
    %388 = arith.mulf %386, %387 : vector<32x32xf32>
    %389 = vector.broadcast %368 : vector<1x32xf32> to vector<32x32xf32>
    %390 = arith.addf %388, %389 : vector<32x32xf32>
    %c0_199 = arith.constant 0 : index
    %c0_200 = arith.constant 0 : index
    %391 = vector.load %arg18[%c0_199, %c0_200] : memref<32x24xf32, #tpu.memory_space<vmem>>, vector<32x24xf32>
    %392 = arith.truncf %390 : vector<32x32xf32> to vector<32x32xbf16>
    %393 = arith.truncf %391 : vector<32x24xf32> to vector<32x24xbf16>
    %cst_201 = arith.constant dense<0.000000e+00> : vector<32x24xf32>
    %394 = tpu.matmul %392, %393, %cst_201 {dimension_numbers = #tpu.dot_dimension_numbers<[1], [0], [0], [1], [0, 0, 1, 1], [], []>} : vector<32x32xbf16>, vector<32x24xbf16>, vector<32x24xf32> -> vector<32x24xf32>
    %c0_202 = arith.constant 0 : index
    %c0_203 = arith.constant 0 : index
    %395 = vector.load %arg19[%c0_202, %c0_203] : memref<1x24xf32, #tpu.memory_space<vmem>>, vector<1x24xf32>
    %396 = vector.broadcast %395 : vector<1x24xf32> to vector<32x24xf32>
    %397 = arith.addf %394, %396 : vector<32x24xf32>
    %398 = vector.shape_cast %397 : vector<32x24xf32> to vector<2x16x24xf32>
    %c0_204 = arith.constant 0 : index
    %c0_205 = arith.constant 0 : index
    %c0_206 = arith.constant 0 : index
    %399 = vector.load %arg20[%c0_204, %c0_205, %c0_206] : memref<2x16x24xf32, #tpu.memory_space<vmem>>, vector<2x16x24xf32>
    tpu.vector_store %arg20[%c0_204, %c0_205, %c0_206], %398 {strides = array<i32>} : memref<2x16x24xf32, #tpu.memory_space<vmem>>, vector<2x16x24xf32>,
    return
  }
}

</mosaic_0001>

<bundles_post_ra>
// kernel: cmdm_forward_pallas.1
= control target key start
LH: loop header
LB: loop body
LE: loop exit
PB: predicated region body
PF: predicated region fallthrough
CT: control target
= control target key end

     0   :  { %vm78_vm0 = vcmask 261120   ;;  %vm163_vm1 = vcmask 392192   ;;  %v3335_v34 = vmov 0   ;;  %vm632_vm6 = vcmask 130048   ;;  %s4769_s6 = inlined_call_operand.vmem [shape: f32[2,32,32], index: 6, kind: input, shape index: {}]   ;;  %s4770_s8 = inlined_call_operand.vmem [shape: f32[48,32], index: 8, kind: input, shape index: {}]   ;;  %s4771_s0 = inlined_call_operand.vmem [shape: f32[2,32], index: 0, kind: input, shape index: {}]   ;;  %s4772_s7 = inlined_call_operand.vmem [shape: f32[2,1,32], index: 7, kind: input, shape index: {}]   ;;  %s4773_s1 = inlined_call_operand.vmem [shape: f32[2,16,48], index: 1, kind: input, shape index: {}]   ;;  %s4774_s9 = inlined_call_operand.vmem [shape: f32[1,32], index: 9, kind: input, shape index: {}]   ;;  %s4775_s3 = inlined_call_operand.vmem [shape: f32[1,16,1], index: 3, kind: input, shape index: {}]   ;;  %s4776_s11 = inlined_call_operand.vmem [shape: f32[2,4,1,32], index: 11, kind: input, shape index: {}]   ;;  %s4777_s10 = inlined_call_operand.vmem [shape: f32[2,4,32,32], index: 10, kind: input, shape index: {}]   ;;  %s4778_s2 = inlined_call_operand.vmem [shape: f32[16,32], index: 2, kind: input, shape index: {}]   ;;  %s4779_s4 = inlined_call_operand.vmem [shape: f32[4,1,32], index: 4, kind: input, shape index: {}]   ;;  %s4780_s5 = inlined_call_operand.vmem [shape: f32[1,16], index: 5, kind: input, shape index: {}]   ;;  %s4781_s12 = inlined_call_operand.vmem [shape: f32[2,2,1,32], index: 12, kind: input, shape index: {}]   ;;  %s4782_s13 = inlined_call_operand.vmem [shape: f32[2,2,1,32], index: 13, kind: input, shape index: {}]   ;;  %s4783_s15 = inlined_call_operand.vmem [shape: f32[2,1,64], index: 15, kind: input, shape index: {}]   ;;  %s4784_s14 = inlined_call_operand.vmem [shape: f32[2,32,64], index: 14, kind: input, shape index: {}]   ;;  %s4785_s17 = inlined_call_operand.vmem [shape: f32[2,1,32], index: 17, kind: input, shape index: {}]   ;;  %s4786_s16 = inlined_call_operand.vmem [shape: f32[2,64,32], index: 16, kind: input, shape index: {}]   ;;  %s4787_s19 = inlined_call_operand.vmem [shape: f32[1,24], index: 19, kind: input, shape index: {}]   ;;  %s4788_s18 = inlined_call_operand.vmem [shape: f32[32,24], index: 18, kind: input, shape index: {}]   ;;  %s4789_s20 = inlined_call_operand.vmem [shape: f32[2,16,24], index: 20, kind: output, shape index: {}]  }
   0x1   :  { %4794 = sst [smem:[#allocation2_spill]] %s4769_s6  ;;  %v189_v30 = vld [vmem:[%s4775_s3] sm:$0xff]  ;;  %3118 = vset.pattern.permute.xlu1 %v3335_v34  ;;  %3117 = vset.pattern.permute.xlu0 %v3335_v34  ;;  %v190_v36 = vld [vmem:[%s4775_s3 + $0x8] sm:$0xff]  ;;  %v244_v53 = vld [vmem:[%s4777_s10 + $0x10] sm:$0xff] }
   0x2   :  { %4795 = sst [smem:[#allocation3_spill]] %s4770_s8  ;;  %v197_v32 = vsub.f32 1.0, %v189_v30  ;;  %215 = vperm.xlu1 %3118, %v189_v30   ;;  %v198_v37 = vsub.f32 1.0, %v190_v36  ;;  %v245_v54 = vld [vmem:[%s4777_s10 + $0x18] sm:$0xff]  ;;  %v2998_v55 = vld [vmem:[%s4777_s10 + $0x30] sm:$0xff]  ;;  %v242_v62 = vld [vmem:[%s4777_s10] sm:$0xff] }
   0x3   :  { %4796 = sst [smem:[#allocation4_spill]] %s4771_s0  ;;  %v249_v56 = vpack.c.bf16 %v245_v54, %v244_v53  ;;  %v2999_v57 = vld [vmem:[%s4777_s10 + $0x38] sm:$0xff]  ;;  %v3005_v58 = vld [vmem:[%s4777_s10 + $0x50] sm:$0xff]  ;;  %v243_v63 = vld [vmem:[%s4777_s10 + $0x8] sm:$0xff] }
   0x4   :  { %4797 = sst [smem:[#allocation5_spill]] %s4772_s7  ;;  %201 = vperm.xlu0 %3117, %v197_v32   ;;  %v3006_v59 = vld [vmem:[%s4777_s10 + $0x58] sm:$0xff]  ;;  %v285_v60 = vpack.c.bf16 %v2999_v57, %v2998_v55  ;;  %v3595_v53 = vld [vmem:[%s4779_s4 + $0x1] ss:$0 sm:$0xff]  ;;  %v3600_v54 = vld [vmem:[%s4776_s11] ss:$0 sm:$0xff] }
   0x5   :  { %4798 = sst [smem:[#allocation6_spill]] %s4773_s1  ;;  %v316_v61 = vpack.c.bf16 %v3006_v59, %v3005_v58  ;;  %266 = vmatpush.bf16.msra.mxu3 %v249_v56  ;;  %v3606_v56 = vld [vmem:[%s4779_s4 + $0x2] ss:$0 sm:$0xff]  ;;  %v3611_v57 = vld [vmem:[%s4779_s4 + $0x3] ss:$0 sm:$0xff] }
   0x6   :  { %s4799_s23 = sld [smem:[#allocation2_spill]] }
   0x7   :  { %s4800_s29 = sld [smem:[#allocation3_spill]] }
   0x8   :  { %s4801_s7 = sld [smem:[#allocation4_spill]] }
   0x9   :  { %s4802_s21 = sld [smem:[#allocation6_spill]] }
   0xa   :  { %s4803_s6 = sld [smem:[#allocation5_spill]]  ;;  %220 = vperm.xlu1 %3118, %v190_v36  }
   0xc   :  { %v69_v0 = vld [vmem:[%s4799_s23 + $0x10] sm:$0xff]  ;;  %v70_v1 = vld [vmem:[%s4799_s23 + $0x18] sm:$0xff]  ;;  %v67_v2 = vld [vmem:[%s4799_s23] sm:$0xff]  ;;  %206 = vperm.xlu0 %3117, %v198_v37  }
   0xd   :  { %v73_v3 = vpack.c.bf16 %v70_v1, %v69_v0  ;;  %v68_v4 = vld [vmem:[%s4799_s23 + $0x8] sm:$0xff]  ;;  %v152_v5 = vld [vmem:[%s4800_s29 + $0x20] sm:$0xff]  ;;  %v150_v7 = vld [vmem:[%s4800_s29 + $0x10] sm:$0xff]  ;;  %v248_v1 = vpack.c.bf16 %v243_v63, %v242_v62 }
   0xe   :  { %v153_v6 = vld [vmem:[%s4800_s29 + $0x28] sm:$0xff]  ;;  %v151_v8 = vld [vmem:[%s4800_s29 + $0x18] sm:$0xff]  ;;  %v72_v9 = vpack.c.bf16 %v68_v4, %v67_v2  ;;  %v66_v10 = vld [vmem:[%s4801_s7] sm:$0x3] }
   0xf   :  { %88 = vmatpush.bf16.msra.mxu0 %v73_v3  ;;  %v158_v11 = vpack.c.bf16 %v153_v6, %v152_v5  ;;  %v157_v12 = vpack.c.bf16 %v151_v8, %v150_v7  ;;  %v71_v13 = vpack.c.bf16 %v66_v10, %v66_v10  ;;  %v148_v14 = vld [vmem:[%s4800_s29] sm:$0xff]  ;;  %v149_v15 = vld [vmem:[%s4800_s29 + $0x8] sm:$0xff]  ;;  %v146_v20 = vld [vmem:[%s4802_s21 + $0x10] sm:$0xff]  ;;  %267 = vmatpush.bf16.msra.mxu3 %v248_v1 }
  0x10   :  { %v156_v16 = vpack.c.bf16 %v149_v15, %v148_v14  ;;  %v144_v17 = vld [vmem:[%s4802_s21] sm:$0xff]  ;;  %v145_v18 = vld [vmem:[%s4802_s21 + $0x8] sm:$0xff]  ;;  %v147_v21 = vld [vmem:[%s4802_s21 + $0x18] sm:$0xff] }
  0x11   :  { %175 = vmatpush.bf16.msra.mxu2 %v158_v11  ;;  %v154_v19 = vpack.c.bf16 %v145_v18, %v144_v17  ;;  %v155_v22 = vpack.c.bf16 %v147_v21, %v146_v20  ;;  %v2988_v23 = vld [vmem:[%s4799_s23 + $0x30] sm:$0xff]  ;;  %v2989_v24 = vld [vmem:[%s4799_s23 + $0x38] sm:$0xff]  ;;  %v3119_v26 = vld [vmem:[%s4803_s6] ss:$0 sm:$0xff] }
  0x12   :  { %v122_v25 = vpack.c.bf16 %v2989_v24, %v2988_v23  ;;  %v2986_v27 = vld [vmem:[%s4799_s23 + $0x20] sm:$0xff]  ;;  %v2987_v28 = vld [vmem:[%s4799_s23 + $0x28] sm:$0xff] }
  0x13   :  { %89 = vmatpush.bf16.msra.mxu0 %v72_v9  ;;  %v121_v29 = vpack.c.bf16 %v2987_v28, %v2986_v27  ;;  %v2996_v0 = vld [vmem:[%s4777_s10 + $0x20] sm:$0xff]  ;;  %v2997_v2 = vld [vmem:[%s4777_s10 + $0x28] sm:$0xff] }
  0x14   :  { %137 = vmatpush.bf16.msra.mxu1 %v122_v25  ;;  %v3003_v3 = vld [vmem:[%s4777_s10 + $0x40] sm:$0xff]  ;;  %v3004_v4 = vld [vmem:[%s4777_s10 + $0x48] sm:$0xff]  ;;  %v284_v5 = vpack.c.bf16 %v2997_v2, %v2996_v0 }
  0x15   :  { %176 = vmatpush.bf16.msra.mxu2 %v157_v12  ;;  %v315_v6 = vpack.c.bf16 %v3004_v4, %v3003_v3  ;;  %v3120_v11 = vld [vmem:[%s4774_s9] ss:$0 sm:$0xff]  ;;  %v3121_v12 = vld [vmem:[%s4803_s6 + $0x1] ss:$0 sm:$0xff] }
  0x16   :  { %2984 = vmatmul.msk.bf16.vlgmr.msra.gmra.mxu0 %vm78_vm0, %v71_v13  ;;  %v231_v25 = vld [vmem:[%s4778_s2] sm:$0xff] }
  0x17   :  { %297 = vmatpush.bf16.msrb.mxu0 %v285_v60 }
  0x18   :  { %138 = vmatpush.bf16.msra.mxu1 %v121_v29 }
  0x19   :  { %177 = vmatpush.bf16.msra.mxu2 %v156_v16 }
  0x1b   :  { %298 = vmatpush.bf16.msrb.mxu0 %v284_v5 }
  0x1c   :  { %2992 = vmatmul.msk.bf16.vlgmr.msra.gmra.mxu2 %vm163_vm1, %v154_v19  ;;  %328 = vmatpush.bf16.msrb.mxu1 %v316_v61 }
  0x20   :  { %329 = vmatpush.bf16.msrb.mxu1 %v315_v6 }
  0x2c   :  { %2993 = vmatmul.msk.bf16.gmra.mxu2 %vm163_vm1, %v155_v22 }
  0x74   :  { %v216_v10 = vpop.permute.xlu1 %215 }
  0x76   :  { %v202_v9 = vpop.permute.xlu0 %201 }
  0x7c   :  { %v221_v20 = vpop.permute.xlu1 %220 }
  0x7e   :  { %v207_v18 = vpop.permute.xlu0 %206 }
  0x93   :  { %v91_v31 = vpop.f32.mrf.mxu0 }
  0x94   :  { %v92_v33 = vadd.f32 %v3119_v26, %v91_v31  ;;  %v232_v26 = vld [vmem:[%s4778_s2 + $0x8] sm:$0xff] }
  0x96   :  { %v2985_v35 = vmul.f32 -1.442695, %v92_v33 }
  0x98   :  { %3148 = vpow2.f32 %v2985_v35 }
  0x9b   :  { %v93_v38 = vpop.f32.mrf.mxu0 }
  0x9e   :  { %v3149_v39 = vpop.eup %3148 }
  0x9f   :  { %v98_v40 = vadd.f32 1.0, %v3149_v39  ;;  %v179_v7 = vpop.f32.mrf.mxu2 }
  0xa0   :  { %v180_v15 = vadd.f32 %v3120_v11, %v179_v7 }
  0xa1   :  { %3150 = vrcp.f32 %v98_v40  ;;  %v110_v44 = vand.u32 2147483648, %v98_v40  ;;  %v108_v46 = vand.u32 2147483647, %v98_v40  ;;  %vm104_vm3 = vweird.f32 %v98_v40 }
  0xa2   :  { %v209_v21 = vmul.f32 %v202_v9, %v180_v15 }
  0xa3   :  { %v111_v48 = vor.u32 1.1754944e-38, %v110_v44  ;;  %vm109_vm5 = vcmp.eq.f32.partialorder %v108_v46, 8.507059e+37 }
  0xa7   :  { %v3151_v41 = vpop.eup %3150  ;;  %v181_v8 = vpop.f32.mrf.mxu2 }
  0xa8   :  { %v100_v42 = vmul.f32 %v3151_v41, %v98_v40  ;;  %vm105_vm2 = vweird.f32 %v3151_v41  ;;  %v182_v16 = vadd.f32 %v3120_v11, %v181_v8 }
  0xa9   :  { %vm106_vm4 = vmor %vm104_vm3, %vm105_vm2 }
  0xaa   :  { %v101_v43 = vsub.f32 1.0, %v100_v42  ;;  %v210_v22 = vmul.f32 %v207_v18, %v182_v16 }
  0xac   :  { %v102_v45 = vmul.f32 %v3151_v41, %v101_v43 }
  0xae   :  { %v103_v47 = vadd.f32 %v3151_v41, %v102_v45 }
  0xaf   :  { %v184_v13 = vpop.f32.mrf.mxu2 }
  0xb0   :  { %v107_v49 = vsel %vm106_vm4, %v3151_v41, %v103_v47  ;;  %v185_v36 = vadd.f32 %v3120_v11, %v184_v13  ;;  %v3579_v47 = vld [vmem:[%s4776_s11 + $0x2] ss:$0 sm:$0xff] }
  0xb1   :  { %v112_v50 = vsel %vm109_vm5, %v111_v48, %v107_v49  ;;  %v3584_v49 = vld [vmem:[%s4776_s11 + $0x1] ss:$0 sm:$0xff] }
  0xb2   :  { %v114_v51 = vmul.f32 %v112_v50, %v92_v33  ;;  %v211_v40 = vmul.f32 %v202_v9, %v185_v36 }
  0xb4   :  { %v120_v52 = vpack.c.bf16 %v114_v51, %v114_v51 }
  0xb6   :  { %2991 = vmatmul.msk.bf16.vlgmr.msra.gmra.mxu1 %vm78_vm0, %v120_v52  ;;  %v3590_v52 = vld [vmem:[%s4779_s4] ss:$0 sm:$0xff] }
  0xb7   :  { %v186_v33 = vpop.f32.mrf.mxu2 }
  0xb8   :  { %v187_v37 = vadd.f32 %v3120_v11, %v186_v33 }
  0xba   :  { %v212_v41 = vmul.f32 %v207_v18, %v187_v37 }
 0x133   :  { %v140_v14 = vpop.f32.mrf.mxu1 }
 0x134   :  { %v141_v17 = vadd.f32 %v3121_v12, %v140_v14 }
 0x136   :  { %v193_v19 = vperm.slane %v141_v17, 0  ;;  %v192_v27 = vrot.slane %v141_v17, 1 }
 0x138   :  { %v223_v23 = vmul.f32 %v216_v10, %v193_v19  ;;  %v224_v24 = vmul.f32 %v221_v20, %v193_v19  ;;  %v194_v34 = vperm.slane %v192_v27, 0 }
 0x13a   :  { %v227_v28 = vadd.f32 %v223_v23, %v209_v21  ;;  %v228_v29 = vadd.f32 %v224_v24, %v210_v22  ;;  %v225_v38 = vmul.f32 %v216_v10, %v194_v34  ;;  %v226_v39 = vmul.f32 %v221_v20, %v194_v34 }
 0x13b   :  { %v142_v30 = vpop.f32.mrf.mxu1 }
 0x13c   :  { %v3558_v31 = vadd.f32 %v231_v25, %v227_v28  ;;  %v3560_v32 = vadd.f32 %v232_v26, %v228_v29  ;;  %v229_v42 = vadd.f32 %v225_v38, %v211_v40  ;;  %v230_v43 = vadd.f32 %v226_v39, %v212_v41 }
 0x13e   :  { %v246_v35 = vpack.c.bf16 %v3560_v32, %v3558_v31  ;;  %v3567_v44 = vadd.f32 %v231_v25, %v229_v42  ;;  %v3569_v45 = vadd.f32 %v232_v26, %v230_v43 }
 0x140   :  { %2994 = vmatmul.msk.bf16.vlgmr.msra.gmra.mxu3 %vm78_vm0, %v246_v35  ;;  %3001 = vmatmul.msk.bf16.vlgmr.msrb.gmra.mxu0 %vm78_vm0, %v246_v35  ;;  %v247_v46 = vpack.c.bf16 %v3569_v45, %v3567_v44 }
 0x141   :  { %3008 = vmatmul.msk.bf16.vlgmr.msrb.gmra.mxu1 %vm78_vm0, %v246_v35 }
 0x150   :  { %2995 = vmatmul.msk.bf16.gmra.mxu3 %vm78_vm0, %v247_v46  ;;  %3002 = vmatmul.msk.bf16.gmra.mxu0 %vm78_vm0, %v247_v46 }
 0x151   :  { %3009 = vmatmul.msk.bf16.gmra.mxu1 %vm78_vm0, %v247_v46 }
 0x1bd   :  { %v300_v48 = vpop.f32.mrf.mxu0 }
 0x1be   :  { %v331_v50 = vpop.f32.mrf.mxu1  ;;  %v301_v55 = vadd.f32 %v3584_v49, %v300_v48 }
 0x1bf   :  { %v332_v51 = vadd.f32 %v3579_v47, %v331_v50 }
 0x1c0   :  { %v401_v63 = vpack.c.bf16 %v301_v55, %v301_v55 }
 0x1c1   :  { %v369_v58 = vmul.f32 %v3590_v52, %v332_v51  ;;  %v371_v60 = vmul.f32 %v3595_v53, %v332_v51  ;;  %v373_v0 = vmul.f32 %v3606_v56, %v332_v51  ;;  %v375_v2 = vmul.f32 %v3611_v57, %v332_v51 }
 0x1c2   :  { %v412_v11 = vunpack.c.l.b16 %v401_v63 }
 0x1c3   :  { %v269_v59 = vpop.f32.mrf.mxu3  ;;  %v825_v3 = vpack.c.bf16 %v369_v58, %v369_v58  ;;  %v827_v6 = vpack.c.bf16 %v371_v60, %v371_v60  ;;  %v829_v12 = vpack.c.bf16 %v373_v0, %v373_v0  ;;  %v831_v13 = vpack.c.bf16 %v375_v2, %v375_v2 }
 0x1c4   :  { %v270_v61 = vadd.f32 %v3600_v54, %v269_v59 }
 0x1c5   :  { %v302_v62 = vpop.f32.mrf.mxu0  ;;  %v3624_v17 = vunpack.c.l.b16 %v825_v3  ;;  %v3628_v21 = vunpack.c.l.b16 %v827_v6  ;;  %v3638_v41 = vunpack.c.l.b16 %v829_v12  ;;  %v3640_v48 = vunpack.c.l.b16 %v831_v13 }
 0x1c6   :  { %v333_v1 = vpop.f32.mrf.mxu1  ;;  %v303_v4 = vadd.f32 %v3584_v49, %v302_v62  ;;  %v353_v7 = vmul.f32 %v3590_v52, %v270_v61  ;;  %v357_v8 = vmul.f32 %v3606_v56, %v270_v61  ;;  %v359_v9 = vmul.f32 %v3611_v57, %v270_v61 }
 0x1c7   :  { %v334_v5 = vadd.f32 %v3579_v47, %v333_v1  ;;  %v355_v18 = vmul.f32 %v3595_v53, %v270_v61 }
 0x1c8   :  { %v402_v10 = vpack.c.bf16 %v303_v4, %v303_v4  ;;  %v385_v19 = vpack.c.bf16 %v353_v7, %v353_v7  ;;  %v389_v22 = vpack.c.bf16 %v357_v8, %v357_v8  ;;  %v391_v23 = vpack.c.bf16 %v359_v9, %v359_v9 }
 0x1c9   :  { %v370_v15 = vmul.f32 %v3590_v52, %v334_v5  ;;  %v372_v25 = vmul.f32 %v3595_v53, %v334_v5  ;;  %v374_v27 = vmul.f32 %v3606_v56, %v334_v5  ;;  %v387_v42 = vpack.c.bf16 %v355_v18, %v355_v18 }
 0x1ca   :  { %v413_v14 = vunpack.c.l.b16 %v402_v10  ;;  %v407_v43 = vunpack.c.l.b16 %v385_v19  ;;  %v459_v59 = vunpack.c.l.b16 %v389_v22  ;;  %v481_v60 = vunpack.c.l.b16 %v391_v23 }
 0x1cb   :  { %v271_v16 = vpop.f32.mrf.mxu3  ;;  %v826_v37 = vpack.c.bf16 %v370_v15, %v370_v15  ;;  %v828_v46 = vpack.c.bf16 %v372_v25, %v372_v25  ;;  %v376_v61 = vmul.f32 %v3611_v57, %v334_v5  ;;  %v830_v63 = vpack.c.bf16 %v374_v27, %v374_v27 }
 0x1cc   :  { %v272_v20 = vadd.f32 %v3600_v54, %v271_v16  ;;  %v414_v24 = vpack.c.b16 %v413_v14, %v412_v11  ;;  %v437_v7 = vunpack.c.l.b16 %v387_v42 }
 0x1cd   :  { %v305_v26 = vpop.f32.mrf.mxu0  ;;  %v3644_v3 = vunpack.c.l.b16 %v826_v37  ;;  %v877_v13 = vunpack.c.l.b16 %v828_v46  ;;  %v832_v18 = vpack.c.bf16 %v376_v61, %v376_v61  ;;  %v905_v23 = vunpack.c.l.b16 %v830_v63 }
 0x1ce   :  { %v354_v28 = vmul.f32 %v3590_v52, %v272_v20  ;;  %v358_v29 = vmul.f32 %v3606_v56, %v272_v20  ;;  %v360_v30 = vmul.f32 %v3611_v57, %v272_v20  ;;  %v336_v33 = vpop.f32.mrf.mxu1  ;;  %v356_v34 = vmul.f32 %v3595_v53, %v272_v20 }
 0x1cf   :  { %v306_v35 = vadd.f32 %v3584_v49, %v305_v26  ;;  %v419_v36 = vsel %vm78_vm0, %v414_v24, 0  ;;  %v337_v55 = vadd.f32 %v3579_v47, %v336_v33  ;;  %v850_v22 = vpack.c.b16 %v3644_v3, %v3624_v17 }
 0x1d0   :  { %v390_v38 = vpack.c.bf16 %v358_v29, %v358_v29  ;;  %v392_v39 = vpack.c.bf16 %v360_v30, %v360_v30  ;;  %428 = vmatpush.bf16.xpose.msrb.mxu3 %v419_v36  ;;  %450 = vmatpush.bf16.xpose.msrb.mxu2 %v419_v36  ;;  %v386_v40 = vpack.c.bf16 %v354_v28, %v354_v28 }
 0x1d1   :  { %472 = vmatpush.bf16.xpose.msra.mxu0 %v419_v36  ;;  %494 = vmatpush.bf16.xpose.msra.mxu1 %v419_v36  ;;  %v403_v0 = vpack.c.bf16 %v306_v35, %v306_v35  ;;  %v388_v2 = vpack.c.bf16 %v356_v34, %v356_v34  ;;  %v3648_v10 = vmul.f32 %v3590_v52, %v337_v55 }
 0x1d2   :  { %v460_v50 = vunpack.c.l.b16 %v390_v38  ;;  %v482_v51 = vunpack.c.l.b16 %v392_v39  ;;  %v408_v58 = vunpack.c.l.b16 %v386_v40  ;;  %v3651_v11 = vmul.f32 %v3606_v56, %v337_v55 }
 0x1d3   :  { %v274_v62 = vpop.f32.mrf.mxu3  ;;  %v3654_v5 = vmul.f32 %v3611_v57, %v337_v55  ;;  %v438_v16 = vunpack.c.l.b16 %v388_v2  ;;  %v508_v19 = vunpack.c.l.b16 %v403_v0  ;;  %v3660_v20 = vmul.f32 %v3595_v53, %v337_v55 }
 0x1d4   :  { %v409_v1 = vpack.c.b16 %v408_v58, %v407_v43  ;;  %v275_v4 = vadd.f32 %v3600_v54, %v274_v62  ;;  %v461_v8 = vpack.c.b16 %v460_v50, %v459_v59  ;;  %v483_v9 = vpack.c.b16 %v482_v51, %v481_v60 }
 0x1d5   :  { %v307_v6 = vpop.f32.mrf.mxu0  ;;  %v833_v26 = vpack.c.bf16 %v3648_v10, %v3648_v10  ;;  %v837_v27 = vpack.c.bf16 %v3651_v11, %v3651_v11  ;;  %v839_v28 = vpack.c.bf16 %v3654_v5, %v3654_v5  ;;  %v878_v17 = vpack.c.b16 %v877_v13, %v3628_v21 }
 0x1d6   :  { %v338_v12 = vpop.f32.mrf.mxu1  ;;  %v308_v14 = vadd.f32 %v3584_v49, %v307_v6  ;;  %v361_v24 = vmul.f32 %v3590_v52, %v275_v4  ;;  %v365_v49 = vmul.f32 %v3606_v56, %v275_v4  ;;  %v367_v29 = vmul.f32 %v3611_v57, %v275_v4 }
 0x1d7   :  { %v339_v15 = vadd.f32 %v3579_v47, %v338_v12  ;;  %3010 = vmatmul.msk.bf16.vlgmr.msrb.gmra.mxu3 %vm78_vm0, %v409_v1  ;;  %v439_v34 = vpack.c.b16 %v438_v16, %v437_v7  ;;  %v363_v36 = vmul.f32 %v3595_v53, %v275_v4  ;;  %v906_v38 = vpack.c.b16 %v905_v23, %v3638_v41 }
 0x1d8   :  { %3012 = vmatmul.msk.bf16.vlgmr.msra.gmra.mxu0 %vm78_vm0, %v461_v8  ;;  %v404_v25 = vpack.c.bf16 %v308_v14, %v308_v14  ;;  %3013 = vmatmul.msk.bf16.vlgmr.msra.gmra.mxu1 %vm78_vm0, %v483_v9  ;;  %v933_v39 = vunpack.c.l.b16 %v832_v18  ;;  %v393_v40 = vpack.c.bf16 %v361_v24, %v361_v24  ;;  %v397_v42 = vpack.c.bf16 %v365_v49, %v365_v49 }
 0x1d9   :  { %v378_v47 = vmul.f32 %v3590_v52, %v339_v15  ;;  %v382_v33 = vmul.f32 %v3606_v56, %v339_v15  ;;  %3011 = vmatmul.msk.bf16.vlgmr.msrb.gmra.mxu2 %vm78_vm0, %v439_v34  ;;  %v399_v58 = vpack.c.bf16 %v367_v29, %v367_v29  ;;  %v380_v60 = vmul.f32 %v3595_v53, %v339_v15 }
 0x1da   :  { %v509_v30 = vunpack.c.l.b16 %v404_v25  ;;  %v503_v0 = vunpack.c.l.b16 %v393_v40  ;;  %v395_v6 = vpack.c.bf16 %v363_v36, %v363_v36  ;;  %v960_v11 = vunpack.c.l.b16 %v833_v26 }
 0x1db   :  { %v276_v35 = vpop.f32.mrf.mxu3  ;;  %v834_v21 = vpack.c.bf16 %v378_v47, %v378_v47  ;;  %v838_v59 = vpack.c.bf16 %v382_v33, %v382_v33  ;;  %v577_v7 = vunpack.c.l.b16 %v399_v58  ;;  %v836_v5 = vpack.c.bf16 %v380_v60, %v380_v60 }
 0x1dc   :  { %v277_v37 = vadd.f32 %v3600_v54, %v276_v35  ;;  %v510_v43 = vpack.c.b16 %v509_v30, %v508_v19  ;;  %v384_v54 = vmul.f32 %v3611_v57, %v339_v15  ;;  %v835_v15 = vpack.c.bf16 %v3660_v20, %v3660_v20 }
 0x1dd   :  { %v1044_v18 = vunpack.c.l.b16 %v839_v28  ;;  %v533_v19 = vunpack.c.l.b16 %v395_v6  ;;  %v989_v23 = vunpack.c.l.b16 %v836_v5  ;;  %v3699_v28 = vld [vmem:[%s4780_s5] ss:$0 sm:$0xff] }
 0x1de   :  { %v362_v46 = vmul.f32 %v3590_v52, %v277_v37  ;;  %v364_v50 = vmul.f32 %v3595_v53, %v277_v37  ;;  %v366_v51 = vmul.f32 %v3606_v56, %v277_v37  ;;  %v368_v55 = vmul.f32 %v3611_v57, %v277_v37 }
 0x1df   :  { %v515_v41 = vsel %vm78_vm0, %v510_v43, 0  ;;  %v555_v52 = vunpack.c.l.b16 %v397_v42  ;;  %v934_v56 = vpack.c.b16 %v933_v39, %v3640_v48  ;;  %v961_v57 = vunpack.c.l.b16 %v834_v21 }
 0x1e0   :  { %v394_v61 = vpack.c.bf16 %v362_v46, %v362_v46  ;;  %v398_v62 = vpack.c.bf16 %v366_v51, %v366_v51  ;;  %v400_v63 = vpack.c.bf16 %v368_v55, %v368_v55  ;;  %524 = vmatpush.bf16.xpose.msra.mxu3 %v515_v41  ;;  %v396_v1 = vpack.c.bf16 %v364_v50, %v364_v50 }
 0x1e1   :  { %546 = vmatpush.bf16.xpose.msra.mxu2 %v515_v41  ;;  %568 = vmatpush.bf16.xpose.msrb.mxu0 %v515_v41  ;;  %v1017_v53 = vunpack.c.l.b16 %v838_v59  ;;  %v840_v8 = vpack.c.bf16 %v384_v54, %v384_v54  ;;  %v1016_v48 = vunpack.c.l.b16 %v837_v27  ;;  %v962_v16 = vpack.c.b16 %v961_v57, %v960_v11 }
 0x1e2   :  { %v504_v2 = vunpack.c.l.b16 %v394_v61  ;;  %v556_v3 = vunpack.c.l.b16 %v398_v62  ;;  %v578_v4 = vunpack.c.l.b16 %v400_v63  ;;  %590 = vmatpush.bf16.xpose.msrb.mxu1 %v515_v41  ;;  %v534_v12 = vunpack.c.l.b16 %v396_v1 }
 0x1e3   :  { %v1045_v14 = vunpack.c.l.b16 %v840_v8  ;;  %v988_v25 = vunpack.c.l.b16 %v835_v15 }
 0x1e4   :  { %v505_v9 = vpack.c.b16 %v504_v2, %v503_v0  ;;  %v557_v10 = vpack.c.b16 %v556_v3, %v555_v52  ;;  %v579_v13 = vpack.c.b16 %v578_v4, %v577_v7  ;;  %v535_v49 = vpack.c.b16 %v534_v12, %v533_v19 }
 0x1e5   :  { %v1046_v24 = vpack.c.b16 %v1045_v14, %v1044_v18  ;;  %v990_v47 = vpack.c.b16 %v989_v23, %v988_v25 }
 0x1e7   :  { %3014 = vmatmul.msk.bf16.vlgmr.msra.gmra.mxu3 %vm78_vm0, %v505_v9 }
 0x1e8   :  { %862 = vmatpush.bf16.msrb.mxu3 %v850_v22  ;;  %v1018_v22 = vpack.c.b16 %v1017_v53, %v1016_v48  ;;  %3016 = vmatmul.msk.bf16.vlgmr.msrb.gmra.mxu0 %vm78_vm0, %v557_v10 }
 0x1e9   :  { %890 = vmatpush.bf16.msrb.mxu2 %v878_v17  ;;  %918 = vmatpush.bf16.msra.mxu0 %v906_v38 }
 0x1ea   :  { %946 = vmatpush.bf16.msra.mxu1 %v934_v56  ;;  %3015 = vmatmul.msk.bf16.vlgmr.msra.gmra.mxu2 %vm78_vm0, %v535_v49 }
 0x1eb   :  { %3017 = vmatmul.msk.bf16.vlgmr.msrb.gmra.mxu1 %vm78_vm0, %v579_v13 }
 0x1ec   :  { %974 = vmatpush.bf16.msra.mxu3 %v962_v16 }
 0x1ed   :  { %1030 = vmatpush.bf16.msrb.mxu0 %v1018_v22  ;;  %1002 = vmatpush.bf16.msra.mxu2 %v990_v47 }
 0x1ee   :  { %1058 = vmatpush.bf16.msrb.mxu1 %v1046_v24 }
 0x255   :  { %v474_v20 = vpop.f32.mrf.mxu0  ;;  %v496_v40 = vpop.f32.mrf.mxu1 }
 0x256   :  { %v601_v42 = vmul.f32 0.35355338, %v474_v20  ;;  %v603_v56 = vmul.f32 0.35355338, %v496_v40 }
 0x258   :  { %v3720_v55 = vadd.f32 %v3699_v28, %v601_v42  ;;  %v3743_v53 = vadd.f32 %v3699_v28, %v603_v56 }
 0x25a   :  { %v430_v26 = vpop.f32.mrf.mxu3  ;;  %v645_v41 = vsel %vm632_vm6, %v3720_v55, -inf  ;;  %v651_v5 = vsel %vm632_vm6, %v3743_v53, -inf }
 0x25b   :  { %v597_v27 = vmul.f32 0.35355338, %v430_v26 }
 0x25c   :  { %v452_v33 = vpop.f32.mrf.mxu2 }
 0x25d   :  { %v3702_v17 = vadd.f32 %v3699_v28, %v597_v27  ;;  %v476_v29 = vpop.f32.mrf.mxu0  ;;  %v599_v34 = vmul.f32 0.35355338, %v452_v33  ;;  %v498_v59 = vpop.f32.mrf.mxu1 }
 0x25e   :  { %v602_v54 = vmul.f32 0.35355338, %v476_v29  ;;  %v604_v11 = vmul.f32 0.35355338, %v498_v59 }
 0x25f   :  { %v633_v30 = vsel %vm632_vm6, %v3702_v17, -inf  ;;  %v3707_v36 = vadd.f32 %v3699_v28, %v599_v34 }
 0x260   :  { %634 = vmax.xlane.f32.xlu2 %v633_v30  ;;  %v3730_v0 = vadd.f32 %v3699_v28, %v602_v54  ;;  %v3755_v48 = vadd.f32 %v3699_v28, %v604_v11 }
 0x261   :  { %v639_v38 = vsel %vm632_vm6, %v3707_v36, -inf }
 0x262   :  { %v432_v35 = vpop.f32.mrf.mxu3  ;;  %640 = vmax.xlane.f32.xlu0 %v639_v38  ;;  %v648_v2 = vsel %vm632_vm6, %v3730_v0, -inf  ;;  %v654_v16 = vsel %vm632_vm6, %v3755_v48, -inf }
 0x263   :  { %v598_v37 = vmul.f32 0.35355338, %v432_v35 }
 0x264   :  { %v454_v21 = vpop.f32.mrf.mxu2 }
 0x265   :  { %v3712_v39 = vadd.f32 %v3699_v28, %v598_v37  ;;  %v570_v46 = vpop.f32.mrf.mxu0  ;;  %v600_v50 = vmul.f32 0.35355338, %v454_v21 }
 0x266   :  { %v609_v49 = vmul.f32 0.35355338, %v570_v46 }
 0x267   :  { %v636_v43 = vsel %vm632_vm6, %v3712_v39, -inf  ;;  %v3717_v51 = vadd.f32 %v3699_v28, %v600_v50 }
 0x268   :  { %637 = vmax.xlane.f32.xlu2 %v636_v43  ;;  %v592_v6 = vpop.f32.mrf.mxu1  ;;  %v3772_v47 = vadd.f32 %v3699_v28, %v609_v49 }
 0x269   :  { %v642_v58 = vsel %vm632_vm6, %v3717_v51, -inf  ;;  %v611_v8 = vmul.f32 0.35355338, %v592_v6 }
 0x26a   :  { %643 = vmax.xlane.f32.xlu1 %v642_v58  ;;  %v526_v13 = vpop.f32.mrf.mxu3  ;;  %v669_v27 = vsel %vm632_vm6, %v3772_v47, -inf }
 0x26b   :  { %v3752_v12 = vadd.f32 %v3699_v28, %v611_v8  ;;  %v605_v15 = vmul.f32 0.35355338, %v526_v13 }
 0x26d   :  { %v548_v60 = vpop.f32.mrf.mxu2  ;;  %v572_v62 = vpop.f32.mrf.mxu0  ;;  %v675_v14 = vsel %vm632_vm6, %v3752_v12, -inf  ;;  %v3762_v18 = vadd.f32 %v3699_v28, %v605_v15 }
 0x26e   :  { %v607_v61 = vmul.f32 0.35355338, %v548_v60  ;;  %v610_v52 = vmul.f32 0.35355338, %v572_v62 }
 0x26f   :  { %v657_v23 = vsel %vm632_vm6, %v3762_v18, -inf }
 0x270   :  { %646 = vmax.xlane.f32.xlu2 %v645_v41  ;;  %v3727_v63 = vadd.f32 %v3699_v28, %v607_v61  ;;  %v3737_v57 = vadd.f32 %v3699_v28, %v610_v52  ;;  %v594_v20 = vpop.f32.mrf.mxu1 }
 0x271   :  { %v612_v26 = vmul.f32 0.35355338, %v594_v20 }
 0x272   :  { %v663_v1 = vsel %vm632_vm6, %v3727_v63, -inf  ;;  %v672_v9 = vsel %vm632_vm6, %v3737_v57, -inf  ;;  %v528_v19 = vpop.f32.mrf.mxu3 }
 0x273   :  { %664 = vmax.xlane.f32.xlu0 %v663_v1  ;;  %v606_v22 = vmul.f32 0.35355338, %v528_v19  ;;  %v3777_v29 = vadd.f32 %v3699_v28, %v612_v26 }
 0x275   :  { %v550_v3 = vpop.f32.mrf.mxu2  ;;  %v3767_v24 = vadd.f32 %v3699_v28, %v606_v22  ;;  %v678_v30 = vsel %vm632_vm6, %v3777_v29, -inf }
 0x276   :  { %v608_v4 = vmul.f32 0.35355338, %v550_v3 }
 0x277   :  { %v660_v25 = vsel %vm632_vm6, %v3767_v24, -inf }
 0x278   :  { %649 = vmax.xlane.f32.xlu2 %v648_v2  ;;  %v3740_v7 = vadd.f32 %v3699_v28, %v608_v4 }
 0x27a   :  { %v666_v10 = vsel %vm632_vm6, %v3740_v7, -inf }
 0x27b   :  { %673 = vmax.xlane.f32.xlu0 %v672_v9  ;;  %667 = vmax.xlane.f32.xlu1 %v666_v10 }
 0x280   :  { %652 = vmax.xlane.f32.xlu2 %v651_v5 }
 0x283   :  { %676 = vmax.xlane.f32.xlu1 %v675_v14 }
 0x288   :  { %655 = vmax.xlane.f32.xlu2 %v654_v16 }
 0x290   :  { %658 = vmax.xlane.f32.xlu2 %v657_v23 }
 0x298   :  { %661 = vmax.xlane.f32.xlu2 %v660_v25 }
 0x2a0   :  { %670 = vmax.xlane.f32.xlu2 %v669_v27 }
 0x2a8   :  { %679 = vmax.xlane.f32.xlu2 %v678_v30 }
 0x2d3   :  { %v635_v33 = vpop.xlane.xlu2 %634 }
 0x2d4   :  { %v681_v34 = vsub.f32 %v3702_v17, %v635_v33 }
 0x2d5   :  { %v641_v37 = vpop.xlane.xlu0 %640 }
 0x2d6   :  { %v697_v35 = vmul.f32 1.442695, %v681_v34  ;;  %v683_v38 = vsub.f32 %v3707_v36, %v641_v37 }
 0x2d8   :  { %3152 = vpow2.f32 %v697_v35  ;;  %v701_v42 = vmul.f32 1.442695, %v683_v38 }
 0x2da   :  { %3154 = vpow2.f32 %v701_v42 }
 0x2db   :  { %v638_v40 = vpop.xlane.xlu2 %637 }
 0x2dc   :  { %v682_v43 = vsub.f32 %v3712_v39, %v638_v40 }
 0x2dd   :  { %v644_v50 = vpop.xlane.xlu1 %643 }
 0x2de   :  { %v3784_v21 = vpop.eup %3152  ;;  %v699_v28 = vmul.f32 1.442695, %v682_v43  ;;  %v684_v17 = vsub.f32 %v3717_v51, %v644_v50 }
 0x2df   :  { %v729_v46 = vsel %vm632_vm6, %v3784_v21, 0.0 }
 0x2e0   :  { %3156 = vpow2.f32 %v699_v28  ;;  %730 = vadd.xlane.f32.xlu0 %v729_v46  ;;  %v3789_v54 = vpop.eup %3154  ;;  %v703_v36 = vmul.f32 1.442695, %v684_v17 }
 0x2e1   :  { %v735_v39 = vsel %vm632_vm6, %v3789_v54, 0.0 }
 0x2e2   :  { %3158 = vpow2.f32 %v703_v36  ;;  %736 = vadd.xlane.f32.xlu2 %v735_v39 }
 0x2e3   :  { %v647_v58 = vpop.xlane.xlu2 %646 }
 0x2e4   :  { %v685_v41 = vsub.f32 %v3720_v55, %v647_v58 }
 0x2e6   :  { %v3794_v59 = vpop.eup %3156  ;;  %v705_v60 = vmul.f32 1.442695, %v685_v41  ;;  %v665_v9 = vpop.xlane.xlu0 %664 }
 0x2e7   :  { %v732_v61 = vsel %vm632_vm6, %v3794_v59, 0.0  ;;  %v691_v13 = vsub.f32 %v3727_v63, %v665_v9 }
 0x2e8   :  { %3160 = vpow2.f32 %v705_v60  ;;  %733 = vadd.xlane.f32.xlu1 %v732_v61  ;;  %v3798_v62 = vpop.eup %3158 }
 0x2e9   :  { %v738_v55 = vsel %vm632_vm6, %v3798_v62, 0.0  ;;  %v717_v16 = vmul.f32 1.442695, %v691_v13 }
 0x2ea   :  { %739 = vadd.xlane.f32.xlu0 %v738_v55 }
 0x2eb   :  { %v650_v51 = vpop.xlane.xlu2 %649 }
 0x2ec   :  { %v686_v52 = vsub.f32 %v3730_v0, %v650_v51 }
 0x2ee   :  { %v3803_v1 = vpop.eup %3160  ;;  %v707_v56 = vmul.f32 1.442695, %v686_v52  ;;  %v668_v15 = vpop.xlane.xlu1 %667 }
 0x2ef   :  { %v741_v2 = vsel %vm632_vm6, %v3803_v1, 0.0  ;;  %v674_v19 = vpop.xlane.xlu0 %673 }
 0x2f0   :  { %3162 = vpow2.f32 %v707_v56  ;;  %742 = vadd.xlane.f32.xlu1 %v741_v2  ;;  %v694_v49 = vsub.f32 %v3737_v57, %v674_v19 }
 0x2f2   :  { %v723_v26 = vmul.f32 1.442695, %v694_v49 }
 0x2f3   :  { %v653_v3 = vpop.xlane.xlu2 %652 }
 0x2f4   :  { %v687_v4 = vsub.f32 %v3743_v53, %v653_v3 }
 0x2f6   :  { %v3808_v6 = vpop.eup %3162  ;;  %v709_v8 = vmul.f32 1.442695, %v687_v4  ;;  %v677_v30 = vpop.xlane.xlu1 %676 }
 0x2f7   :  { %v744_v0 = vsel %vm632_vm6, %v3808_v6, 0.0 }
 0x2f8   :  { %3164 = vpow2.f32 %v709_v8  ;;  %745 = vadd.xlane.f32.xlu2 %v744_v0 }
 0x2fb   :  { %v656_v10 = vpop.xlane.xlu2 %655 }
 0x2fc   :  { %v688_v11 = vsub.f32 %v3755_v48, %v656_v10  ;;  %v692_v48 = vsub.f32 %v3740_v7, %v668_v15  ;;  %v695_v7 = vsub.f32 %v3752_v12, %v677_v30 }
 0x2fe   :  { %v3813_v5 = vpop.eup %3164  ;;  %v711_v14 = vmul.f32 1.442695, %v688_v11  ;;  %v719_v27 = vmul.f32 1.442695, %v692_v48  ;;  %v725_v40 = vmul.f32 1.442695, %v695_v7 }
 0x2ff   :  { %v747_v53 = vsel %vm632_vm6, %v3813_v5, 0.0 }
 0x300   :  { %3166 = vpow2.f32 %v711_v14  ;;  %748 = vadd.xlane.f32.xlu0 %v747_v53 }
 0x301   :  { %3168 = vpow2.f32 %v717_v16 }
 0x303   :  { %v659_v22 = vpop.xlane.xlu2 %658 }
 0x304   :  { %v689_v23 = vsub.f32 %v3762_v18, %v659_v22 }
 0x306   :  { %v3820_v25 = vpop.eup %3166  ;;  %v713_v63 = vmul.f32 1.442695, %v689_v23 }
 0x307   :  { %v750_v20 = vsel %vm632_vm6, %v3820_v25, 0.0  ;;  %v3825_v34 = vpop.eup %3168 }
 0x308   :  { %3170 = vpow2.f32 %v713_v63  ;;  %751 = vadd.xlane.f32.xlu1 %v750_v20  ;;  %v759_v37 = vsel %vm632_vm6, %v3825_v34, 0.0 }
 0x309   :  { %3172 = vpow2.f32 %v723_v26 }
 0x30a   :  { %3174 = vpow2.f32 %v719_v27 }
 0x30b   :  { %v662_v33 = vpop.xlane.xlu2 %661 }
 0x30c   :  { %v690_v18 = vsub.f32 %v3767_v24, %v662_v33 }
 0x30e   :  { %v3828_v57 = vpop.eup %3170  ;;  %v715_v35 = vmul.f32 1.442695, %v690_v18 }
 0x30f   :  { %v753_v38 = vsel %vm632_vm6, %v3828_v57, 0.0  ;;  %v3835_v42 = vpop.eup %3172 }
 0x310   :  { %3176 = vpow2.f32 %v715_v35  ;;  %760 = vadd.xlane.f32.xlu1 %v759_v37  ;;  %754 = vadd.xlane.f32.xlu2 %v753_v38  ;;  %v3837_v43 = vpop.eup %3174  ;;  %v768_v50 = vsel %vm632_vm6, %v3835_v42, 0.0 }
 0x311   :  { %3178 = vpow2.f32 %v725_v40  ;;  %v762_v17 = vsel %vm632_vm6, %v3837_v43, 0.0 }
 0x313   :  { %v671_v24 = vpop.xlane.xlu2 %670 }
 0x314   :  { %v693_v28 = vsub.f32 %v3772_v47, %v671_v24 }
 0x316   :  { %v3840_v46 = vpop.eup %3176  ;;  %v721_v12 = vmul.f32 1.442695, %v693_v28 }
 0x317   :  { %v756_v58 = vsel %vm632_vm6, %v3840_v46, 0.0  ;;  %v3848_v41 = vpop.eup %3178 }
 0x318   :  { %3180 = vpow2.f32 %v721_v12  ;;  %769 = vadd.xlane.f32.xlu1 %v768_v50  ;;  %763 = vadd.xlane.f32.xlu2 %v762_v17  ;;  %v771_v61 = vsel %vm632_vm6, %v3848_v41, 0.0 }
 0x319   :  { %757 = vadd.xlane.f32.xlu0 %v756_v58 }
 0x31b   :  { %v680_v36 = vpop.xlane.xlu2 %679 }
 0x31c   :  { %v696_v47 = vsub.f32 %v3777_v29, %v680_v36 }
 0x31e   :  { %v3851_v39 = vpop.eup %3180  ;;  %v727_v60 = vmul.f32 1.442695, %v696_v47 }
 0x31f   :  { %v765_v51 = vsel %vm632_vm6, %v3851_v39, 0.0 }
 0x320   :  { %3182 = vpow2.f32 %v727_v60  ;;  %772 = vadd.xlane.f32.xlu2 %v771_v61 }
 0x321   :  { %766 = vadd.xlane.f32.xlu0 %v765_v51 }
 0x326   :  { %v3857_v52 = vpop.eup %3182 }
 0x327   :  { %v774_v55 = vsel %vm632_vm6, %v3857_v52, 0.0 }
 0x329   :  { %775 = vadd.xlane.f32.xlu0 %v774_v55 }
 0x353   :  { %v731_v56 = vpop.xlane.xlu0 %730 }
 0x354   :  { %3184 = vrcp.f32 %v731_v56 }
 0x355   :  { %v737_v29 = vpop.xlane.xlu2 %736 }
 0x356   :  { %3186 = vrcp.f32 %v737_v29 }
 0x35a   :  { %v3185_v3 = vpop.eup %3184 }
 0x35b   :  { %v734_v2 = vpop.xlane.xlu1 %733  ;;  %v793_v4 = vmul.f32 %v3185_v3, %v3784_v21 }
 0x35c   :  { %3188 = vrcp.f32 %v734_v2  ;;  %v3187_v8 = vpop.eup %3186 }
 0x35d   :  { %v740_v0 = vpop.xlane.xlu0 %739  ;;  %v809_v10 = vpack.c.bf16 %v793_v4, %v793_v4  ;;  %v795_v14 = vmul.f32 %v3187_v8, %v3789_v54 }
 0x35e   :  { %3190 = vrcp.f32 %v740_v0 }
 0x35f   :  { %v843_v15 = vunpack.c.l.b16 %v809_v10  ;;  %v811_v22 = vpack.c.bf16 %v795_v14, %v795_v14 }
 0x361   :  { %v871_v20 = vunpack.c.l.b16 %v811_v22 }
 0x362   :  { %v3189_v9 = vpop.eup %3188 }
 0x363   :  { %v794_v11 = vmul.f32 %v3189_v9, %v3794_v59  ;;  %v743_v13 = vpop.xlane.xlu1 %742 }
 0x364   :  { %3192 = vrcp.f32 %v743_v13  ;;  %v3191_v19 = vpop.eup %3190 }
 0x365   :  { %v810_v53 = vpack.c.bf16 %v794_v11, %v794_v11  ;;  %v796_v23 = vmul.f32 %v3191_v19, %v3798_v62 }
 0x367   :  { %v844_v16 = vunpack.c.l.b16 %v810_v53  ;;  %v812_v21 = vpack.c.bf16 %v796_v23, %v796_v23 }
 0x369   :  { %v845_v49 = vpack.c.b16 %v844_v16, %v843_v15  ;;  %v872_v59 = vunpack.c.l.b16 %v812_v21 }
 0x36a   :  { %v3193_v63 = vpop.eup %3192 }
 0x36b   :  { %3018 = vmatmul.msk.bf16.vlgmr.msrb.gmra.mxu3 %vm632_vm6, %v845_v49  ;;  %v746_v48 = vpop.xlane.xlu2 %745  ;;  %v873_v26 = vpack.c.b16 %v872_v59, %v871_v20  ;;  %v797_v54 = vmul.f32 %v3193_v63, %v3803_v1 }
 0x36c   :  { %3194 = vrcp.f32 %v746_v48 }
 0x36d   :  { %3019 = vmatmul.msk.bf16.vlgmr.msrb.gmra.mxu2 %vm632_vm6, %v873_v26  ;;  %v813_v30 = vpack.c.bf16 %v797_v54, %v797_v54 }
 0x36f   :  { %v899_v7 = vunpack.c.l.b16 %v813_v30 }
 0x372   :  { %v3195_v27 = vpop.eup %3194 }
 0x373   :  { %v798_v33 = vmul.f32 %v3195_v27, %v3808_v6  ;;  %v749_v18 = vpop.xlane.xlu0 %748 }
 0x374   :  { %3196 = vrcp.f32 %v749_v18 }
 0x375   :  { %v814_v62 = vpack.c.bf16 %v798_v33, %v798_v33 }
 0x377   :  { %v900_v35 = vunpack.c.l.b16 %v814_v62  ;;  %v3028_v62 = vld [vmem:[%s4777_s10 + $0x70] sm:$0xff] }
 0x379   :  { %v901_v37 = vpack.c.b16 %v900_v35, %v899_v7  ;;  %v3027_v35 = vld [vmem:[%s4777_s10 + $0x68] sm:$0xff] }
 0x37a   :  { %v3197_v40 = vpop.eup %3196 }
 0x37b   :  { %v752_v38 = vpop.xlane.xlu1 %751  ;;  %3020 = vmatmul.msk.bf16.vlgmr.msra.gmra.mxu0 %vm632_vm6, %v901_v37  ;;  %v799_v24 = vmul.f32 %v3197_v40, %v3813_v5 }
 0x37c   :  { %3198 = vrcp.f32 %v752_v38 }
 0x37d   :  { %v815_v28 = vpack.c.bf16 %v799_v24, %v799_v24 }
 0x37f   :  { %v927_v58 = vunpack.c.l.b16 %v815_v28 }
 0x382   :  { %v3199_v1 = vpop.eup %3198 }
 0x383   :  { %v800_v12 = vmul.f32 %v3199_v1, %v3820_v25  ;;  %v761_v50 = vpop.xlane.xlu1 %760  ;;  %v755_v17 = vpop.xlane.xlu2 %754 }
 0x384   :  { %3200 = vrcp.f32 %v755_v17 }
 0x385   :  { %v816_v6 = vpack.c.bf16 %v800_v12, %v800_v12  ;;  %3202 = vrcp.f32 %v761_v50 }
 0x387   :  { %v928_v36 = vunpack.c.l.b16 %v816_v6 }
 0x389   :  { %v929_v47 = vpack.c.b16 %v928_v36, %v927_v58 }
 0x38a   :  { %v3201_v55 = vpop.eup %3200 }
 0x38b   :  { %3021 = vmatmul.msk.bf16.vlgmr.msra.gmra.mxu1 %vm632_vm6, %v929_v47  ;;  %v764_v60 = vpop.xlane.xlu2 %763  ;;  %v770_v61 = vpop.xlane.xlu1 %769  ;;  %v801_v25 = vmul.f32 %v3201_v55, %v3828_v57 }
 0x38c   :  { %v758_v51 = vpop.xlane.xlu0 %757  ;;  %v3203_v5 = vpop.eup %3202 }
 0x38d   :  { %3204 = vrcp.f32 %v758_v51  ;;  %v803_v56 = vmul.f32 %v3203_v5, %v3825_v34  ;;  %v817_v3 = vpack.c.bf16 %v801_v25, %v801_v25 }
 0x38e   :  { %3206 = vrcp.f32 %v764_v60 }
 0x38f   :  { %3208 = vrcp.f32 %v770_v61  ;;  %v819_v10 = vpack.c.bf16 %v803_v56, %v803_v56  ;;  %v955_v53 = vunpack.c.l.b16 %v817_v3 }
 0x391   :  { %v983_v34 = vunpack.c.l.b16 %v819_v10 }
 0x393   :  { %v3205_v29 = vpop.eup %3204  ;;  %v773_v0 = vpop.xlane.xlu2 %772 }
 0x394   :  { %v3207_v2 = vpop.eup %3206  ;;  %v802_v4 = vmul.f32 %v3205_v29, %v3840_v46  ;;  %v767_v8 = vpop.xlane.xlu0 %766 }
 0x395   :  { %v3209_v9 = vpop.eup %3208  ;;  %v804_v11 = vmul.f32 %v3207_v2, %v3837_v43  ;;  %3210 = vrcp.f32 %v767_v8 }
 0x396   :  { %v818_v13 = vpack.c.bf16 %v802_v4, %v802_v4  ;;  %3212 = vrcp.f32 %v773_v0  ;;  %v806_v57 = vmul.f32 %v3209_v9, %v3835_v42 }
 0x397   :  { %v820_v14 = vpack.c.bf16 %v804_v11, %v804_v11 }
 0x398   :  { %v956_v15 = vunpack.c.l.b16 %v818_v13  ;;  %v822_v46 = vpack.c.bf16 %v806_v57, %v806_v57 }
 0x399   :  { %v984_v16 = vunpack.c.l.b16 %v820_v14 }
 0x39a   :  { %v957_v19 = vpack.c.b16 %v956_v15, %v955_v53  ;;  %v1012_v63 = vunpack.c.l.b16 %v822_v46  ;;  %v3130_v53 = vld [vmem:[%s4776_s11 + $0x3] ss:$0 sm:$0xff] }
 0x39b   :  { %v3211_v22 = vpop.eup %3210  ;;  %v985_v23 = vpack.c.b16 %v984_v16, %v983_v34 }
 0x39c   :  { %v805_v49 = vmul.f32 %v3211_v22, %v3851_v39  ;;  %v776_v21 = vpop.xlane.xlu0 %775  ;;  %3022 = vmatmul.msk.bf16.vlgmr.msra.gmra.mxu3 %vm632_vm6, %v957_v19  ;;  %v3213_v43 = vpop.eup %3212 }
 0x39d   :  { %3214 = vrcp.f32 %v776_v21  ;;  %3023 = vmatmul.msk.bf16.vlgmr.msra.gmra.mxu2 %vm632_vm6, %v985_v23  ;;  %v807_v42 = vmul.f32 %v3213_v43, %v3848_v41  ;;  %v3029_v41 = vld [vmem:[%s4777_s10 + $0x78] sm:$0xff] }
 0x39e   :  { %v821_v48 = vpack.c.bf16 %v805_v49, %v805_v49  ;;  %v1085_v7 = vpack.c.bf16 %v3029_v41, %v3028_v62 }
 0x39f   :  { %v823_v54 = vpack.c.bf16 %v807_v42, %v807_v42 }
 0x3a0   :  { %v1011_v20 = vunpack.c.l.b16 %v821_v48  ;;  %1103 = vmatpush.bf16.msrb.mxu3 %v1085_v7 }
 0x3a1   :  { %v1039_v30 = vunpack.c.l.b16 %v823_v54 }
 0x3a2   :  { %v1013_v59 = vpack.c.b16 %v1012_v63, %v1011_v20 }
 0x3a3   :  { %v3215_v26 = vpop.eup %3214 }
 0x3a4   :  { %v808_v27 = vmul.f32 %v3215_v26, %v3857_v52  ;;  %3024 = vmatmul.msk.bf16.vlgmr.msrb.gmra.mxu0 %vm632_vm6, %v1013_v59  ;;  %v3026_v52 = vld [vmem:[%s4777_s10 + $0x60] sm:$0xff]  ;;  %v3336_v59 = vmov 32.0  }
 0x3a5   :  { %v1084_v37 = vpack.c.bf16 %v3027_v35, %v3026_v52  ;;  %3216 = vrcp.f32 %v3336_v59 }
 0x3a6   :  { %v824_v39 = vpack.c.bf16 %v808_v27, %v808_v27 }
 0x3a7   :  { %1104 = vmatpush.bf16.msrb.mxu3 %v1084_v37 }
 0x3a8   :  { %v1040_v33 = vunpack.c.l.b16 %v824_v39 }
 0x3aa   :  { %v1041_v18 = vpack.c.b16 %v1040_v33, %v1039_v30 }
 0x3ac   :  { %3025 = vmatmul.msk.bf16.vlgmr.msrb.gmra.mxu1 %vm632_vm6, %v1041_v18 }
 0x3ee   :  { %v864_v38 = vpop.f32.mrf.mxu3 }
 0x3f0   :  { %v892_v40 = vpop.f32.mrf.mxu2 }
 0x3f1   :  { %v1065_v17 = vadd.f32 %v892_v40, %v864_v38 }
 0x3f6   :  { %v866_v28 = vpop.f32.mrf.mxu3 }
 0x3f8   :  { %v920_v24 = vpop.f32.mrf.mxu0  ;;  %v894_v12 = vpop.f32.mrf.mxu2 }
 0x3f9   :  { %v1066_v6 = vadd.f32 %v894_v12, %v866_v28  ;;  %v1069_v58 = vadd.f32 %v1065_v17, %v920_v24 }
 0x400   :  { %v922_v50 = vpop.f32.mrf.mxu0 }
 0x401   :  { %v1070_v36 = vadd.f32 %v1066_v6, %v922_v50 }
 0x408   :  { %v948_v1 = vpop.f32.mrf.mxu1 }
 0x409   :  { %v1073_v60 = vadd.f32 %v1069_v58, %v948_v1 }
 0x410   :  { %v950_v47 = vpop.f32.mrf.mxu1 }
 0x411   :  { %v1074_v61 = vadd.f32 %v1070_v36, %v950_v47 }
 0x413   :  { %v1082_v51 = vpack.c.bf16 %v1074_v61, %v1073_v60  ;;  %v1233_v61 = vld [vmem:[%s4784_s14 + $0x10] sm:$0xff] }
 0x415   :  { %3031 = vmatmul.msk.bf16.vlgmr.msrb.gmra.mxu3 %vm78_vm0, %v1082_v51  ;;  %v1234_v51 = vld [vmem:[%s4784_s14 + $0x18] sm:$0xff] }
 0x41f   :  { %v976_v55 = vpop.f32.mrf.mxu3 }
 0x420   :  { %v1004_v5 = vpop.f32.mrf.mxu2 }
 0x421   :  { %v1032_v25 = vpop.f32.mrf.mxu0  ;;  %v1067_v3 = vadd.f32 %v1004_v5, %v976_v55  ;;  %v1238_v55 = vpack.c.bf16 %v1234_v51, %v1233_v61 }
 0x423   :  { %v1071_v0 = vadd.f32 %v1067_v3, %v1032_v25  ;;  %1255 = vmatpush.bf16.msrb.mxu2 %v1238_v55  ;;  %v1231_v3 = vld [vmem:[%s4784_s14] sm:$0xff] }
 0x427   :  { %v978_v56 = vpop.f32.mrf.mxu3 }
 0x428   :  { %v1006_v29 = vpop.f32.mrf.mxu2 }
 0x429   :  { %v1060_v2 = vpop.f32.mrf.mxu1  ;;  %v1068_v4 = vadd.f32 %v1006_v29, %v978_v56  ;;  %v1034_v8 = vpop.f32.mrf.mxu0 }
 0x42a   :  { %v1075_v11 = vadd.f32 %v1071_v0, %v1060_v2 }
 0x42b   :  { %v1072_v9 = vadd.f32 %v1068_v4, %v1034_v8  ;;  %v1232_v4 = vld [vmem:[%s4784_s14 + $0x8] sm:$0xff] }
 0x42c   :  { %v1237_v0 = vpack.c.bf16 %v1232_v4, %v1231_v3 }
 0x42e   :  { %1256 = vmatpush.bf16.msrb.mxu2 %v1237_v0 }
 0x431   :  { %v1062_v10 = vpop.f32.mrf.mxu1 }
 0x432   :  { %v1076_v13 = vadd.f32 %v1072_v9, %v1062_v10 }
 0x434   :  { %v1083_v14 = vpack.c.bf16 %v1076_v13, %v1075_v11 }
 0x436   :  { %3032 = vmatmul.msk.bf16.gmra.mxu3 %vm78_vm0, %v1083_v14 }
 0x498   :  { %v1106_v57 = vpop.f32.mrf.mxu3 }
 0x499   :  { %v1107_v15 = vadd.f32 %v3130_v53, %v1106_v57 }
 0x49b   :  { %v1116_v34 = vadd.f32 %v1107_v15, %v3558_v31 }
 0x49d   :  { %v1122_v16 = vsel %vm78_vm0, %v1116_v34, 0.0 }
 0x49e   :  { %1123 = vadd.xlane.f32.xlu1 %v1122_v16  ;;  %v3131_v16 = vld [vmem:[%s4781_s12] ss:$0 sm:$0xff] }
 0x4a0   :  { %v1108_v19 = vpop.f32.mrf.mxu3 }
 0x4a1   :  { %v1109_v22 = vadd.f32 %v3130_v53, %v1108_v19 }
 0x4a3   :  { %v1117_v23 = vadd.f32 %v1109_v22, %v3560_v32  ;;  %v3217_v32 = vpop.eup %3216 }
 0x4a4   :  { %v1135_v26 = vmul.f32 32.0, %v3217_v32  ;;  %vm1139_vm7 = vweird.f32 %v3217_v32 }
 0x4a5   :  { %v1125_v46 = vsel %vm78_vm0, %v1117_v23, 0.0 }
 0x4a6   :  { %1126 = vadd.xlane.f32.xlu2 %v1125_v46  ;;  %v1136_v54 = vsub.f32 1.0, %v1135_v26  ;;  %v3132_v46 = vld [vmem:[%s4782_s13] ss:$0 sm:$0xff] }
 0x4a8   :  { %v1137_v27 = vmul.f32 %v3217_v32, %v1136_v54 }
 0x4aa   :  { %v1138_v39 = vadd.f32 %v3217_v32, %v1137_v27 }
 0x4ac   :  { %v3910_v30 = vsel %vm1139_vm7, %v3217_v32, %v1138_v39 }
 0x4b9   :  { %v1111_v49 = vpop.f32.mrf.mxu3 }
 0x4ba   :  { %v1112_v21 = vadd.f32 %v3130_v53, %v1111_v49 }
 0x4bc   :  { %v1118_v43 = vadd.f32 %v1112_v21, %v3567_v44 }
 0x4be   :  { %v1128_v48 = vsel %vm78_vm0, %v1118_v43, 0.0 }
 0x4bf   :  { %1129 = vadd.xlane.f32.xlu0 %v1128_v48 }
 0x4c1   :  { %v1113_v63 = vpop.f32.mrf.mxu3 }
 0x4c2   :  { %v1114_v20 = vadd.f32 %v3130_v53, %v1113_v63 }
 0x4c4   :  { %v1119_v31 = vadd.f32 %v1114_v20, %v3569_v45 }
 0x4c6   :  { %v1131_v42 = vsel %vm78_vm0, %v1119_v31, 0.0 }
 0x4c7   :  { %1132 = vadd.xlane.f32.xlu1 %v1131_v42 }
 0x511   :  { %v1124_v44 = vpop.xlane.xlu1 %1123 }
 0x512   :  { %v1141_v33 = vmul.f32 %v3910_v30, %v1124_v44 }
 0x514   :  { %v1145_v18 = vsub.f32 %v1116_v34, %v1141_v33 }
 0x516   :  { %v1149_v62 = vmul.f32 %v1145_v18, %v1145_v18 }
 0x518   :  { %v1153_v45 = vsel %vm78_vm0, %v1149_v62, 0.0 }
 0x519   :  { %1154 = vadd.xlane.f32.xlu2 %v1153_v45  ;;  %v1127_v41 = vpop.xlane.xlu2 %1126 }
 0x51a   :  { %v1142_v7 = vmul.f32 %v3910_v30, %v1127_v41 }
 0x51c   :  { %v1146_v52 = vsub.f32 %v1117_v23, %v1142_v7 }
 0x51e   :  { %v1150_v35 = vmul.f32 %v1146_v52, %v1146_v52 }
 0x520   :  { %v1156_v37 = vsel %vm78_vm0, %v1150_v35, 0.0 }
 0x521   :  { %1157 = vadd.xlane.f32.xlu0 %v1156_v37 }
 0x532   :  { %v1130_v38 = vpop.xlane.xlu0 %1129 }
 0x533   :  { %v1143_v40 = vmul.f32 %v3910_v30, %v1130_v38 }
 0x535   :  { %v3917_v24 = vsub.f32 %v1118_v43, %v1143_v40 }
 0x537   :  { %v1151_v1 = vmul.f32 %v3917_v24, %v3917_v24 }
 0x539   :  { %v1159_v28 = vsel %vm78_vm0, %v1151_v1, 0.0 }
 0x53a   :  { %v1133_v12 = vpop.xlane.xlu1 %1132  ;;  %1160 = vadd.xlane.f32.xlu1 %v1159_v28 }
 0x53b   :  { %v1144_v50 = vmul.f32 %v3910_v30, %v1133_v12 }
 0x53d   :  { %v3923_v17 = vsub.f32 %v1119_v31, %v1144_v50 }
 0x53f   :  { %v1152_v6 = vmul.f32 %v3923_v17, %v3923_v17 }
 0x541   :  { %v1162_v58 = vsel %vm78_vm0, %v1152_v6, 0.0 }
 0x542   :  { %1163 = vadd.xlane.f32.xlu2 %v1162_v58 }
 0x58c   :  { %v1155_v36 = vpop.xlane.xlu2 %1154 }
 0x58d   :  { %v1165_v47 = vmul.f32 %v1155_v36, %v3910_v30 }
 0x58f   :  { %v1169_v60 = vadd.f32 1e-05, %v1165_v47 }
 0x591   :  { %3218 = vrsqrt.f32 %v1169_v60  ;;  %vm1179_vm9 = vweird.f32 %v1169_v60 }
 0x594   :  { %v1158_v5 = vpop.xlane.xlu0 %1157 }
 0x595   :  { %v1166_v25 = vmul.f32 %v1158_v5, %v3910_v30 }
 0x597   :  { %v3219_v56 = vpop.eup %3218  ;;  %v1170_v29 = vadd.f32 1e-05, %v1166_v25 }
 0x598   :  { %v1174_v2 = vmul.f32 %v3219_v56, %v1169_v60  ;;  %vm1180_vm8 = vweird.f32 %v3219_v56 }
 0x599   :  { %3220 = vrsqrt.f32 %v1170_v29  ;;  %vm1181_vm10 = vmor %vm1179_vm9, %vm1180_vm8  ;;  %vm1189_vm12 = vweird.f32 %v1170_v29 }
 0x59a   :  { %v1175_v8 = vmul.f32 %v3219_v56, %v1174_v2 }
 0x59c   :  { %v1176_v9 = vmul.f32 0.5, %v1175_v8 }
 0x59e   :  { %v1177_v10 = vsub.f32 1.5, %v1176_v9 }
 0x59f   :  { %v3221_v11 = vpop.eup %3220 }
 0x5a0   :  { %v1178_v13 = vmul.f32 %v3219_v56, %v1177_v10  ;;  %v1184_v14 = vmul.f32 %v3221_v11, %v1170_v29  ;;  %vm1190_vm11 = vweird.f32 %v3221_v11 }
 0x5a1   :  { %vm1191_vm13 = vmor %vm1189_vm12, %vm1190_vm11 }
 0x5a2   :  { %v1185_v53 = vmul.f32 %v3221_v11, %v1184_v14  ;;  %v1182_v57 = vsel %vm1181_vm10, %v3219_v56, %v1178_v13 }
 0x5a3   :  { %v1213_v19 = vmul.f32 %v1182_v57, %v1145_v18 }
 0x5a4   :  { %v1186_v15 = vmul.f32 0.5, %v1185_v53 }
 0x5a5   :  { %v1220_v49 = vmul.f32 %v3131_v16, %v1213_v19 }
 0x5a6   :  { %v1187_v34 = vsub.f32 1.5, %v1186_v15 }
 0x5a7   :  { %v3949_v20 = vadd.f32 %v3132_v46, %v1220_v49 }
 0x5a8   :  { %v1188_v22 = vmul.f32 %v3221_v11, %v1187_v34 }
 0x5aa   :  { %v1192_v23 = vsel %vm1191_vm13, %v3221_v11, %v1188_v22 }
 0x5ab   :  { %v1214_v21 = vmul.f32 %v1192_v23, %v1146_v52 }
 0x5ad   :  { %v1221_v43 = vmul.f32 %v3131_v16, %v1214_v21  ;;  %v1161_v48 = vpop.xlane.xlu1 %1160 }
 0x5ae   :  { %v1167_v63 = vmul.f32 %v1161_v48, %v3910_v30 }
 0x5af   :  { %v3951_v31 = vadd.f32 %v3132_v46, %v1221_v43 }
 0x5b0   :  { %v1171_v42 = vadd.f32 1e-05, %v1167_v63  ;;  %v1450_v63 = vld [vmem:[%s4786_s16 + $0x30] sm:$0xff] }
 0x5b1   :  { %v1235_v59 = vpack.c.bf16 %v3951_v31, %v3949_v20 }
 0x5b2   :  { %3222 = vrsqrt.f32 %v1171_v42  ;;  %vm1199_vm15 = vweird.f32 %v1171_v42 }
 0x5b3   :  { %3033 = vmatmul.msk.bf16.vlgmr.msrb.gmra.mxu2 %vm78_vm0, %v1235_v59 }
 0x5b5   :  { %v1164_v32 = vpop.xlane.xlu2 %1163 }
 0x5b6   :  { %v1168_v26 = vmul.f32 %v1164_v32, %v3910_v30 }
 0x5b8   :  { %v3223_v54 = vpop.eup %3222  ;;  %v1172_v27 = vadd.f32 1e-05, %v1168_v26 }
 0x5b9   :  { %v1194_v39 = vmul.f32 %v3223_v54, %v1171_v42  ;;  %vm1200_vm14 = vweird.f32 %v3223_v54  ;;  %v1451_v42 = vld [vmem:[%s4786_s16 + $0x38] sm:$0xff] }
 0x5ba   :  { %3224 = vrsqrt.f32 %v1172_v27  ;;  %vm1201_vm1 = vmor %vm1199_vm15, %vm1200_vm14  ;;  %vm1209_vm3 = vweird.f32 %v1172_v27  ;;  %vm1462_vm14 = vcmask 523264  }
 0x5bb   :  { %v1195_v44 = vmul.f32 %v3223_v54, %v1194_v39 }
 0x5bd   :  { %v1196_v33 = vmul.f32 0.5, %v1195_v44  ;;  %v1448_v44 = vld [vmem:[%s4786_s16 + $0x20] sm:$0xff] }
 0x5bf   :  { %v1197_v18 = vsub.f32 1.5, %v1196_v33  ;;  %v1449_v33 = vld [vmem:[%s4786_s16 + $0x28] sm:$0xff] }
 0x5c0   :  { %v3225_v62 = vpop.eup %3224 }
 0x5c1   :  { %v1198_v45 = vmul.f32 %v3223_v54, %v1197_v18  ;;  %v1204_v41 = vmul.f32 %v3225_v62, %v1172_v27  ;;  %vm1210_vm2 = vweird.f32 %v3225_v62 }
 0x5c2   :  { %vm1211_vm4 = vmor %vm1209_vm3, %vm1210_vm2 }
 0x5c3   :  { %v1205_v7 = vmul.f32 %v3225_v62, %v1204_v41  ;;  %v1202_v52 = vsel %vm1201_vm1, %v3223_v54, %v1198_v45  ;;  %v1457_v54 = vpack.c.bf16 %v1451_v42, %v1450_v63  ;;  %v1456_v45 = vpack.c.bf16 %v1449_v33, %v1448_v44 }
 0x5c4   :  { %v1215_v38 = vmul.f32 %v1202_v52, %v3917_v24  ;;  %v3969_v24 = vld [vmem:[%s4783_s15] ss:$0 sm:$0xff] }
 0x5c5   :  { %v1206_v35 = vmul.f32 0.5, %v1205_v7  ;;  %1473 = vmatpush.bf16.msra.mxu0 %v1457_v54 }
 0x5c6   :  { %v1222_v12 = vmul.f32 %v3131_v16, %v1215_v38  ;;  %v1447_v38 = vld [vmem:[%s4786_s16 + $0x18] sm:$0xff] }
 0x5c7   :  { %v1207_v37 = vsub.f32 1.5, %v1206_v35 }
 0x5c8   :  { %v3959_v6 = vadd.f32 %v3132_v46, %v1222_v12 }
 0x5c9   :  { %v1208_v40 = vmul.f32 %v3225_v62, %v1207_v37  ;;  %1474 = vmatpush.bf16.msra.mxu0 %v1456_v45  ;;  %v1446_v37 = vld [vmem:[%s4786_s16 + $0x10] sm:$0xff] }
 0x5ca   :  { %v1455_v12 = vpack.c.bf16 %v1447_v38, %v1446_v37 }
 0x5cb   :  { %v1212_v1 = vsel %vm1211_vm4, %v3225_v62, %v1208_v40 }
 0x5cc   :  { %v1216_v28 = vmul.f32 %v1212_v1, %v3923_v17 }
 0x5cd   :  { %1475 = vmatpush.bf16.msra.mxu0 %v1455_v12 }
 0x5ce   :  { %v1223_v50 = vmul.f32 %v3131_v16, %v1216_v28 }
 0x5d0   :  { %v3961_v58 = vadd.f32 %v3132_v46, %v1223_v50 }
 0x5d2   :  { %v1236_v36 = vpack.c.bf16 %v3961_v58, %v3959_v6 }
 0x5d4   :  { %3034 = vmatmul.msk.bf16.gmra.mxu2 %vm78_vm0, %v1236_v36 }
 0x636   :  { %v1258_v47 = vpop.f32.mrf.mxu2 }
 0x637   :  { %v3972_v60 = vadd.f32 %v3969_v24, %v1258_v47 }
 0x639   :  { %v3975_v17 = vmul.f32 0.70710677, %v3972_v60 }
 0x63b   :  { %v1276_v61 = vmul.f32 %v3975_v17, %v3975_v17 }
 0x63d   :  { %v3979_v51 = vmin.f32 %v1276_v61, 16.0 }
 0x63e   :  { %v1260_v55 = vpop.f32.mrf.mxu2 }
 0x63f   :  { %v1278_v5 = vmul.f32 2.1237322e-06, %v3979_v51  ;;  %v1289_v25 = vmul.f32 3.8918573e-05, %v3979_v51  ;;  %v3984_v56 = vadd.f32 %v3969_v24, %v1260_v55  ;;  %v1444_v55 = vld [vmem:[%s4786_s16] sm:$0xff] }
 0x641   :  { %v1279_v29 = vadd.f32 0.00028619796, %v1278_v5  ;;  %v1290_v2 = vadd.f32 0.001143296, %v1289_v25  ;;  %v3987_v3 = vmul.f32 0.70710677, %v3984_v56 }
 0x642   :  { %v1445_v5 = vld [vmem:[%s4786_s16 + $0x8] sm:$0xff] }
 0x643   :  { %v1291_v4 = vmul.f32 %v1290_v2, %v3979_v51  ;;  %v1316_v8 = vmul.f32 %v3987_v3, %v3987_v3  ;;  %v1280_v0 = vmul.f32 %v1279_v29, %v3979_v51 }
 0x645   :  { %v1292_v9 = vadd.f32 0.014752088, %v1291_v4  ;;  %v3993_v10 = vmin.f32 %v1316_v8, 16.0  ;;  %v1281_v53 = vadd.f32 0.0036580483, %v1280_v0  ;;  %v1454_v4 = vpack.c.bf16 %v1445_v5, %v1444_v55 }
 0x647   :  { %v1293_v11 = vmul.f32 %v1292_v9, %v3979_v51  ;;  %v1318_v13 = vmul.f32 2.1237322e-06, %v3993_v10  ;;  %v1329_v14 = vmul.f32 3.8918573e-05, %v3993_v10  ;;  %v1282_v23 = vmul.f32 %v1281_v53, %v3979_v51  ;;  %1476 = vmatpush.bf16.msra.mxu0 %v1454_v4 }
 0x648   :  { %v1268_v4 = vmul.f32 0.5, %v3972_v60 }
 0x649   :  { %v1294_v57 = vadd.f32 0.112945676, %v1293_v11  ;;  %v1319_v15 = vadd.f32 0.00028619796, %v1318_v13  ;;  %v1330_v34 = vadd.f32 0.001143296, %v1329_v14 }
 0x64a   :  { %v1283_v59 = vadd.f32 0.05243302, %v1282_v23 }
 0x64b   :  { %v1295_v16 = vmul.f32 %v1294_v57, %v3979_v51  ;;  %v1320_v19 = vmul.f32 %v1319_v15, %v3993_v10  ;;  %v1331_v22 = vmul.f32 %v1330_v34, %v3993_v10 }
 0x64c   :  { %v1284_v18 = vmul.f32 %v1283_v59, %v3979_v51 }
 0x64d   :  { %v1296_v46 = vadd.f32 0.4994258, %v1295_v16  ;;  %v1321_v49 = vadd.f32 0.0036580483, %v1320_v19  ;;  %v1332_v21 = vadd.f32 0.014752088, %v1331_v22 }
 0x64e   :  { %v1285_v1 = vadd.f32 0.18741608, %v1284_v18 }
 0x64f   :  { %v1297_v43 = vmul.f32 %v1296_v46, %v3979_v51  ;;  %v1333_v48 = vmul.f32 %v1332_v21, %v3993_v10  ;;  %v1322_v26 = vmul.f32 %v1321_v49, %v3993_v10 }
 0x650   :  { %v1286_v25 = vmul.f32 %v1285_v1, %v3979_v51 }
 0x651   :  { %v1298_v32 = vadd.f32 1.0, %v1297_v43  ;;  %v1334_v27 = vadd.f32 0.112945676, %v1333_v48  ;;  %v1323_v62 = vadd.f32 0.05243302, %v1322_v26 }
 0x652   :  { %v1287_v57 = vadd.f32 1.1283791, %v1286_v25 }
 0x653   :  { %3226 = vrcp.f32 %v1298_v32  ;;  %v1335_v39 = vmul.f32 %v1334_v27, %v3993_v10  ;;  %v1324_v28 = vmul.f32 %v1323_v62, %v3993_v10  ;;  %v1310_v0 = vand.u32 2147483648, %v1298_v32 }
 0x654   :  { %v1308_v9 = vand.u32 2147483647, %v1298_v32  ;;  %vm1304_vm7 = vweird.f32 %v1298_v32 }
 0x655   :  { %v1336_v41 = vadd.f32 0.4994258, %v1335_v39  ;;  %v1325_v29 = vadd.f32 0.18741608, %v1324_v28  ;;  %v1311_v22 = vor.u32 1.1754944e-38, %v1310_v0 }
 0x656   :  { %vm1309_vm9 = vcmp.eq.f32.partialorder %v1308_v9, 8.507059e+37 }
 0x657   :  { %v1263_v7 = vpop.f32.mrf.mxu2  ;;  %v1337_v52 = vmul.f32 %v1336_v41, %v3993_v10  ;;  %v1326_v51 = vmul.f32 %v1325_v29, %v3993_v10  ;;  %v1288_v10 = vmul.f32 %v1287_v57, %v3975_v17 }
 0x658   :  { %v4021_v35 = vadd.f32 %v3969_v24, %v1263_v7 }
 0x659   :  { %v3227_v40 = vpop.eup %3226  ;;  %v1338_v36 = vadd.f32 1.0, %v1337_v52  ;;  %v1327_v48 = vadd.f32 1.1283791, %v1326_v51 }
 0x65a   :  { %v1300_v50 = vmul.f32 %v3227_v40, %v1298_v32  ;;  %v4031_v47 = vmul.f32 0.70710677, %v4021_v35  ;;  %vm1305_vm5 = vweird.f32 %v3227_v40 }
 0x65b   :  { %3228 = vrcp.f32 %v1338_v36  ;;  %vm1306_vm8 = vmor %vm1304_vm7, %vm1305_vm5  ;;  %v1350_v42 = vand.u32 2147483648, %v1338_v36  ;;  %v1348_v39 = vand.u32 2147483647, %v1338_v36  ;;  %v1328_v18 = vmul.f32 %v1327_v48, %v3987_v3 }
 0x65c   :  { %v1301_v61 = vsub.f32 1.0, %v1300_v50  ;;  %v1356_v2 = vmul.f32 %v4031_v47, %v4031_v47  ;;  %vm1344_vm11 = vweird.f32 %v1338_v36 }
 0x65d   :  { %v1351_v45 = vor.u32 1.1754944e-38, %v1350_v42  ;;  %vm1349_vm13 = vcmp.eq.f32.partialorder %v1348_v39, 8.507059e+37 }
 0x65e   :  { %v1302_v8 = vmul.f32 %v3227_v40, %v1301_v61  ;;  %v4042_v11 = vmin.f32 %v1356_v2, 16.0 }
 0x65f   :  { %v1265_v13 = vpop.f32.mrf.mxu2 }
 0x660   :  { %v1303_v14 = vadd.f32 %v3227_v40, %v1302_v8  ;;  %v4045_v53 = vadd.f32 %v3969_v24, %v1265_v13  ;;  %v1358_v15 = vmul.f32 2.1237322e-06, %v4042_v11  ;;  %v1369_v34 = vmul.f32 3.8918573e-05, %v4042_v11 }
 0x661   :  { %v3229_v16 = vpop.eup %3228  ;;  %v1269_v8 = vmul.f32 0.5, %v3984_v56 }
 0x662   :  { %v1307_v19 = vsel %vm1306_vm8, %v3227_v40, %v1303_v14  ;;  %v4051_v23 = vmul.f32 0.70710677, %v4045_v53  ;;  %v1340_v46 = vmul.f32 %v3229_v16, %v1338_v36  ;;  %v1359_v49 = vadd.f32 0.00028619796, %v1358_v15 }
 0x663   :  { %v1312_v21 = vsel %vm1309_vm9, %v1311_v22, %v1307_v19  ;;  %v1370_v24 = vadd.f32 0.001143296, %v1369_v34  ;;  %vm1345_vm10 = vweird.f32 %v3229_v16 }
 0x664   :  { %v1396_v43 = vmul.f32 %v4051_v23, %v4051_v23  ;;  %v1341_v63 = vsub.f32 1.0, %v1340_v46  ;;  %v1360_v59 = vmul.f32 %v1359_v49, %v4042_v11  ;;  %v1313_v54 = vmul.f32 %v1312_v21, %v1288_v10  ;;  %vm1346_vm12 = vmor %vm1344_vm11, %vm1345_vm10 }
 0x665   :  { %v1371_v32 = vmul.f32 %v1370_v24, %v4042_v11 }
 0x666   :  { %v4058_v26 = vmin.f32 %v1396_v43, 16.0  ;;  %v1342_v27 = vmul.f32 %v3229_v16, %v1341_v63  ;;  %v1361_v41 = vadd.f32 0.0036580483, %v1360_v59  ;;  %v3035_v37 = vclamps-f32 %v1313_v54, 1.0 }
 0x667   :  { %v1372_v44 = vadd.f32 0.014752088, %v1371_v32 }
 0x668   :  { %v1398_v33 = vmul.f32 2.1237322e-06, %v4058_v26  ;;  %v1343_v62 = vadd.f32 %v3229_v16, %v1342_v27  ;;  %v1409_v17 = vmul.f32 3.8918573e-05, %v4058_v26  ;;  %v1362_v36 = vmul.f32 %v1361_v41, %v4042_v11 }
 0x669   :  { %v1373_v7 = vmul.f32 %v1372_v44, %v4042_v11  ;;  %v1436_v55 = vadd.f32 1.0, %v3035_v37 }
 0x66a   :  { %v1399_v52 = vadd.f32 0.00028619796, %v1398_v33  ;;  %v1347_v38 = vsel %vm1346_vm12, %v3229_v16, %v1343_v62  ;;  %v1410_v40 = vadd.f32 0.001143296, %v1409_v17  ;;  %v1363_v13 = vadd.f32 0.05243302, %v1362_v36 }
 0x66b   :  { %v1352_v1 = vsel %vm1349_vm13, %v1351_v45, %v1347_v38  ;;  %v1374_v28 = vadd.f32 0.112945676, %v1373_v7  ;;  %v1440_v57 = vmul.f32 %v1436_v55, %v1268_v4 }
 0x66c   :  { %v1400_v12 = vmul.f32 %v1399_v52, %v4058_v26  ;;  %v1353_v50 = vmul.f32 %v1352_v1, %v1328_v18  ;;  %v1411_v3 = vmul.f32 %v1410_v40, %v4058_v26  ;;  %v1364_v60 = vmul.f32 %v1363_v13, %v4042_v11 }
 0x66d   :  { %v1375_v61 = vmul.f32 %v1374_v28, %v4042_v11 }
 0x66e   :  { %v3036_v5 = vclamps-f32 %v1353_v50, 1.0  ;;  %v1401_v25 = vadd.f32 0.0036580483, %v1400_v12  ;;  %v1412_v29 = vadd.f32 0.014752088, %v1411_v3 }
 0x66f   :  { %v1376_v2 = vadd.f32 0.4994258, %v1375_v61  ;;  %v1365_v21 = vadd.f32 0.18741608, %v1364_v60 }
 0x670   :  { %v1437_v0 = vadd.f32 1.0, %v3036_v5  ;;  %v1413_v9 = vmul.f32 %v1412_v29, %v4058_v26  ;;  %v1402_v15 = vmul.f32 %v1401_v25, %v4058_v26  ;;  %v1270_v5 = vmul.f32 0.5, %v4021_v35 }
 0x671   :  { %v1377_v14 = vmul.f32 %v1376_v2, %v4042_v11  ;;  %v1366_v63 = vmul.f32 %v1365_v21, %v4042_v11  ;;  %v1271_v25 = vmul.f32 0.5, %v4045_v53 }
 0x672   :  { %v1441_v51 = vmul.f32 %v1437_v0, %v1269_v8  ;;  %v1414_v34 = vadd.f32 0.112945676, %v1413_v9  ;;  %v1403_v56 = vadd.f32 0.05243302, %v1402_v15 }
 0x673   :  { %v1378_v16 = vadd.f32 1.0, %v1377_v14  ;;  %v1367_v39 = vadd.f32 1.1283791, %v1366_v63 }
 0x674   :  { %v1452_v19 = vpack.c.bf16 %v1441_v51, %v1440_v57  ;;  %v1415_v22 = vmul.f32 %v1414_v34, %v4058_v26  ;;  %v1404_v24 = vmul.f32 %v1403_v56, %v4058_v26 }
 0x675   :  { %3230 = vrcp.f32 %v1378_v16  ;;  %v1390_v32 = vand.u32 2147483648, %v1378_v16  ;;  %v1388_v27 = vand.u32 2147483647, %v1378_v16  ;;  %vm1384_vm1 = vweird.f32 %v1378_v16 }
 0x676   :  { %v1416_v46 = vadd.f32 0.4994258, %v1415_v22  ;;  %3039 = vmatmul.msk.bf16.vlgmr.msra.gmra.mxu0 %vm1462_vm14, %v1452_v19  ;;  %v1405_v59 = vadd.f32 0.18741608, %v1404_v24  ;;  %v1368_v41 = vmul.f32 %v1367_v39, %v4031_v47 }
 0x677   :  { %v1391_v62 = vor.u32 1.1754944e-38, %v1390_v32  ;;  %vm1389_vm3 = vcmp.eq.f32.partialorder %v1388_v27, 8.507059e+37 }
 0x678   :  { %v1417_v49 = vmul.f32 %v1416_v46, %v4058_v26  ;;  %v1406_v18 = vmul.f32 %v1405_v59, %v4058_v26 }
 0x67a   :  { %v1418_v43 = vadd.f32 1.0, %v1417_v49  ;;  %v1407_v52 = vadd.f32 1.1283791, %v1406_v18 }
 0x67b   :  { %v3231_v10 = vpop.eup %3230 }
 0x67c   :  { %v1380_v48 = vmul.f32 %v3231_v10, %v1378_v16  ;;  %3232 = vrcp.f32 %v1418_v43  ;;  %vm1385_vm15 = vweird.f32 %v3231_v10  ;;  %v1430_v37 = vand.u32 2147483648, %v1418_v43 }
 0x67d   :  { %vm1386_vm2 = vmor %vm1384_vm1, %vm1385_vm15  ;;  %v1428_v1 = vand.u32 2147483647, %v1418_v43  ;;  %vm1424_vm5 = vweird.f32 %v1418_v43  ;;  %v1408_v50 = vmul.f32 %v1407_v52, %v4051_v23  ;;  %v3134_v23 = vld [vmem:[%s4785_s17] ss:$0 sm:$0xff] }
 0x67e   :  { %v1381_v42 = vsub.f32 1.0, %v1380_v48  ;;  %v1431_v12 = vor.u32 1.1754944e-38, %v1430_v37  ;;  %v3053_v37 = vld [vmem:[%s4777_s10 + $0xb8] sm:$0xff] }
 0x67f   :  { %vm1429_vm8 = vcmp.eq.f32.partialorder %v1428_v1, 8.507059e+37 }
 0x680   :  { %v1382_v54 = vmul.f32 %v3231_v10, %v1381_v42 }
 0x682   :  { %v3233_v44 = vpop.eup %3232  ;;  %v1383_v33 = vadd.f32 %v3231_v10, %v1382_v54 }
 0x683   :  { %v1420_v17 = vmul.f32 %v3233_v44, %v1418_v43  ;;  %vm1425_vm4 = vweird.f32 %v3233_v44 }
 0x684   :  { %v1387_v45 = vsel %vm1386_vm2, %v3231_v10, %v1383_v33  ;;  %vm1426_vm7 = vmor %vm1424_vm5, %vm1425_vm4 }
 0x685   :  { %v1392_v11 = vsel %vm1389_vm3, %v1391_v62, %v1387_v45  ;;  %v1421_v7 = vsub.f32 1.0, %v1420_v17 }
 0x686   :  { %v1393_v38 = vmul.f32 %v1392_v11, %v1368_v41  ;;  %v3045_v41 = vld [vmem:[%s4777_s10 + $0x90] sm:$0xff]  ;;  %v3046_v11 = vld [vmem:[%s4777_s10 + $0x98] sm:$0xff] }
 0x687   :  { %v1422_v40 = vmul.f32 %v3233_v44, %v1421_v7  ;;  %v3052_v7 = vld [vmem:[%s4777_s10 + $0xb0] sm:$0xff]  ;;  %v1606_v52 = vpack.c.bf16 %v3046_v11, %v3045_v41 }
 0x688   :  { %v3037_v26 = vclamps-f32 %v1393_v38, 1.0  ;;  %v3059_v38 = vld [vmem:[%s4777_s10 + $0xd0] sm:$0xff]  ;;  %v1643_v1 = vpack.c.bf16 %v3053_v37, %v3052_v7 }
 0x689   :  { %v1423_v28 = vadd.f32 %v3233_v44, %v1422_v40  ;;  %v3060_v40 = vld [vmem:[%s4777_s10 + $0xd8] sm:$0xff]  ;;  %1624 = vmatpush.bf16.msra.mxu1 %v1606_v52 }
 0x68a   :  { %v1438_v47 = vadd.f32 1.0, %v3037_v26  ;;  %1655 = vmatpush.bf16.msra.mxu3 %v1643_v1 }
 0x68b   :  { %v1427_v3 = vsel %vm1426_vm7, %v3233_v44, %v1423_v28  ;;  %v1674_v28 = vpack.c.bf16 %v3060_v40, %v3059_v38 }
 0x68c   :  { %v1432_v36 = vsel %vm1429_vm8, %v1431_v12, %v1427_v3  ;;  %v1442_v2 = vmul.f32 %v1438_v47, %v1270_v5  ;;  %v3044_v47 = vld [vmem:[%s4777_s10 + $0x88] sm:$0xff] }
 0x68d   :  { %v1433_v61 = vmul.f32 %v1432_v36, %v1408_v50  ;;  %1686 = vmatpush.bf16.msra.mxu2 %v1674_v28 }
 0x68f   :  { %v3038_v55 = vclamps-f32 %v1433_v61, 1.0  ;;  %v3043_v61 = vld [vmem:[%s4777_s10 + $0x80] sm:$0xff] }
 0x690   :  { %v1605_v5 = vpack.c.bf16 %v3044_v47, %v3043_v61 }
 0x691   :  { %v1439_v29 = vadd.f32 1.0, %v3038_v55  ;;  %v3050_v55 = vld [vmem:[%s4777_s10 + $0xa0] sm:$0xff] }
 0x692   :  { %1625 = vmatpush.bf16.msra.mxu1 %v1605_v5 }
 0x693   :  { %v1443_v4 = vmul.f32 %v1439_v29, %v1271_v25  ;;  %v3051_v25 = vld [vmem:[%s4777_s10 + $0xa8] sm:$0xff]  ;;  %v3057_v29 = vld [vmem:[%s4777_s10 + $0xc0] sm:$0xff] }
 0x695   :  { %v1453_v8 = vpack.c.bf16 %v1443_v4, %v1442_v2  ;;  %v1642_v4 = vpack.c.bf16 %v3051_v25, %v3050_v55 }
 0x697   :  { %3040 = vmatmul.msk.bf16.gmra.mxu0 %vm1462_vm14, %v1453_v8  ;;  %v3058_v8 = vld [vmem:[%s4777_s10 + $0xc8] sm:$0xff]  ;;  %1656 = vmatpush.bf16.msra.mxu3 %v1642_v4  ;;  %v4211_v4 = vld [vmem:[%s4779_s4 + $0x1] ss:$0 sm:$0xff] }
 0x6f3   :  { %v1478_v0 = vpop.f32.mrf.mxu0 }
 0x6f4   :  { %v1479_v9 = vadd.f32 %v3134_v23, %v1478_v0 }
 0x6f6   :  { %v1488_v13 = vadd.f32 %v1479_v9, %v3949_v20 }
 0x6f8   :  { %v1496_v14 = vsel %vm78_vm0, %v1488_v13, 0.0 }
 0x6f9   :  { %1497 = vadd.xlane.f32.xlu0 %v1496_v14 }
 0x6fb   :  { %v1480_v35 = vpop.f32.mrf.mxu0 }
 0x6fc   :  { %v1481_v57 = vadd.f32 %v3134_v23, %v1480_v35 }
 0x6fe   :  { %v1489_v53 = vadd.f32 %v1481_v57, %v3951_v31 }
 0x700   :  { %v1499_v51 = vsel %vm78_vm0, %v1489_v53, 0.0 }
 0x701   :  { %1500 = vadd.xlane.f32.xlu1 %v1499_v51 }
 0x714   :  { %v1483_v15 = vpop.f32.mrf.mxu0 }
 0x715   :  { %v1484_v34 = vadd.f32 %v3134_v23, %v1483_v15 }
 0x717   :  { %v1490_v16 = vadd.f32 %v1484_v34, %v3959_v6  ;;  %v3135_v34 = vld [vmem:[%s4781_s12 + $0x1] ss:$0 sm:$0xff] }
 0x719   :  { %v1502_v19 = vsel %vm78_vm0, %v1490_v16, 0.0 }
 0x71a   :  { %1503 = vadd.xlane.f32.xlu2 %v1502_v19 }
 0x71c   :  { %v1485_v22 = vpop.f32.mrf.mxu0 }
 0x71d   :  { %v1486_v60 = vadd.f32 %v3134_v23, %v1485_v22  ;;  %v1673_v23 = vpack.c.bf16 %v3058_v8, %v3057_v29  ;;  %v4205_v29 = vld [vmem:[%s4779_s4] ss:$0 sm:$0xff] }
 0x71f   :  { %v1491_v20 = vadd.f32 %v1486_v60, %v3961_v58  ;;  %1687 = vmatpush.bf16.msra.mxu2 %v1673_v23  ;;  %v3136_v60 = vld [vmem:[%s4782_s13 + $0x1] ss:$0 sm:$0xff] }
 0x721   :  { %v1505_v56 = vsel %vm78_vm0, %v1491_v20, 0.0 }
 0x722   :  { %1506 = vadd.xlane.f32.xlu0 %v1505_v56 }
 0x76c   :  { %v1498_v46 = vpop.xlane.xlu0 %1497 }
 0x76d   :  { %v1508_v31 = vmul.f32 %v1498_v46, %v3910_v30 }
 0x76f   :  { %v4097_v49 = vsub.f32 %v1488_v13, %v1508_v31 }
 0x771   :  { %v1516_v21 = vmul.f32 %v4097_v49, %v4097_v49 }
 0x773   :  { %v1520_v6 = vsel %vm78_vm0, %v1516_v21, 0.0 }
 0x774   :  { %v1501_v24 = vpop.xlane.xlu1 %1500  ;;  %1521 = vadd.xlane.f32.xlu1 %v1520_v6 }
 0x775   :  { %v1509_v43 = vmul.f32 %v1501_v24, %v3910_v30 }
 0x777   :  { %v4103_v10 = vsub.f32 %v1489_v53, %v1509_v43 }
 0x779   :  { %v1517_v58 = vmul.f32 %v4103_v10, %v4103_v10 }
 0x77b   :  { %v1523_v48 = vsel %vm78_vm0, %v1517_v58, 0.0 }
 0x77c   :  { %1524 = vadd.xlane.f32.xlu2 %v1523_v48 }
 0x78d   :  { %v1504_v63 = vpop.xlane.xlu2 %1503 }
 0x78e   :  { %v1510_v42 = vmul.f32 %v1504_v63, %v3910_v30 }
 0x790   :  { %v4109_v59 = vsub.f32 %v1490_v16, %v1510_v42 }
 0x792   :  { %v1518_v32 = vmul.f32 %v4109_v59, %v4109_v59 }
 0x794   :  { %v1526_v54 = vsel %vm78_vm0, %v1518_v32, 0.0 }
 0x795   :  { %v1507_v27 = vpop.xlane.xlu0 %1506  ;;  %1527 = vadd.xlane.f32.xlu0 %v1526_v54 }
 0x796   :  { %v1511_v39 = vmul.f32 %v1507_v27, %v3910_v30 }
 0x798   :  { %v4115_v44 = vsub.f32 %v1491_v20, %v1511_v39 }
 0x79a   :  { %v1519_v33 = vmul.f32 %v4115_v44, %v4115_v44 }
 0x79c   :  { %v1529_v18 = vsel %vm78_vm0, %v1519_v33, 0.0 }
 0x79d   :  { %1530 = vadd.xlane.f32.xlu1 %v1529_v18 }
 0x7e7   :  { %v1522_v62 = vpop.xlane.xlu1 %1521 }
 0x7e8   :  { %v1532_v17 = vmul.f32 %v1522_v62, %v3910_v30 }
 0x7ea   :  { %v1536_v45 = vadd.f32 1e-05, %v1532_v17 }
 0x7ec   :  { %3234 = vrsqrt.f32 %v1536_v45  ;;  %vm1546_vm10 = vweird.f32 %v1536_v45 }
 0x7ef   :  { %v1525_v12 = vpop.xlane.xlu2 %1524 }
 0x7f0   :  { %v1533_v26 = vmul.f32 %v1525_v12, %v3910_v30 }
 0x7f2   :  { %v3235_v50 = vpop.eup %3234  ;;  %v1537_v3 = vadd.f32 1e-05, %v1533_v26 }
 0x7f3   :  { %v1541_v36 = vmul.f32 %v3235_v50, %v1536_v45  ;;  %vm1547_vm9 = vweird.f32 %v3235_v50 }
 0x7f4   :  { %3236 = vrsqrt.f32 %v1537_v3  ;;  %vm1548_vm11 = vmor %vm1546_vm10, %vm1547_vm9  ;;  %vm1556_vm13 = vweird.f32 %v1537_v3 }
 0x7f5   :  { %v1542_v2 = vmul.f32 %v3235_v50, %v1541_v36 }
 0x7f7   :  { %v1543_v0 = vmul.f32 0.5, %v1542_v2 }
 0x7f9   :  { %v1544_v9 = vsub.f32 1.5, %v1543_v0 }
 0x7fa   :  { %v3237_v13 = vpop.eup %3236 }
 0x7fb   :  { %v1545_v14 = vmul.f32 %v3235_v50, %v1544_v9  ;;  %v1551_v35 = vmul.f32 %v3237_v13, %v1537_v3  ;;  %vm1557_vm12 = vweird.f32 %v3237_v13  ;;  %v4196_v3 = vld [vmem:[%s4776_s11 + $0x4] ss:$0 sm:$0xff] }
 0x7fc   :  { %vm1558_vm15 = vmor %vm1556_vm13, %vm1557_vm12 }
 0x7fd   :  { %v1552_v57 = vmul.f32 %v3237_v13, %v1551_v35  ;;  %v1549_v53 = vsel %vm1548_vm11, %v3235_v50, %v1545_v14 }
 0x7fe   :  { %v1580_v16 = vmul.f32 %v1549_v53, %v4097_v49 }
 0x7ff   :  { %v1553_v51 = vmul.f32 0.5, %v1552_v57 }
 0x800   :  { %v1587_v20 = vmul.f32 %v3135_v34, %v1580_v16 }
 0x801   :  { %v1554_v15 = vsub.f32 1.5, %v1553_v51 }
 0x802   :  { %v4167_v6 = vadd.f32 %v3136_v60, %v1587_v20 }
 0x803   :  { %v1555_v19 = vmul.f32 %v3237_v13, %v1554_v15 }
 0x805   :  { %v1559_v22 = vsel %vm1558_vm15, %v3237_v13, %v1555_v19 }
 0x806   :  { %v1581_v56 = vmul.f32 %v1559_v22, %v4103_v10 }
 0x808   :  { %v1588_v46 = vmul.f32 %v3135_v34, %v1581_v56  ;;  %v1528_v31 = vpop.xlane.xlu0 %1527 }
 0x809   :  { %v1534_v21 = vmul.f32 %v1528_v31, %v3910_v30 }
 0x80a   :  { %v4169_v24 = vadd.f32 %v3136_v60, %v1588_v46  ;;  %v4220_v46 = vld [vmem:[%s4776_s11 + $0x6] ss:$0 sm:$0xff] }
 0x80b   :  { %v1538_v49 = vadd.f32 1e-05, %v1534_v21 }
 0x80c   :  { %v1603_v43 = vpack.c.bf16 %v4169_v24, %v4167_v6 }
 0x80d   :  { %3238 = vrsqrt.f32 %v1538_v49  ;;  %vm1566_vm2 = vweird.f32 %v1538_v49 }
 0x80e   :  { %3048 = vmatmul.msk.bf16.vlgmr.msra.gmra.mxu1 %vm78_vm0, %v1603_v43  ;;  %3055 = vmatmul.msk.bf16.vlgmr.msra.gmra.mxu3 %vm78_vm0, %v1603_v43 }
 0x80f   :  { %3062 = vmatmul.msk.bf16.vlgmr.msra.gmra.mxu2 %vm78_vm0, %v1603_v43 }
 0x810   :  { %v1531_v10 = vpop.xlane.xlu1 %1530 }
 0x811   :  { %v1535_v58 = vmul.f32 %v1531_v10, %v3910_v30  ;;  %v4229_v10 = vld [vmem:[%s4779_s4 + $0x2] ss:$0 sm:$0xff] }
 0x813   :  { %v3239_v48 = vpop.eup %3238  ;;  %v1539_v63 = vadd.f32 1e-05, %v1535_v58 }
 0x814   :  { %v1561_v42 = vmul.f32 %v3239_v48, %v1538_v49  ;;  %vm1567_vm1 = vweird.f32 %v3239_v48 }
 0x815   :  { %3240 = vrsqrt.f32 %v1539_v63  ;;  %vm1568_vm3 = vmor %vm1566_vm2, %vm1567_vm1  ;;  %vm1576_vm5 = vweird.f32 %v1539_v63 }
 0x816   :  { %v1562_v32 = vmul.f32 %v3239_v48, %v1561_v42 }
 0x818   :  { %v1563_v54 = vmul.f32 0.5, %v1562_v32 }
 0x81a   :  { %v1564_v27 = vsub.f32 1.5, %v1563_v54 }
 0x81b   :  { %v3241_v39 = vpop.eup %3240 }
 0x81c   :  { %v1565_v33 = vmul.f32 %v3239_v48, %v1564_v27  ;;  %v1571_v18 = vmul.f32 %v3241_v39, %v1539_v63  ;;  %vm1577_vm4 = vweird.f32 %v3241_v39 }
 0x81d   :  { %vm1578_vm7 = vmor %vm1576_vm5, %vm1577_vm4 }
 0x81e   :  { %v1572_v62 = vmul.f32 %v3241_v39, %v1571_v18  ;;  %v1569_v17 = vsel %vm1568_vm3, %v3239_v48, %v1565_v33  ;;  %v4235_v48 = vld [vmem:[%s4779_s4 + $0x3] ss:$0 sm:$0xff] }
 0x81f   :  { %v1582_v11 = vmul.f32 %v1569_v17, %v4109_v59 }
 0x820   :  { %v1573_v45 = vmul.f32 0.5, %v1572_v62 }
 0x821   :  { %v1589_v38 = vmul.f32 %v3135_v34, %v1582_v11 }
 0x822   :  { %v1574_v41 = vsub.f32 1.5, %v1573_v45 }
 0x823   :  { %v4179_v1 = vadd.f32 %v3136_v60, %v1589_v38 }
 0x824   :  { %v1575_v7 = vmul.f32 %v3241_v39, %v1574_v41 }
 0x826   :  { %v1579_v52 = vsel %vm1578_vm7, %v3241_v39, %v1575_v7 }
 0x827   :  { %v1583_v37 = vmul.f32 %v1579_v52, %v4115_v44  ;;  %v4191_v44 = vld [vmem:[%s4776_s11 + $0x5] ss:$0 sm:$0xff] }
 0x829   :  { %v1590_v40 = vmul.f32 %v3135_v34, %v1583_v37 }
 0x82b   :  { %v4181_v28 = vadd.f32 %v3136_v60, %v1590_v40 }
 0x82d   :  { %v1604_v12 = vpack.c.bf16 %v4181_v28, %v4179_v1 }
 0x82f   :  { %3049 = vmatmul.msk.bf16.gmra.mxu1 %vm78_vm0, %v1604_v12  ;;  %3056 = vmatmul.msk.bf16.gmra.mxu3 %vm78_vm0, %v1604_v12 }
 0x830   :  { %3063 = vmatmul.msk.bf16.gmra.mxu2 %vm78_vm0, %v1604_v12 }
 0x88b   :  { %v1627_v59 = vpop.f32.mrf.mxu1 }
 0x88c   :  { %v1628_v55 = vadd.f32 %v4196_v3, %v1627_v59 }
 0x88e   :  { %v1699_v9 = vmul.f32 %v4205_v29, %v1628_v55  ;;  %v1701_v13 = vmul.f32 %v4211_v4, %v1628_v55  ;;  %v1703_v32 = vmul.f32 %v4229_v10, %v1628_v55  ;;  %v1705_v54 = vmul.f32 %v4235_v48, %v1628_v55 }
 0x890   :  { %v1731_v15 = vpack.c.bf16 %v1699_v9, %v1699_v9  ;;  %v1733_v34 = vpack.c.bf16 %v1701_v13, %v1701_v13  ;;  %v1735_v41 = vpack.c.bf16 %v1703_v32, %v1703_v32  ;;  %v1737_v52 = vpack.c.bf16 %v1705_v54, %v1705_v54 }
 0x891   :  { %v1658_v26 = vpop.f32.mrf.mxu3 }
 0x892   :  { %v1659_v36 = vadd.f32 %v4191_v44, %v1658_v26  ;;  %v1689_v0 = vpop.f32.mrf.mxu2  ;;  %v1753_v60 = vunpack.c.l.b16 %v1731_v15  ;;  %v1783_v20 = vunpack.c.l.b16 %v1733_v34  ;;  %v1805_v55 = vunpack.c.l.b16 %v1735_v41 }
 0x893   :  { %v1629_v50 = vpop.f32.mrf.mxu1  ;;  %v1690_v43 = vadd.f32 %v4220_v46, %v1689_v0 }
 0x894   :  { %v1630_v61 = vadd.f32 %v4196_v3, %v1629_v50  ;;  %v1747_v5 = vpack.c.bf16 %v1659_v36, %v1659_v36 }
 0x895   :  { %v1715_v18 = vmul.f32 %v4205_v29, %v1690_v43  ;;  %v1717_v11 = vmul.f32 %v4211_v4, %v1690_v43  ;;  %v1719_v7 = vmul.f32 %v4229_v10, %v1690_v43  ;;  %v1721_v37 = vmul.f32 %v4235_v48, %v1690_v43 }
 0x896   :  { %v1700_v2 = vmul.f32 %v4205_v29, %v1630_v61  ;;  %v1702_v8 = vmul.f32 %v4211_v4, %v1630_v61  ;;  %v1758_v14 = vunpack.c.l.b16 %v1747_v5  ;;  %v1704_v58 = vmul.f32 %v4229_v10, %v1630_v61 }
 0x897   :  { %v1706_v63 = vmul.f32 %v4235_v48, %v1630_v61  ;;  %v2167_v50 = vpack.c.bf16 %v1715_v18, %v1715_v18  ;;  %v2169_v5 = vpack.c.bf16 %v1717_v11, %v1717_v11 }
 0x898   :  { %v1732_v57 = vpack.c.bf16 %v1700_v2, %v1700_v2  ;;  %v1734_v53 = vpack.c.bf16 %v1702_v8, %v1702_v8  ;;  %v1736_v62 = vpack.c.bf16 %v1704_v58, %v1704_v58  ;;  %v1827_v2 = vunpack.c.l.b16 %v1737_v52 }
 0x899   :  { %v1660_v47 = vpop.f32.mrf.mxu3  ;;  %v1738_v17 = vpack.c.bf16 %v1706_v63, %v1706_v63  ;;  %v2173_v8 = vpack.c.bf16 %v1721_v37, %v1721_v37 }
 0x89a   :  { %v1661_v25 = vadd.f32 %v4191_v44, %v1660_v47  ;;  %v1754_v19 = vunpack.c.l.b16 %v1732_v57  ;;  %v1784_v22 = vunpack.c.l.b16 %v1734_v53  ;;  %v1691_v56 = vpop.f32.mrf.mxu2  ;;  %v1806_v36 = vunpack.c.l.b16 %v1736_v62 }
 0x89b   :  { %v1692_v49 = vadd.f32 %v4220_v46, %v1691_v56  ;;  %v1828_v61 = vunpack.c.l.b16 %v1738_v17  ;;  %v2274_v56 = vunpack.c.l.b16 %v2173_v8 }
 0x89c   :  { %v1748_v23 = vpack.c.bf16 %v1661_v25, %v1661_v25  ;;  %v1755_v31 = vpack.c.b16 %v1754_v19, %v1753_v60  ;;  %v1785_v21 = vpack.c.b16 %v1784_v22, %v1783_v20  ;;  %v2171_v25 = vpack.c.bf16 %v1719_v7, %v1719_v7 }
 0x89d   :  { %v1716_v27 = vmul.f32 %v4205_v29, %v1692_v49  ;;  %v1718_v39 = vmul.f32 %v4211_v4, %v1692_v49  ;;  %v1720_v33 = vmul.f32 %v4229_v10, %v1692_v49  ;;  %v1722_v45 = vmul.f32 %v4235_v48, %v1692_v49 }
 0x89e   :  { %v1759_v35 = vunpack.c.l.b16 %v1748_v23  ;;  %v1807_v57 = vpack.c.b16 %v1806_v36, %v1805_v55  ;;  %v1829_v53 = vpack.c.b16 %v1828_v61, %v1827_v2  ;;  %v4261_v19 = vunpack.c.l.b16 %v2171_v25 }
 0x89f   :  { %v2168_v38 = vpack.c.bf16 %v1716_v27, %v1716_v27  ;;  %v2170_v12 = vpack.c.bf16 %v1718_v39, %v1718_v39  ;;  %v2172_v59 = vpack.c.bf16 %v1720_v33, %v1720_v33  ;;  %v2174_v47 = vpack.c.bf16 %v1722_v45, %v1722_v45 }
 0x8a0   :  { %v1760_v51 = vpack.c.b16 %v1759_v35, %v1758_v14 }
 0x8a1   :  { %v4249_v9 = vunpack.c.l.b16 %v2168_v38  ;;  %v4252_v14 = vunpack.c.l.b16 %v2170_v12  ;;  %v4254_v35 = vunpack.c.l.b16 %v2172_v59  ;;  %v4258_v15 = vunpack.c.l.b16 %v2174_v47 }
 0x8a2   :  { %v1765_v16 = vsel %vm78_vm0, %v1760_v51, 0  ;;  %v4256_v51 = vunpack.c.l.b16 %v2167_v50 }
 0x8a3   :  { %1774 = vmatpush.bf16.xpose.msrb.mxu0 %v1765_v16  ;;  %1796 = vmatpush.bf16.xpose.msrb.mxu1 %v1765_v16  ;;  %v2248_v43 = vpack.c.b16 %v4254_v35, %v4261_v19  ;;  %v2276_v32 = vpack.c.b16 %v4258_v15, %v2274_v56 }
 0x8a4   :  { %v2192_v20 = vpack.c.b16 %v4249_v9, %v4256_v51 }
 0x8aa   :  { %3064 = vmatmul.msk.bf16.vlgmr.msrb.gmra.mxu0 %vm78_vm0, %v1755_v31  ;;  %3065 = vmatmul.msk.bf16.vlgmr.msrb.gmra.mxu1 %vm78_vm0, %v1785_v21 }
 0x8ab   :  { %1818 = vmatpush.bf16.xpose.msra.mxu0 %v1765_v16  ;;  %1840 = vmatpush.bf16.xpose.msra.mxu1 %v1765_v16  ;;  %v2218_v16 = vunpack.c.l.b16 %v2169_v5 }
 0x8ac   :  { %v1632_v42 = vpop.f32.mrf.mxu1 }
 0x8ad   :  { %v1633_v23 = vadd.f32 %v4196_v3, %v1632_v42 }
 0x8af   :  { %v1707_v22 = vmul.f32 %v4205_v29, %v1633_v23  ;;  %v1709_v58 = vmul.f32 %v4211_v4, %v1633_v23  ;;  %v1711_v54 = vmul.f32 %v4229_v10, %v1633_v23  ;;  %v1713_v33 = vmul.f32 %v4235_v48, %v1633_v23 }
 0x8b1   :  { %v1739_v18 = vpack.c.bf16 %v1707_v22, %v1707_v22  ;;  %v1741_v7 = vpack.c.bf16 %v1709_v58, %v1709_v58  ;;  %v1743_v55 = vpack.c.bf16 %v1711_v54, %v1711_v54  ;;  %v1745_v2 = vpack.c.bf16 %v1713_v33, %v1713_v33  ;;  %v4298_v33 = vld [vmem:[%s4780_s5] ss:$0 sm:$0xff] }
 0x8b2   :  { %v1663_v40 = vpop.f32.mrf.mxu3 }
 0x8b3   :  { %v1694_v26 = vpop.f32.mrf.mxu2  ;;  %v1664_v13 = vadd.f32 %v4191_v44, %v1663_v40 }
 0x8b4   :  { %v1634_v0 = vpop.f32.mrf.mxu1  ;;  %v1695_v63 = vadd.f32 %v4220_v46, %v1694_v26 }
 0x8b5   :  { %v1635_v34 = vadd.f32 %v4196_v3, %v1634_v0  ;;  %v1749_v31 = vpack.c.bf16 %v1664_v13, %v1664_v13  ;;  %v2220_v3 = vpack.c.b16 %v4252_v14, %v2218_v16  ;;  %v1923_v16 = vunpack.c.l.b16 %v1745_v2 }
 0x8b6   :  { %v1723_v52 = vmul.f32 %v4205_v29, %v1695_v63  ;;  %v1725_v40 = vmul.f32 %v4211_v4, %v1695_v63  ;;  %v1727_v50 = vmul.f32 %v4229_v10, %v1695_v63  ;;  %v1729_v36 = vmul.f32 %v4235_v48, %v1695_v63 }
 0x8b7   :  { %v1708_v27 = vmul.f32 %v4205_v29, %v1635_v34  ;;  %v1712_v62 = vmul.f32 %v4229_v10, %v1635_v34  ;;  %v1714_v17 = vmul.f32 %v4235_v48, %v1635_v34  ;;  %v1854_v45 = vunpack.c.l.b16 %v1749_v31 }
 0x8b8   :  { %v2177_v0 = vpack.c.bf16 %v1725_v40, %v1725_v40 }
 0x8b9   :  { %v1740_v12 = vpack.c.bf16 %v1708_v27, %v1708_v27  ;;  %v1744_v61 = vpack.c.bf16 %v1712_v62, %v1712_v62  ;;  %v1746_v47 = vpack.c.bf16 %v1714_v17, %v1714_v17 }
 0x8ba   :  { %v1665_v60 = vpop.f32.mrf.mxu3  ;;  %3066 = vmatmul.msk.bf16.vlgmr.msra.gmra.mxu0 %vm78_vm0, %v1807_v57  ;;  %3067 = vmatmul.msk.bf16.vlgmr.msra.gmra.mxu1 %vm78_vm0, %v1829_v53  ;;  %v1849_v57 = vunpack.c.l.b16 %v1739_v18  ;;  %v1879_v53 = vunpack.c.l.b16 %v1741_v7 }
 0x8bb   :  { %v1666_v21 = vadd.f32 %v4191_v44, %v1665_v60  ;;  %v1696_v49 = vpop.f32.mrf.mxu2  ;;  %v1710_v44 = vmul.f32 %v4211_v4, %v1635_v34  ;;  %v1850_v9 = vunpack.c.l.b16 %v1740_v12  ;;  %v1902_v14 = vunpack.c.l.b16 %v1744_v61 }
 0x8bc   :  { %v1697_v42 = vadd.f32 %v4220_v46, %v1696_v49  ;;  %v1924_v35 = vunpack.c.l.b16 %v1746_v47  ;;  %v1901_v34 = vunpack.c.l.b16 %v1743_v55 }
 0x8bd   :  { %v1750_v39 = vpack.c.bf16 %v1666_v21, %v1666_v21  ;;  %v1742_v59 = vpack.c.bf16 %v1710_v44, %v1710_v44  ;;  %v1851_v60 = vpack.c.b16 %v1850_v9, %v1849_v57  ;;  %v2330_v21 = vunpack.c.l.b16 %v2177_v0 }
 0x8be   :  { %v1724_v46 = vmul.f32 %v4205_v29, %v1697_v42  ;;  %v1726_v11 = vmul.f32 %v4211_v4, %v1697_v42  ;;  %v1728_v37 = vmul.f32 %v4229_v10, %v1697_v42  ;;  %v1730_v38 = vmul.f32 %v4235_v48, %v1697_v42 }
 0x8bf   :  { %v1855_v41 = vunpack.c.l.b16 %v1750_v39  ;;  %v2175_v4 = vpack.c.bf16 %v1723_v52, %v1723_v52  ;;  %v1880_v13 = vunpack.c.l.b16 %v1742_v59  ;;  %v2179_v10 = vpack.c.bf16 %v1727_v50, %v1727_v50 }
 0x8c0   :  { %v2176_v5 = vpack.c.bf16 %v1724_v46, %v1724_v46  ;;  %v2178_v25 = vpack.c.bf16 %v1726_v11, %v1726_v11  ;;  %v2180_v8 = vpack.c.bf16 %v1728_v37, %v1728_v37  ;;  %v2182_v23 = vpack.c.bf16 %v1730_v38, %v1730_v38 }
 0x8c1   :  { %v1856_v26 = vpack.c.b16 %v1855_v41, %v1854_v45  ;;  %v2181_v48 = vpack.c.bf16 %v1729_v36, %v1729_v36  ;;  %v1881_v56 = vpack.c.b16 %v1880_v13, %v1879_v53  ;;  %v2302_v31 = vunpack.c.l.b16 %v2175_v4 }
 0x8c2   :  { %v2303_v51 = vunpack.c.l.b16 %v2176_v5  ;;  %v2331_v15 = vunpack.c.l.b16 %v2178_v25  ;;  %v2359_v19 = vunpack.c.l.b16 %v2180_v8  ;;  %v2387_v22 = vunpack.c.l.b16 %v2182_v23 }
 0x8c3   :  { %v1861_v29 = vsel %vm78_vm0, %v1856_v26, 0  ;;  %v1903_v49 = vpack.c.b16 %v1902_v14, %v1901_v34  ;;  %v1925_v58 = vpack.c.b16 %v1924_v35, %v1923_v16  ;;  %v2358_v63 = vunpack.c.l.b16 %v2179_v10 }
 0x8c4   :  { %1870 = vmatpush.bf16.xpose.msrb.mxu3 %v1861_v29  ;;  %1892 = vmatpush.bf16.xpose.msrb.mxu2 %v1861_v29  ;;  %v2386_v42 = vunpack.c.l.b16 %v2181_v48 }
 0x8c5   :  { %1914 = vmatpush.bf16.xpose.msrb.mxu0 %v1861_v29  ;;  %1936 = vmatpush.bf16.xpose.msrb.mxu1 %v1861_v29 }
 0x8cb   :  { %3068 = vmatmul.msk.bf16.vlgmr.msrb.gmra.mxu3 %vm78_vm0, %v1851_v60  ;;  %3069 = vmatmul.msk.bf16.vlgmr.msrb.gmra.mxu2 %vm78_vm0, %v1881_v56 }
 0x8cc   :  { %2204 = vmatpush.bf16.msra.mxu3 %v2192_v20  ;;  %2232 = vmatpush.bf16.msra.mxu2 %v2220_v3  ;;  %v2304_v20 = vpack.c.b16 %v2303_v51, %v2302_v31  ;;  %v2332_v3 = vpack.c.b16 %v2331_v15, %v2330_v21 }
 0x8cd   :  { %2260 = vmatpush.bf16.msra.mxu0 %v2248_v43  ;;  %2288 = vmatpush.bf16.msra.mxu1 %v2276_v32  ;;  %v2360_v43 = vpack.c.b16 %v2359_v19, %v2358_v63  ;;  %v2388_v32 = vpack.c.b16 %v2387_v22, %v2386_v42 }
 0x8ce   :  { %3070 = vmatmul.msk.bf16.vlgmr.msrb.gmra.mxu0 %vm78_vm0, %v1903_v49  ;;  %3071 = vmatmul.msk.bf16.vlgmr.msrb.gmra.mxu1 %vm78_vm0, %v1925_v58 }
 0x8d0   :  { %2316 = vmatpush.bf16.msrb.mxu3 %v2304_v20  ;;  %2344 = vmatpush.bf16.msrb.mxu2 %v2332_v3 }
 0x8d1   :  { %2372 = vmatpush.bf16.msrb.mxu0 %v2360_v43  ;;  %2400 = vmatpush.bf16.msrb.mxu1 %v2388_v32 }
 0x927   :  { %v1776_v54 = vpop.f32.mrf.mxu0  ;;  %v1798_v27 = vpop.f32.mrf.mxu1 }
 0x928   :  { %v1943_v44 = vmul.f32 0.35355338, %v1776_v54  ;;  %v1945_v39 = vmul.f32 0.35355338, %v1798_v27 }
 0x92a   :  { %v4301_v18 = vadd.f32 %v4298_v33, %v1945_v39  ;;  %v4304_v62 = vadd.f32 %v4298_v33, %v1943_v44 }
 0x92c   :  { %v1981_v17 = vsel %vm632_vm6, %v4301_v18, -inf  ;;  %v1975_v45 = vsel %vm632_vm6, %v4304_v62, -inf }
 0x92d   :  { %1982 = vmax.xlane.f32.xlu1 %v1981_v17  ;;  %1976 = vmax.xlane.f32.xlu2 %v1975_v45 }
 0x92f   :  { %v1778_v41 = vpop.f32.mrf.mxu0  ;;  %v1800_v46 = vpop.f32.mrf.mxu1 }
 0x930   :  { %v1944_v11 = vmul.f32 0.35355338, %v1778_v41  ;;  %v1946_v7 = vmul.f32 0.35355338, %v1800_v46 }
 0x932   :  { %v4311_v52 = vadd.f32 %v4298_v33, %v1946_v7  ;;  %v4314_v37 = vadd.f32 %v4298_v33, %v1944_v11 }
 0x934   :  { %v1984_v38 = vsel %vm632_vm6, %v4311_v52, -inf  ;;  %v1978_v40 = vsel %vm632_vm6, %v4314_v37, -inf }
 0x935   :  { %1985 = vmax.xlane.f32.xlu2 %v1984_v38  ;;  %1979 = vmax.xlane.f32.xlu0 %v1978_v40 }
 0x937   :  { %v1820_v12 = vpop.f32.mrf.mxu0  ;;  %v1842_v59 = vpop.f32.mrf.mxu1 }
 0x938   :  { %v1947_v26 = vmul.f32 0.35355338, %v1820_v12  ;;  %v1949_v50 = vmul.f32 0.35355338, %v1842_v59 }
 0x93a   :  { %v4321_v36 = vadd.f32 %v4298_v33, %v1949_v50  ;;  %v4324_v61 = vadd.f32 %v4298_v33, %v1947_v26 }
 0x93c   :  { %v1993_v47 = vsel %vm632_vm6, %v4321_v36, -inf  ;;  %v1987_v55 = vsel %vm632_vm6, %v4324_v61, -inf }
 0x93d   :  { %1994 = vmax.xlane.f32.xlu2 %v1993_v47  ;;  %1988 = vmax.xlane.f32.xlu0 %v1987_v55 }
 0x93f   :  { %v1822_v5 = vpop.f32.mrf.mxu0  ;;  %v1844_v25 = vpop.f32.mrf.mxu1 }
 0x940   :  { %v1950_v29 = vmul.f32 0.35355338, %v1844_v25  ;;  %v1948_v35 = vmul.f32 0.35355338, %v1822_v5 }
 0x942   :  { %v4331_v2 = vadd.f32 %v4298_v33, %v1950_v29  ;;  %v4346_v19 = vadd.f32 %v4298_v33, %v1948_v35 }
 0x944   :  { %v1996_v8 = vsel %vm632_vm6, %v4331_v2, -inf  ;;  %v1990_v58 = vsel %vm632_vm6, %v4346_v19, -inf }
 0x945   :  { %1997 = vmax.xlane.f32.xlu0 %v1996_v8 }
 0x94b   :  { %v1916_v23 = vpop.f32.mrf.mxu0  ;;  %v1938_v15 = vpop.f32.mrf.mxu1 }
 0x94c   :  { %v1955_v31 = vmul.f32 0.35355338, %v1916_v23  ;;  %v1957_v43 = vmul.f32 0.35355338, %v1938_v15 }
 0x94e   :  { %v1872_v4 = vpop.f32.mrf.mxu3  ;;  %v1894_v0 = vpop.f32.mrf.mxu2  ;;  %v4364_v20 = vadd.f32 %v4298_v33, %v1955_v31  ;;  %v4371_v44 = vadd.f32 %v4298_v33, %v1957_v43 }
 0x94f   :  { %v1951_v9 = vmul.f32 0.35355338, %v1872_v4  ;;  %v1953_v13 = vmul.f32 0.35355338, %v1894_v0 }
 0x950   :  { %v2011_v27 = vsel %vm632_vm6, %v4364_v20, -inf  ;;  %v2017_v17 = vsel %vm632_vm6, %v4371_v44, -inf }
 0x951   :  { %v4336_v48 = vadd.f32 %v4298_v33, %v1951_v9  ;;  %v4339_v14 = vadd.f32 %v4298_v33, %v1953_v13 }
 0x953   :  { %v1918_v10 = vpop.f32.mrf.mxu0  ;;  %v1999_v57 = vsel %vm632_vm6, %v4336_v48, -inf  ;;  %v2005_v53 = vsel %vm632_vm6, %v4339_v14, -inf  ;;  %v1940_v3 = vpop.f32.mrf.mxu1 }
 0x954   :  { %v1956_v51 = vmul.f32 0.35355338, %v1918_v10  ;;  %2000 = vmax.xlane.f32.xlu1 %v1999_v57  ;;  %2006 = vmax.xlane.f32.xlu0 %v2005_v53  ;;  %v1958_v32 = vmul.f32 0.35355338, %v1940_v3 }
 0x956   :  { %v1874_v34 = vpop.f32.mrf.mxu3  ;;  %v1896_v22 = vpop.f32.mrf.mxu2  ;;  %v4349_v60 = vadd.f32 %v4298_v33, %v1956_v51  ;;  %v4374_v39 = vadd.f32 %v4298_v33, %v1958_v32 }
 0x957   :  { %v1952_v16 = vmul.f32 0.35355338, %v1874_v34  ;;  %v1954_v21 = vmul.f32 0.35355338, %v1896_v22 }
 0x958   :  { %v2014_v63 = vsel %vm632_vm6, %v4349_v60, -inf  ;;  %v2020_v45 = vsel %vm632_vm6, %v4374_v39, -inf }
 0x959   :  { %v4352_v56 = vadd.f32 %v4298_v33, %v1952_v16  ;;  %v4361_v42 = vadd.f32 %v4298_v33, %v1954_v21 }
 0x95b   :  { %v2002_v49 = vsel %vm632_vm6, %v4352_v56, -inf  ;;  %v2008_v54 = vsel %vm632_vm6, %v4361_v42, -inf }
 0x95c   :  { %2003 = vmax.xlane.f32.xlu2 %v2002_v49  ;;  %1991 = vmax.xlane.f32.xlu1 %v1990_v58 }
 0x95d   :  { %2015 = vmax.xlane.f32.xlu0 %v2014_v63 }
 0x964   :  { %2009 = vmax.xlane.f32.xlu1 %v2008_v54  ;;  %2012 = vmax.xlane.f32.xlu2 %v2011_v27 }
 0x96c   :  { %2018 = vmax.xlane.f32.xlu1 %v2017_v17  ;;  %2021 = vmax.xlane.f32.xlu2 %v2020_v45 }
 0x9a0   :  { %v1983_v41 = vpop.xlane.xlu1 %1982  ;;  %v1977_v46 = vpop.xlane.xlu2 %1976 }
 0x9a1   :  { %v2025_v11 = vsub.f32 %v4301_v18, %v1983_v41  ;;  %v2023_v7 = vsub.f32 %v4304_v62, %v1977_v46 }
 0x9a3   :  { %v2043_v38 = vmul.f32 1.442695, %v2025_v11  ;;  %v2039_v40 = vmul.f32 1.442695, %v2023_v7 }
 0x9a5   :  { %3242 = vpow2.f32 %v2043_v38 }
 0x9a6   :  { %3244 = vpow2.f32 %v2039_v40 }
 0x9a8   :  { %v1986_v33 = vpop.xlane.xlu2 %1985  ;;  %v1980_v12 = vpop.xlane.xlu0 %1979 }
 0x9a9   :  { %v2026_v59 = vsub.f32 %v4311_v52, %v1986_v33  ;;  %v2024_v26 = vsub.f32 %v4314_v37, %v1980_v12 }
 0x9ab   :  { %v4384_v50 = vpop.eup %3242  ;;  %v2045_v47 = vmul.f32 1.442695, %v2026_v59  ;;  %v2041_v55 = vmul.f32 1.442695, %v2024_v26 }
 0x9ac   :  { %v4386_v5 = vpop.eup %3244  ;;  %v2077_v18 = vsel %vm632_vm6, %v4384_v50, 0.0 }
 0x9ad   :  { %3246 = vpow2.f32 %v2045_v47  ;;  %2078 = vadd.xlane.f32.xlu2 %v2077_v18  ;;  %v2071_v62 = vsel %vm632_vm6, %v4386_v5, 0.0 }
 0x9ae   :  { %3248 = vpow2.f32 %v2041_v55  ;;  %2072 = vadd.xlane.f32.xlu0 %v2071_v62 }
 0x9b0   :  { %v1995_v25 = vpop.xlane.xlu2 %1994  ;;  %v1989_v52 = vpop.xlane.xlu0 %1988 }
 0x9b1   :  { %v2029_v37 = vsub.f32 %v4321_v36, %v1995_v25  ;;  %v2027_v29 = vsub.f32 %v4324_v61, %v1989_v52 }
 0x9b3   :  { %v4394_v8 = vpop.eup %3246  ;;  %v2051_v23 = vmul.f32 1.442695, %v2029_v37  ;;  %v2047_v4 = vmul.f32 1.442695, %v2027_v29 }
 0x9b4   :  { %v4396_v0 = vpop.eup %3248  ;;  %v2080_v9 = vsel %vm632_vm6, %v4394_v8, 0.0 }
 0x9b5   :  { %3250 = vpow2.f32 %v2051_v23  ;;  %v2074_v13 = vsel %vm632_vm6, %v4396_v0, 0.0 }
 0x9b6   :  { %3252 = vpow2.f32 %v2047_v4  ;;  %2075 = vadd.xlane.f32.xlu1 %v2074_v13  ;;  %2081 = vadd.xlane.f32.xlu0 %v2080_v9 }
 0x9b8   :  { %v1998_v10 = vpop.xlane.xlu0 %1997 }
 0x9b9   :  { %v2030_v36 = vsub.f32 %v4331_v2, %v1998_v10 }
 0x9bb   :  { %v4403_v61 = vpop.eup %3250  ;;  %v2053_v35 = vmul.f32 1.442695, %v2030_v36 }
 0x9bc   :  { %v4405_v57 = vpop.eup %3252  ;;  %v2089_v53 = vsel %vm632_vm6, %v4403_v61, 0.0 }
 0x9bd   :  { %3254 = vpow2.f32 %v2053_v35  ;;  %v2083_v51 = vsel %vm632_vm6, %v4405_v57, 0.0 }
 0x9be   :  { %2084 = vadd.xlane.f32.xlu1 %v2083_v51  ;;  %2090 = vadd.xlane.f32.xlu0 %v2089_v53 }
 0x9c3   :  { %v4411_v15 = vpop.eup %3254 }
 0x9c4   :  { %v2092_v34 = vsel %vm632_vm6, %v4411_v15, 0.0 }
 0x9c6   :  { %2093 = vadd.xlane.f32.xlu1 %v2092_v34 }
 0x9c7   :  { %v2001_v2 = vpop.xlane.xlu1 %2000  ;;  %v2007_v16 = vpop.xlane.xlu0 %2006 }
 0x9c8   :  { %v2031_v22 = vsub.f32 %v4336_v48, %v2001_v2  ;;  %v2033_v31 = vsub.f32 %v4339_v14, %v2007_v16 }
 0x9ca   :  { %v2055_v21 = vmul.f32 1.442695, %v2031_v22  ;;  %v2059_v49 = vmul.f32 1.442695, %v2033_v31 }
 0x9cc   :  { %3256 = vpow2.f32 %v2055_v21 }
 0x9cd   :  { %3258 = vpow2.f32 %v2059_v49 }
 0x9cf   :  { %v2004_v58 = vpop.xlane.xlu2 %2003  ;;  %v1992_v63 = vpop.xlane.xlu1 %1991 }
 0x9d0   :  { %v2032_v3 = vsub.f32 %v4352_v56, %v2004_v58  ;;  %v2028_v43 = vsub.f32 %v4346_v19, %v1992_v63  ;;  %v2016_v32 = vpop.xlane.xlu0 %2015 }
 0x9d1   :  { %v2036_v54 = vsub.f32 %v4349_v60, %v2016_v32 }
 0x9d2   :  { %v4420_v27 = vpop.eup %3256  ;;  %v2057_v17 = vmul.f32 1.442695, %v2032_v3  ;;  %v2049_v45 = vmul.f32 1.442695, %v2028_v43 }
 0x9d3   :  { %v4422_v48 = vpop.eup %3258  ;;  %v2065_v14 = vmul.f32 1.442695, %v2036_v54  ;;  %v2095_v41 = vsel %vm632_vm6, %v4420_v27, 0.0 }
 0x9d4   :  { %3260 = vpow2.f32 %v2057_v17  ;;  %v2101_v46 = vsel %vm632_vm6, %v4422_v48, 0.0  ;;  %2096 = vadd.xlane.f32.xlu2 %v2095_v41 }
 0x9d5   :  { %3262 = vpow2.f32 %v2049_v45  ;;  %2102 = vadd.xlane.f32.xlu1 %v2101_v46 }
 0x9d6   :  { %3264 = vpow2.f32 %v2065_v14 }
 0x9d7   :  { %v2010_v19 = vpop.xlane.xlu1 %2009  ;;  %v2013_v60 = vpop.xlane.xlu2 %2012 }
 0x9d8   :  { %v2034_v56 = vsub.f32 %v4361_v42, %v2010_v19  ;;  %v2035_v11 = vsub.f32 %v4364_v20, %v2013_v60 }
 0x9da   :  { %v4430_v7 = vpop.eup %3260  ;;  %v2061_v38 = vmul.f32 1.442695, %v2034_v56  ;;  %v2063_v40 = vmul.f32 1.442695, %v2035_v11 }
 0x9db   :  { %v4432_v33 = vpop.eup %3262  ;;  %v2098_v12 = vsel %vm632_vm6, %v4430_v7, 0.0 }
 0x9dc   :  { %v4436_v59 = vpop.eup %3264  ;;  %3266 = vpow2.f32 %v2061_v38  ;;  %v2086_v26 = vsel %vm632_vm6, %v4432_v33, 0.0  ;;  %2099 = vadd.xlane.f32.xlu0 %v2098_v12 }
 0x9dd   :  { %3268 = vpow2.f32 %v2063_v40  ;;  %2087 = vadd.xlane.f32.xlu2 %v2086_v26  ;;  %v2110_v42 = vsel %vm632_vm6, %v4436_v59, 0.0 }
 0x9de   :  { %2111 = vadd.xlane.f32.xlu1 %v2110_v42 }
 0x9df   :  { %v2019_v20 = vpop.xlane.xlu1 %2018  ;;  %v2022_v47 = vpop.xlane.xlu2 %2021 }
 0x9e0   :  { %v2037_v55 = vsub.f32 %v4371_v44, %v2019_v20  ;;  %v2038_v18 = vsub.f32 %v4374_v39, %v2022_v47 }
 0x9e2   :  { %v4444_v62 = vpop.eup %3266  ;;  %v2067_v25 = vmul.f32 1.442695, %v2037_v55  ;;  %v2069_v52 = vmul.f32 1.442695, %v2038_v18 }
 0x9e3   :  { %v4446_v37 = vpop.eup %3268  ;;  %v2104_v29 = vsel %vm632_vm6, %v4444_v62, 0.0 }
 0x9e4   :  { %3270 = vpow2.f32 %v2067_v25  ;;  %v2107_v23 = vsel %vm632_vm6, %v4446_v37, 0.0 }
 0x9e5   :  { %3272 = vpow2.f32 %v2069_v52  ;;  %2105 = vadd.xlane.f32.xlu2 %v2104_v29  ;;  %2108 = vadd.xlane.f32.xlu0 %v2107_v23 }
 0x9ea   :  { %v4452_v4 = vpop.eup %3270 }
 0x9eb   :  { %v4454_v44 = vpop.eup %3272  ;;  %v2113_v39 = vsel %vm632_vm6, %v4452_v4, 0.0 }
 0x9ec   :  { %v2116_v9 = vsel %vm632_vm6, %v4454_v44, 0.0 }
 0x9ed   :  { %2114 = vadd.xlane.f32.xlu2 %v2113_v39  ;;  %2117 = vadd.xlane.f32.xlu0 %v2116_v9 }
 0xa20   :  { %v2079_v10 = vpop.xlane.xlu2 %2078 }
 0xa21   :  { %v2073_v13 = vpop.xlane.xlu0 %2072 }
 0xa22   :  { %3274 = vrcp.f32 %v2073_v13 }
 0xa23   :  { %3276 = vrcp.f32 %v2079_v10 }
 0xa28   :  { %v3275_v53 = vpop.eup %3274 }
 0xa29   :  { %v2076_v36 = vpop.xlane.xlu1 %2075  ;;  %v2082_v35 = vpop.xlane.xlu0 %2081  ;;  %v2135_v34 = vmul.f32 %v3275_v53, %v4386_v5 }
 0xa2a   :  { %3278 = vrcp.f32 %v2076_v36  ;;  %v3277_v51 = vpop.eup %3276 }
 0xa2b   :  { %3280 = vrcp.f32 %v2082_v35  ;;  %v2137_v2 = vmul.f32 %v3277_v51, %v4384_v50  ;;  %v2151_v31 = vpack.c.bf16 %v2135_v34, %v2135_v34 }
 0xa2d   :  { %v2153_v63 = vpack.c.bf16 %v2137_v2, %v2137_v2  ;;  %v2185_v54 = vunpack.c.l.b16 %v2151_v31 }
 0xa2f   :  { %v2213_v45 = vunpack.c.l.b16 %v2153_v63 }
 0xa30   :  { %v3279_v16 = vpop.eup %3278 }
 0xa31   :  { %v3281_v22 = vpop.eup %3280  ;;  %v2136_v21 = vmul.f32 %v3279_v16, %v4396_v0  ;;  %v2085_v49 = vpop.xlane.xlu1 %2084 }
 0xa32   :  { %v2091_v58 = vpop.xlane.xlu0 %2090  ;;  %v2138_v3 = vmul.f32 %v3281_v22, %v4394_v8 }
 0xa33   :  { %v2152_v43 = vpack.c.bf16 %v2136_v21, %v2136_v21  ;;  %3282 = vrcp.f32 %v2091_v58 }
 0xa34   :  { %v2154_v32 = vpack.c.bf16 %v2138_v3, %v2138_v3 }
 0xa35   :  { %v2186_v17 = vunpack.c.l.b16 %v2152_v43 }
 0xa36   :  { %v2214_v14 = vunpack.c.l.b16 %v2154_v32 }
 0xa37   :  { %v2187_v5 = vpack.c.b16 %v2186_v17, %v2185_v54 }
 0xa38   :  { %v2215_v41 = vpack.c.b16 %v2214_v14, %v2213_v45 }
 0xa39   :  { %v2094_v50 = vpop.xlane.xlu1 %2093  ;;  %3072 = vmatmul.msk.bf16.vlgmr.msra.gmra.mxu3 %vm632_vm6, %v2187_v5  ;;  %v3283_v46 = vpop.eup %3282 }
 0xa3a   :  { %3284 = vrcp.f32 %v2094_v50  ;;  %3073 = vmatmul.msk.bf16.vlgmr.msra.gmra.mxu2 %vm632_vm6, %v2215_v41  ;;  %v2141_v0 = vmul.f32 %v3283_v46, %v4403_v61 }
 0xa3c   :  { %v2157_v8 = vpack.c.bf16 %v2141_v0, %v2141_v0 }
 0xa3e   :  { %v2269_v11 = vunpack.c.l.b16 %v2157_v8 }
 0xa40   :  { %v3285_v19 = vpop.eup %3284 }
 0xa41   :  { %v2142_v60 = vmul.f32 %v3285_v19, %v4411_v15 }
 0xa43   :  { %v2158_v56 = vpack.c.bf16 %v2142_v60, %v2142_v60 }
 0xa45   :  { %v2270_v38 = vunpack.c.l.b16 %v2158_v56 }
 0xa47   :  { %v2271_v40 = vpack.c.b16 %v2270_v38, %v2269_v11  ;;  %v2097_v12 = vpop.xlane.xlu2 %2096  ;;  %v3080_v11 = vld [vmem:[%s4777_s10 + $0xe0] sm:$0xff] }
 0xa48   :  { %3286 = vrcp.f32 %v2097_v12  ;;  %v2103_v26 = vpop.xlane.xlu1 %2102 }
 0xa49   :  { %3075 = vmatmul.msk.bf16.vlgmr.msra.gmra.mxu1 %vm632_vm6, %v2271_v40  ;;  %3288 = vrcp.f32 %v2085_v49  ;;  %v3081_v40 = vld [vmem:[%s4777_s10 + $0xe8] sm:$0xff] }
 0xa4a   :  { %v2426_v12 = vpack.c.bf16 %v3081_v40, %v3080_v11 }
 0xa4e   :  { %v3287_v20 = vpop.eup %3286 }
 0xa4f   :  { %v2100_v42 = vpop.xlane.xlu0 %2099  ;;  %v3289_v55 = vpop.eup %3288  ;;  %v2143_v61 = vmul.f32 %v3287_v20, %v4420_v27 }
 0xa50   :  { %v2088_v47 = vpop.xlane.xlu2 %2087  ;;  %3290 = vrcp.f32 %v2100_v42  ;;  %v2139_v15 = vmul.f32 %v3289_v55, %v4405_v57 }
 0xa51   :  { %3292 = vrcp.f32 %v2088_v47  ;;  %v2159_v52 = vpack.c.bf16 %v2143_v61, %v2143_v61  ;;  %v2112_v29 = vpop.xlane.xlu1 %2111 }
 0xa52   :  { %3294 = vrcp.f32 %v2103_v26  ;;  %v2155_v39 = vpack.c.bf16 %v2139_v15, %v2139_v15 }
 0xa53   :  { %v2297_v51 = vunpack.c.l.b16 %v2159_v52 }
 0xa54   :  { %v2241_v57 = vunpack.c.l.b16 %v2155_v39 }
 0xa56   :  { %v3291_v18 = vpop.eup %3290 }
 0xa57   :  { %v3293_v25 = vpop.eup %3292  ;;  %v2144_v23 = vmul.f32 %v3291_v18, %v4430_v7 }
 0xa58   :  { %v2140_v9 = vmul.f32 %v3293_v25, %v4432_v33  ;;  %v2106_v13 = vpop.xlane.xlu2 %2105  ;;  %v2109_v10 = vpop.xlane.xlu0 %2108 }
 0xa59   :  { %v3295_v36 = vpop.eup %3294  ;;  %v2160_v35 = vpack.c.bf16 %v2144_v23, %v2144_v23  ;;  %3296 = vrcp.f32 %v2106_v13 }
 0xa5a   :  { %v2156_v53 = vpack.c.bf16 %v2140_v9, %v2140_v9  ;;  %3298 = vrcp.f32 %v2109_v10  ;;  %v2145_v34 = vmul.f32 %v3295_v36, %v4422_v48 }
 0xa5b   :  { %3300 = vrcp.f32 %v2112_v29  ;;  %v2298_v27 = vunpack.c.l.b16 %v2160_v35 }
 0xa5c   :  { %v2242_v2 = vunpack.c.l.b16 %v2156_v53  ;;  %v2161_v31 = vpack.c.bf16 %v2145_v34, %v2145_v34 }
 0xa5d   :  { %v2299_v16 = vpack.c.b16 %v2298_v27, %v2297_v51 }
 0xa5e   :  { %v2243_v22 = vpack.c.b16 %v2242_v2, %v2241_v57  ;;  %v2325_v48 = vunpack.c.l.b16 %v2161_v31 }
 0xa5f   :  { %v3297_v7 = vpop.eup %3296  ;;  %3076 = vmatmul.msk.bf16.vlgmr.msrb.gmra.mxu3 %vm632_vm6, %v2299_v16 }
 0xa60   :  { %v3299_v33 = vpop.eup %3298  ;;  %v2146_v21 = vmul.f32 %v3297_v7, %v4444_v62  ;;  %3074 = vmatmul.msk.bf16.vlgmr.msra.gmra.mxu0 %vm632_vm6, %v2243_v22  ;;  %v2115_v49 = vpop.xlane.xlu2 %2114 }
 0xa61   :  { %v2118_v58 = vpop.xlane.xlu0 %2117  ;;  %v3301_v63 = vpop.eup %3300  ;;  %3302 = vrcp.f32 %v2115_v49  ;;  %v2147_v43 = vmul.f32 %v3299_v33, %v4446_v37  ;;  %v3140_v49 = vld [vmem:[%s4776_s11 + $0x7] ss:$0 sm:$0xff] }
 0xa62   :  { %v2162_v3 = vpack.c.bf16 %v2146_v21, %v2146_v21  ;;  %3304 = vrcp.f32 %v2118_v58  ;;  %v2148_v32 = vmul.f32 %v3301_v63, %v4436_v59 }
 0xa63   :  { %v2163_v45 = vpack.c.bf16 %v2147_v43, %v2147_v43 }
 0xa64   :  { %v2326_v54 = vunpack.c.l.b16 %v2162_v3  ;;  %v2164_v41 = vpack.c.bf16 %v2148_v32, %v2148_v32 }
 0xa65   :  { %v2353_v46 = vunpack.c.l.b16 %v2163_v45 }
 0xa66   :  { %v2327_v17 = vpack.c.b16 %v2326_v54, %v2325_v48  ;;  %v2354_v37 = vunpack.c.l.b16 %v2164_v41 }
 0xa67   :  { %v3303_v14 = vpop.eup %3302 }
 0xa68   :  { %v3305_v5 = vpop.eup %3304  ;;  %v2149_v62 = vmul.f32 %v3303_v14, %v4452_v4  ;;  %3077 = vmatmul.msk.bf16.vlgmr.msrb.gmra.mxu2 %vm632_vm6, %v2327_v17  ;;  %v2355_v56 = vpack.c.b16 %v2354_v37, %v2353_v46  ;;  %v3082_v4 = vld [vmem:[%s4777_s10 + $0xf0] sm:$0xff] }
 0xa69   :  { %v2150_v50 = vmul.f32 %v3305_v5, %v4454_v44  ;;  %v3083_v44 = vld [vmem:[%s4777_s10 + $0xf8] sm:$0xff] }
 0xa6a   :  { %v2165_v0 = vpack.c.bf16 %v2149_v62, %v2149_v62  ;;  %v2427_v38 = vpack.c.bf16 %v3083_v44, %v3082_v4 }
 0xa6b   :  { %v2166_v19 = vpack.c.bf16 %v2150_v50, %v2150_v50 }
 0xa6c   :  { %v2381_v8 = vunpack.c.l.b16 %v2165_v0  ;;  %2445 = vmatpush.bf16.msra.mxu3 %v2427_v38 }
 0xa6d   :  { %v2382_v60 = vunpack.c.l.b16 %v2166_v19 }
 0xa6f   :  { %v2383_v59 = vpack.c.b16 %v2382_v60, %v2381_v8 }
 0xa70   :  { %3078 = vmatmul.msk.bf16.vlgmr.msrb.gmra.mxu0 %vm632_vm6, %v2355_v56  ;;  %2446 = vmatpush.bf16.msra.mxu3 %v2426_v12 }
 0xa71   :  { %3079 = vmatmul.msk.bf16.vlgmr.msrb.gmra.mxu1 %vm632_vm6, %v2383_v59 }
 0xabc   :  { %v2206_v26 = vpop.f32.mrf.mxu3 }
 0xabd   :  { %v2234_v42 = vpop.f32.mrf.mxu2 }
 0xabe   :  { %v2407_v15 = vadd.f32 %v2234_v42, %v2206_v26 }
 0xac4   :  { %v2208_v55 = vpop.f32.mrf.mxu3 }
 0xac5   :  { %v2236_v61 = vpop.f32.mrf.mxu2 }
 0xac6   :  { %v2290_v20 = vpop.f32.mrf.mxu1  ;;  %v2408_v18 = vadd.f32 %v2236_v61, %v2208_v55 }
 0xace   :  { %v2292_v29 = vpop.f32.mrf.mxu1 }
 0xadd   :  { %v2262_v47 = vpop.f32.mrf.mxu0 }
 0xade   :  { %v2411_v25 = vadd.f32 %v2407_v15, %v2262_v47 }
 0xae0   :  { %v2415_v39 = vadd.f32 %v2411_v25, %v2290_v20  ;;  %v3092_v25 = vld [vmem:[%s4784_s14 + $0x38] sm:$0xff] }
 0xae2   :  { %v2318_v13 = vpop.f32.mrf.mxu3 }
 0xae5   :  { %v2264_v52 = vpop.f32.mrf.mxu0 }
 0xae6   :  { %v2412_v23 = vadd.f32 %v2408_v18, %v2264_v52  ;;  %v3091_v18 = vld [vmem:[%s4784_s14 + $0x30] sm:$0xff] }
 0xae7   :  { %v2576_v52 = vpack.c.bf16 %v3092_v25, %v3091_v18 }
 0xae8   :  { %v2416_v9 = vadd.f32 %v2412_v23, %v2292_v29 }
 0xae9   :  { %2594 = vmatpush.bf16.msra.mxu2 %v2576_v52 }
 0xaea   :  { %v2424_v10 = vpack.c.bf16 %v2416_v9, %v2415_v39  ;;  %v2320_v27 = vpop.f32.mrf.mxu3  ;;  %v3089_v39 = vld [vmem:[%s4784_s14 + $0x20] sm:$0xff]  ;;  %v3090_v9 = vld [vmem:[%s4784_s14 + $0x28] sm:$0xff] }
 0xaeb   :  { %v2346_v36 = vpop.f32.mrf.mxu2 }
 0xaec   :  { %3085 = vmatmul.msk.bf16.vlgmr.msra.gmra.mxu3 %vm78_vm0, %v2424_v10  ;;  %v2409_v51 = vadd.f32 %v2346_v36, %v2318_v13  ;;  %v2575_v36 = vpack.c.bf16 %v3090_v9, %v3089_v39 }
 0xaed   :  { %v2374_v35 = vpop.f32.mrf.mxu0 }
 0xaee   :  { %v2402_v53 = vpop.f32.mrf.mxu1  ;;  %v2413_v34 = vadd.f32 %v2409_v51, %v2374_v35  ;;  %2595 = vmatpush.bf16.msra.mxu2 %v2575_v36 }
 0xaf0   :  { %v2417_v33 = vadd.f32 %v2413_v34, %v2402_v53 }
 0xaf3   :  { %v2348_v57 = vpop.f32.mrf.mxu2 }
 0xaf4   :  { %v2410_v2 = vadd.f32 %v2348_v57, %v2320_v27 }
 0xaf5   :  { %v2376_v16 = vpop.f32.mrf.mxu0 }
 0xaf6   :  { %v2414_v22 = vadd.f32 %v2410_v2, %v2376_v16  ;;  %v2404_v7 = vpop.f32.mrf.mxu1 }
 0xaf8   :  { %v2418_v31 = vadd.f32 %v2414_v22, %v2404_v7 }
 0xafa   :  { %v2425_v21 = vpack.c.bf16 %v2418_v31, %v2417_v33 }
 0xafc   :  { %3086 = vmatmul.msk.bf16.gmra.mxu3 %vm78_vm0, %v2425_v21 }
 0xb6f   :  { %v2448_v58 = vpop.f32.mrf.mxu3 }
 0xb70   :  { %v2449_v63 = vadd.f32 %v3140_v49, %v2448_v58 }
 0xb72   :  { %v2458_v3 = vadd.f32 %v2449_v63, %v4167_v6 }
 0xb74   :  { %v2466_v43 = vsel %vm78_vm0, %v2458_v3, 0.0 }
 0xb75   :  { %2467 = vadd.xlane.f32.xlu1 %v2466_v43  ;;  %v3141_v43 = vld [vmem:[%s4781_s12 + $0x2] ss:$0 sm:$0xff] }
 0xb77   :  { %v2450_v48 = vpop.f32.mrf.mxu3 }
 0xb78   :  { %v2451_v32 = vadd.f32 %v3140_v49, %v2450_v48 }
 0xb7a   :  { %v2459_v54 = vadd.f32 %v2451_v32, %v4169_v24 }
 0xb7c   :  { %v2469_v17 = vsel %vm78_vm0, %v2459_v54, 0.0 }
 0xb7d   :  { %2470 = vadd.xlane.f32.xlu2 %v2469_v17 }
 0xb7f   :  { %v2453_v45 = vpop.f32.mrf.mxu3 }
 0xb80   :  { %v2454_v14 = vadd.f32 %v3140_v49, %v2453_v45 }
 0xb82   :  { %v2460_v5 = vadd.f32 %v2454_v14, %v4179_v1 }
 0xb84   :  { %v2472_v41 = vsel %vm78_vm0, %v2460_v5, 0.0 }
 0xb85   :  { %2473 = vadd.xlane.f32.xlu0 %v2472_v41 }
 0xb87   :  { %v2455_v62 = vpop.f32.mrf.mxu3 }
 0xb88   :  { %v2456_v50 = vadd.f32 %v3140_v49, %v2455_v62 }
 0xb8a   :  { %v2461_v6 = vadd.f32 %v2456_v50, %v4181_v28 }
 0xb8c   :  { %v2475_v46 = vsel %vm78_vm0, %v2461_v6, 0.0 }
 0xb8d   :  { %2476 = vadd.xlane.f32.xlu1 %v2475_v46 }
 0xbe8   :  { %v2468_v0 = vpop.xlane.xlu1 %2467 }
 0xbe9   :  { %v2478_v24 = vmul.f32 %v2468_v0, %v3910_v30 }
 0xbeb   :  { %v2482_v19 = vsub.f32 %v2458_v3, %v2478_v24 }
 0xbed   :  { %v2486_v37 = vmul.f32 %v2482_v19, %v2482_v19 }
 0xbef   :  { %v2490_v8 = vsel %vm78_vm0, %v2486_v37, 0.0 }
 0xbf0   :  { %v2471_v60 = vpop.xlane.xlu2 %2470  ;;  %2491 = vadd.xlane.f32.xlu2 %v2490_v8 }
 0xbf1   :  { %v2479_v1 = vmul.f32 %v2471_v60, %v3910_v30 }
 0xbf3   :  { %v4512_v56 = vsub.f32 %v2459_v54, %v2479_v1 }
 0xbf5   :  { %v2487_v59 = vmul.f32 %v4512_v56, %v4512_v56 }
 0xbf7   :  { %v2493_v28 = vsel %vm78_vm0, %v2487_v59, 0.0 }
 0xbf8   :  { %2494 = vadd.xlane.f32.xlu0 %v2493_v28  ;;  %v2474_v4 = vpop.xlane.xlu0 %2473 }
 0xbf9   :  { %v2480_v44 = vmul.f32 %v2474_v4, %v3910_v30 }
 0xbfb   :  { %v4518_v11 = vsub.f32 %v2460_v5, %v2480_v44  ;;  %v3142_v5 = vld [vmem:[%s4782_s13 + $0x2] ss:$0 sm:$0xff] }
 0xbfd   :  { %v2488_v38 = vmul.f32 %v4518_v11, %v4518_v11 }
 0xbff   :  { %v2496_v40 = vsel %vm78_vm0, %v2488_v38, 0.0 }
 0xc00   :  { %v2477_v12 = vpop.xlane.xlu1 %2476  ;;  %2497 = vadd.xlane.f32.xlu1 %v2496_v40 }
 0xc01   :  { %v2481_v26 = vmul.f32 %v2477_v12, %v3910_v30 }
 0xc03   :  { %v4524_v42 = vsub.f32 %v2461_v6, %v2481_v26 }
 0xc05   :  { %v2489_v20 = vmul.f32 %v4524_v42, %v4524_v42 }
 0xc07   :  { %v2499_v47 = vsel %vm78_vm0, %v2489_v20, 0.0 }
 0xc08   :  { %2500 = vadd.xlane.f32.xlu2 %v2499_v47 }
 0xc63   :  { %v2492_v55 = vpop.xlane.xlu2 %2491 }
 0xc64   :  { %v2502_v61 = vmul.f32 %v2492_v55, %v3910_v30 }
 0xc66   :  { %v2506_v15 = vadd.f32 1e-05, %v2502_v61 }
 0xc68   :  { %3306 = vrsqrt.f32 %v2506_v15  ;;  %vm2516_vm8 = vweird.f32 %v2506_v15 }
 0xc6b   :  { %v2495_v29 = vpop.xlane.xlu0 %2494 }
 0xc6c   :  { %v2503_v23 = vmul.f32 %v2495_v29, %v3910_v30 }
 0xc6e   :  { %v3307_v13 = vpop.eup %3306  ;;  %v2507_v10 = vadd.f32 1e-05, %v2503_v23 }
 0xc6f   :  { %v2511_v35 = vmul.f32 %v3307_v13, %v2506_v15  ;;  %vm2517_vm6 = vweird.f32 %v3307_v13 }
 0xc70   :  { %3308 = vrsqrt.f32 %v2507_v10  ;;  %vm2518_vm9 = vmor %vm2516_vm8, %vm2517_vm6  ;;  %vm2526_vm11 = vweird.f32 %v2507_v10 }
 0xc71   :  { %v2512_v53 = vmul.f32 %v3307_v13, %v2511_v35 }
 0xc73   :  { %v2513_v51 = vmul.f32 0.5, %v2512_v53  ;;  %v2498_v27 = vpop.xlane.xlu1 %2497 }
 0xc74   :  { %v2504_v57 = vmul.f32 %v2498_v27, %v3910_v30 }
 0xc75   :  { %v2514_v34 = vsub.f32 1.5, %v2513_v51 }
 0xc76   :  { %v3309_v2 = vpop.eup %3308  ;;  %v2508_v16 = vadd.f32 1e-05, %v2504_v57 }
 0xc77   :  { %v2515_v22 = vmul.f32 %v3307_v13, %v2514_v34  ;;  %v2521_v7 = vmul.f32 %v3309_v2, %v2507_v10  ;;  %vm2527_vm10 = vweird.f32 %v3309_v2 }
 0xc78   :  { %3310 = vrsqrt.f32 %v2508_v16  ;;  %vm2528_vm12 = vmor %vm2526_vm11, %vm2527_vm10  ;;  %vm2536_vm15 = vweird.f32 %v2508_v16 }
 0xc79   :  { %v2522_v33 = vmul.f32 %v3309_v2, %v2521_v7  ;;  %v2519_v31 = vsel %vm2518_vm9, %v3307_v13, %v2515_v22 }
 0xc7a   :  { %v2550_v48 = vmul.f32 %v2519_v31, %v2482_v19 }
 0xc7b   :  { %v2523_v21 = vmul.f32 0.5, %v2522_v33  ;;  %v2501_v49 = vpop.xlane.xlu2 %2500 }
 0xc7c   :  { %v2505_v58 = vmul.f32 %v2501_v49, %v3910_v30  ;;  %v2557_v41 = vmul.f32 %v3141_v43, %v2550_v48 }
 0xc7d   :  { %v2524_v63 = vsub.f32 1.5, %v2523_v21 }
 0xc7e   :  { %v3311_v3 = vpop.eup %3310  ;;  %v2509_v32 = vadd.f32 1e-05, %v2505_v58  ;;  %v4552_v24 = vadd.f32 %v3142_v5, %v2557_v41 }
 0xc7f   :  { %v2525_v54 = vmul.f32 %v3309_v2, %v2524_v63  ;;  %v2531_v17 = vmul.f32 %v3311_v3, %v2508_v16  ;;  %vm2537_vm13 = vweird.f32 %v3311_v3 }
 0xc80   :  { %3312 = vrsqrt.f32 %v2509_v32  ;;  %vm2538_vm1 = vmor %vm2536_vm15, %vm2537_vm13  ;;  %vm2546_vm3 = vweird.f32 %v2509_v32 }
 0xc81   :  { %v2529_v45 = vsel %vm2528_vm12, %v3309_v2, %v2525_v54  ;;  %v2532_v14 = vmul.f32 %v3311_v3, %v2531_v17  ;;  %v3106_v54 = vld [vmem:[%s4786_s16 + $0x70] sm:$0xff]  ;;  %v3107_v17 = vld [vmem:[%s4786_s16 + $0x78] sm:$0xff] }
 0xc82   :  { %v2551_v62 = vmul.f32 %v2529_v45, %v4512_v56 }
 0xc83   :  { %v2533_v50 = vmul.f32 0.5, %v2532_v14 }
 0xc84   :  { %v2558_v6 = vmul.f32 %v3141_v43, %v2551_v62  ;;  %v2797_v62 = vpack.c.bf16 %v3107_v17, %v3106_v54 }
 0xc85   :  { %v2534_v46 = vsub.f32 1.5, %v2533_v50 }
 0xc86   :  { %v3313_v0 = vpop.eup %3312  ;;  %v4554_v19 = vadd.f32 %v3142_v5, %v2558_v6  ;;  %2813 = vmatpush.bf16.msra.mxu0 %v2797_v62 }
 0xc87   :  { %v2535_v37 = vmul.f32 %v3311_v3, %v2534_v46  ;;  %v2541_v8 = vmul.f32 %v3313_v0, %v2509_v32  ;;  %vm2547_vm2 = vweird.f32 %v3313_v0 }
 0xc88   :  { %v2573_v60 = vpack.c.bf16 %v4554_v19, %v4552_v24  ;;  %vm2548_vm4 = vmor %vm2546_vm3, %vm2547_vm2 }
 0xc89   :  { %v2542_v1 = vmul.f32 %v3313_v0, %v2541_v8  ;;  %v2539_v56 = vsel %vm2538_vm1, %v3311_v3, %v2535_v37 }
 0xc8a   :  { %3094 = vmatmul.msk.bf16.vlgmr.msra.gmra.mxu2 %vm78_vm0, %v2573_v60  ;;  %v2552_v4 = vmul.f32 %v2539_v56, %v4518_v11  ;;  %v3143_v11 = vld [vmem:[%s4783_s15 + $0x1] ss:$0 sm:$0xff] }
 0xc8b   :  { %v2543_v59 = vmul.f32 0.5, %v2542_v1 }
 0xc8c   :  { %v2559_v12 = vmul.f32 %v3141_v43, %v2552_v4  ;;  %v3105_v4 = vld [vmem:[%s4786_s16 + $0x68] sm:$0xff] }
 0xc8d   :  { %v2544_v28 = vsub.f32 1.5, %v2543_v59 }
 0xc8e   :  { %v4561_v20 = vadd.f32 %v3142_v5, %v2559_v12 }
 0xc8f   :  { %v2545_v44 = vmul.f32 %v3313_v0, %v2544_v28  ;;  %v3104_v28 = vld [vmem:[%s4786_s16 + $0x60] sm:$0xff] }
 0xc91   :  { %v2549_v38 = vsel %vm2548_vm4, %v3313_v0, %v2545_v44 }
 0xc92   :  { %v2553_v40 = vmul.f32 %v2549_v38, %v4524_v42 }
 0xc94   :  { %v2560_v26 = vmul.f32 %v3141_v43, %v2553_v40 }
 0xc96   :  { %v4563_v47 = vadd.f32 %v3142_v5, %v2560_v26 }
 0xc98   :  { %v2574_v55 = vpack.c.bf16 %v4563_v47, %v4561_v20 }
 0xc9a   :  { %3095 = vmatmul.msk.bf16.gmra.mxu2 %vm78_vm0, %v2574_v55 }
 0xd0d   :  { %v2597_v61 = vpop.f32.mrf.mxu2 }
 0xd0e   :  { %v4571_v15 = vadd.f32 %v3143_v11, %v2597_v61  ;;  %v3102_v61 = vld [vmem:[%s4786_s16 + $0x50] sm:$0xff] }
 0xd10   :  { %v4574_v42 = vmul.f32 0.70710677, %v4571_v15 }
 0xd12   :  { %v2615_v18 = vmul.f32 %v4574_v42, %v4574_v42 }
 0xd14   :  { %v4578_v25 = vmin.f32 %v2615_v18, 16.0  ;;  %v3103_v18 = vld [vmem:[%s4786_s16 + $0x58] sm:$0xff] }
 0xd15   :  { %v2599_v52 = vpop.f32.mrf.mxu2 }
 0xd16   :  { %v2617_v29 = vmul.f32 2.1237322e-06, %v4578_v25  ;;  %v2628_v23 = vmul.f32 3.8918573e-05, %v4578_v25  ;;  %v4582_v39 = vadd.f32 %v3143_v11, %v2599_v52 }
 0xd18   :  { %v2618_v9 = vadd.f32 0.00028619796, %v2617_v29  ;;  %v2629_v13 = vadd.f32 0.001143296, %v2628_v23  ;;  %v4585_v10 = vmul.f32 0.70710677, %v4582_v39 }
 0xd1a   :  { %v2630_v36 = vmul.f32 %v2629_v13, %v4578_v25  ;;  %v2619_v35 = vmul.f32 %v2618_v9, %v4578_v25  ;;  %v2655_v53 = vmul.f32 %v4585_v10, %v4585_v10  ;;  %v2795_v9 = vpack.c.bf16 %v3103_v18, %v3102_v61 }
 0xd1c   :  { %v2631_v51 = vadd.f32 0.014752088, %v2630_v36  ;;  %v4591_v27 = vmin.f32 %v2655_v53, 16.0  ;;  %v2620_v16 = vadd.f32 0.0036580483, %v2619_v35 }
 0xd1d   :  { %v2602_v57 = vpop.f32.mrf.mxu2 }
 0xd1e   :  { %v2632_v34 = vmul.f32 %v2631_v51, %v4578_v25  ;;  %v4594_v2 = vadd.f32 %v3143_v11, %v2602_v57  ;;  %v2657_v22 = vmul.f32 2.1237322e-06, %v4591_v27  ;;  %v2668_v7 = vmul.f32 3.8918573e-05, %v4591_v27 }
 0xd1f   :  { %v2621_v63 = vmul.f32 %v2620_v16, %v4578_v25 }
 0xd20   :  { %v2633_v33 = vadd.f32 0.112945676, %v2632_v34  ;;  %v2658_v31 = vadd.f32 0.00028619796, %v2657_v22  ;;  %v2669_v21 = vadd.f32 0.001143296, %v2668_v7 }
 0xd21   :  { %v4599_v49 = vmul.f32 0.70710677, %v4594_v2  ;;  %v2622_v46 = vadd.f32 0.05243302, %v2621_v63  ;;  %v3101_v63 = vld [vmem:[%s4786_s16 + $0x48] sm:$0xff] }
 0xd22   :  { %v2634_v58 = vmul.f32 %v2633_v33, %v4578_v25  ;;  %v2659_v3 = vmul.f32 %v2658_v31, %v4591_v27  ;;  %v2670_v43 = vmul.f32 %v2669_v21, %v4591_v27 }
 0xd23   :  { %v2695_v48 = vmul.f32 %v4599_v49, %v4599_v49  ;;  %v2623_v44 = vmul.f32 %v2622_v46, %v4578_v25 }
 0xd24   :  { %v2635_v32 = vadd.f32 0.4994258, %v2634_v58  ;;  %v2660_v45 = vadd.f32 0.0036580483, %v2659_v3  ;;  %v2671_v14 = vadd.f32 0.014752088, %v2670_v43 }
 0xd25   :  { %v4613_v5 = vmin.f32 %v2695_v48, 16.0  ;;  %v2604_v41 = vpop.f32.mrf.mxu2  ;;  %v2624_v13 = vadd.f32 0.18741608, %v2623_v44  ;;  %v3100_v58 = vld [vmem:[%s4786_s16 + $0x40] sm:$0xff] }
 0xd26   :  { %v2636_v50 = vmul.f32 %v2635_v32, %v4578_v25  ;;  %v4616_v6 = vadd.f32 %v3143_v11, %v2604_v41  ;;  %v2661_v0 = vmul.f32 %v2660_v45, %v4591_v27  ;;  %v2672_v37 = vmul.f32 %v2671_v14, %v4591_v27 }
 0xd27   :  { %v2697_v8 = vmul.f32 2.1237322e-06, %v4613_v5  ;;  %v2708_v1 = vmul.f32 3.8918573e-05, %v4613_v5  ;;  %v2796_v11 = vpack.c.bf16 %v3105_v4, %v3104_v28  ;;  %v2625_v3 = vmul.f32 %v2624_v13, %v4578_v25 }
 0xd28   :  { %v4621_v60 = vadd.f32 1.0, %v2636_v50  ;;  %v4625_v56 = vmul.f32 0.70710677, %v4616_v6  ;;  %v2673_v59 = vadd.f32 0.112945676, %v2672_v37  ;;  %v2794_v62 = vpack.c.bf16 %v3101_v63, %v3100_v58 }
 0xd29   :  { %v2662_v38 = vadd.f32 0.05243302, %v2661_v0  ;;  %v2698_v12 = vadd.f32 0.00028619796, %v2697_v8  ;;  %v2709_v26 = vadd.f32 0.001143296, %v2708_v1  ;;  %2814 = vmatpush.bf16.msra.mxu0 %v2796_v11 }
 0xd2a   :  { %3314 = vrcp.f32 %v4621_v60  ;;  %v2674_v40 = vmul.f32 %v2673_v59, %v4591_v27  ;;  %v2735_v55 = vmul.f32 %v4625_v56, %v4625_v56  ;;  %v2649_v48 = vand.u32 2147483648, %v4621_v60 }
 0xd2b   :  { %v2710_v29 = vmul.f32 %v2709_v26, %v4613_v5  ;;  %v2663_v36 = vmul.f32 %v2662_v38, %v4591_v27  ;;  %v2699_v51 = vmul.f32 %v2698_v12, %v4613_v5  ;;  %v2647_v50 = vand.u32 2147483647, %v4621_v60 }
 0xd2c   :  { %v2675_v52 = vadd.f32 0.4994258, %v2674_v40  ;;  %v4645_v23 = vmin.f32 %v2735_v55, 16.0  ;;  %vm2643_vm7 = vweird.f32 %v4621_v60  ;;  %v2626_v37 = vadd.f32 1.1283791, %v2625_v3 }
 0xd2d   :  { %v2711_v57 = vadd.f32 0.014752088, %v2710_v29  ;;  %2815 = vmatpush.bf16.msra.mxu0 %v2795_v9  ;;  %v2664_v32 = vadd.f32 0.18741608, %v2663_v36  ;;  %v2700_v54 = vadd.f32 0.0036580483, %v2699_v51 }
 0xd2e   :  { %v2676_v35 = vmul.f32 %v2675_v52, %v4591_v27  ;;  %v2737_v34 = vmul.f32 2.1237322e-06, %v4645_v23  ;;  %v2748_v16 = vmul.f32 3.8918573e-05, %v4645_v23  ;;  %v2650_v44 = vor.u32 1.1754944e-38, %v2649_v48 }
 0xd2f   :  { %v2712_v33 = vmul.f32 %v2711_v57, %v4613_v5  ;;  %v2665_v8 = vmul.f32 %v2664_v32, %v4591_v27  ;;  %v2701_v1 = vmul.f32 %v2700_v54, %v4613_v5  ;;  %vm2648_vm8 = vcmp.eq.f32.partialorder %v2647_v50, 8.507059e+37 }
 0xd30   :  { %v3315_v53 = vpop.eup %3314  ;;  %v4653_v7 = vadd.f32 1.0, %v2676_v35  ;;  %v2738_v31 = vadd.f32 0.00028619796, %v2737_v34  ;;  %v2749_v21 = vadd.f32 0.001143296, %v2748_v16  ;;  %v2627_v11 = vmul.f32 %v2626_v37, %v4574_v42 }
 0xd31   :  { %v2639_v22 = vmul.f32 %v3315_v53, %v4621_v60  ;;  %vm2644_vm5 = vweird.f32 %v3315_v53  ;;  %v2713_v17 = vadd.f32 0.112945676, %v2712_v33  ;;  %2816 = vmatpush.bf16.msra.mxu0 %v2794_v62  ;;  %v2666_v61 = vadd.f32 1.1283791, %v2665_v8 }
 0xd32   :  { %3316 = vrcp.f32 %v4653_v7  ;;  %v2739_v14 = vmul.f32 %v2738_v31, %v4645_v23  ;;  %v2750_v41 = vmul.f32 %v2749_v21, %v4645_v23  ;;  %vm2645_vm6 = vmor %vm2643_vm7, %vm2644_vm5  ;;  %v2702_v18 = vadd.f32 0.05243302, %v2701_v1 }
 0xd33   :  { %v2640_v43 = vsub.f32 1.0, %v2639_v22  ;;  %v2714_v46 = vmul.f32 %v2713_v17, %v4613_v5  ;;  %v2689_v52 = vand.u32 2147483648, %v4653_v7  ;;  %vm2683_vm10 = vweird.f32 %v4653_v7 }
 0xd34   :  { %v2751_v0 = vadd.f32 0.014752088, %v2750_v41  ;;  %v2740_v38 = vadd.f32 0.0036580483, %v2739_v14  ;;  %v2703_v42 = vmul.f32 %v2702_v18, %v4613_v5  ;;  %v2667_v34 = vmul.f32 %v2666_v61, %v4585_v10 }
 0xd35   :  { %v2641_v45 = vmul.f32 %v3315_v53, %v2640_v43  ;;  %v2715_v59 = vadd.f32 0.4994258, %v2714_v46  ;;  %v2690_v16 = vor.u32 1.1754944e-38, %v2689_v52  ;;  %v2607_v10 = vmul.f32 0.5, %v4571_v15 }
 0xd36   :  { %v2752_v40 = vmul.f32 %v2751_v0, %v4645_v23  ;;  %v2741_v9 = vmul.f32 %v2740_v38, %v4645_v23  ;;  %v2704_v3 = vadd.f32 0.18741608, %v2703_v42 }
 0xd37   :  { %v2642_v25 = vadd.f32 %v3315_v53, %v2641_v45  ;;  %v2716_v26 = vmul.f32 %v2715_v59, %v4613_v5  ;;  %v2608_v45 = vmul.f32 0.5, %v4582_v39 }
 0xd38   :  { %v3317_v28 = vpop.eup %3316  ;;  %v2753_v55 = vadd.f32 0.112945676, %v2752_v40  ;;  %v2742_v22 = vadd.f32 0.05243302, %v2741_v9  ;;  %v2705_v41 = vmul.f32 %v2704_v3, %v4613_v5 }
 0xd39   :  { %v2646_v4 = vsel %vm2645_vm6, %v3315_v53, %v2642_v25  ;;  %v2679_v12 = vmul.f32 %v3317_v28, %v4653_v7  ;;  %v2717_v29 = vadd.f32 1.0, %v2716_v26  ;;  %vm2684_vm9 = vweird.f32 %v3317_v28 }
 0xd3a   :  { %v2651_v60 = vsel %vm2648_vm8, %v2650_v44, %v2646_v4  ;;  %v2754_v13 = vmul.f32 %v2753_v55, %v4645_v23  ;;  %v2687_v53 = vand.u32 2147483647, %v4653_v7  ;;  %vm2685_vm11 = vmor %vm2683_vm10, %vm2684_vm9  ;;  %v2743_v7 = vmul.f32 %v2742_v22, %v4645_v23 }
 0xd3b   :  { %v2680_v27 = vsub.f32 1.0, %v2679_v12  ;;  %v2652_v36 = vmul.f32 %v2651_v60, %v2627_v11  ;;  %3318 = vrcp.f32 %v2717_v29  ;;  %v2727_v50 = vand.u32 2147483647, %v2717_v29 }
 0xd3c   :  { %v2755_v57 = vadd.f32 0.4994258, %v2754_v13  ;;  %vm2688_vm12 = vcmp.eq.f32.partialorder %v2687_v53, 8.507059e+37  ;;  %v2729_v46 = vand.u32 2147483648, %v2717_v29  ;;  %v2744_v25 = vadd.f32 0.18741608, %v2743_v7 }
 0xd3d   :  { %v2681_v35 = vmul.f32 %v3317_v28, %v2680_v27  ;;  %v3096_v33 = vclamps-f32 %v2652_v36, 1.0  ;;  %v2706_v59 = vadd.f32 1.1283791, %v2705_v41  ;;  %vm2723_vm15 = vweird.f32 %v2717_v29 }
 0xd3e   :  { %v2756_v21 = vmul.f32 %v2755_v57, %v4645_v23  ;;  %v2730_v15 = vor.u32 1.1754944e-38, %v2729_v46  ;;  %v2745_v39 = vmul.f32 %v2744_v25, %v4645_v23  ;;  %vm2728_vm2 = vcmp.eq.f32.partialorder %v2727_v50, 8.507059e+37 }
 0xd3f   :  { %v2682_v51 = vadd.f32 %v3317_v28, %v2681_v35  ;;  %v2775_v32 = vadd.f32 1.0, %v3096_v33  ;;  %v2707_v40 = vmul.f32 %v2706_v59, %v4599_v49  ;;  %v2609_v35 = vmul.f32 0.5, %v4594_v2 }
 0xd40   :  { %v2757_v43 = vadd.f32 1.0, %v2756_v21  ;;  %v2746_v60 = vadd.f32 1.1283791, %v2745_v39  ;;  %v2610_v53 = vmul.f32 0.5, %v4616_v6 }
 0xd41   :  { %v2686_v31 = vsel %vm2685_vm11, %v3317_v28, %v2682_v51  ;;  %v3319_v48 = vpop.eup %3318  ;;  %v2779_v0 = vmul.f32 %v2775_v32, %v2607_v10 }
 0xd42   :  { %v2691_v58 = vsel %vm2688_vm12, %v2690_v16, %v2686_v31  ;;  %v2719_v17 = vmul.f32 %v3319_v48, %v2717_v29  ;;  %3320 = vrcp.f32 %v2757_v43  ;;  %vm2724_vm13 = vweird.f32 %v3319_v48 }
 0xd43   :  { %v2692_v63 = vmul.f32 %v2691_v58, %v2667_v34  ;;  %vm2725_vm1 = vmor %vm2723_vm15, %vm2724_vm13  ;;  %v2769_v26 = vand.u32 2147483648, %v2757_v43  ;;  %v2767_v61 = vand.u32 2147483647, %v2757_v43  ;;  %vm2763_vm4 = vweird.f32 %v2757_v43 }
 0xd44   :  { %v2720_v62 = vsub.f32 1.0, %v2719_v17  ;;  %v2747_v52 = vmul.f32 %v2746_v60, %v4625_v56  ;;  %v3144_v56 = vld [vmem:[%s4785_s17 + $0x1] ss:$0 sm:$0xff] }
 0xd45   :  { %v3097_v54 = vclamps-f32 %v2692_v63, 1.0  ;;  %v2770_v18 = vor.u32 1.1754944e-38, %v2769_v26  ;;  %vm2768_vm7 = vcmp.eq.f32.partialorder %v2767_v61, 8.507059e+37 }
 0xd46   :  { %v2721_v8 = vmul.f32 %v3319_v48, %v2720_v62 }
 0xd47   :  { %v2776_v14 = vadd.f32 1.0, %v3097_v54 }
 0xd48   :  { %v2722_v28 = vadd.f32 %v3319_v48, %v2721_v8  ;;  %v3321_v4 = vpop.eup %3320 }
 0xd49   :  { %v2780_v37 = vmul.f32 %v2776_v14, %v2608_v45  ;;  %v2759_v5 = vmul.f32 %v3321_v4, %v2757_v43  ;;  %vm2764_vm3 = vweird.f32 %v3321_v4 }
 0xd4a   :  { %v2726_v44 = vsel %vm2725_vm1, %v3319_v48, %v2722_v28  ;;  %vm2765_vm5 = vmor %vm2763_vm4, %vm2764_vm3  ;;  %vm2975_vm4 = vcmask 195584  }
 0xd4b   :  { %v2792_v1 = vpack.c.bf16 %v2780_v37, %v2779_v0  ;;  %v2731_v38 = vsel %vm2728_vm2, %v2730_v15, %v2726_v44  ;;  %v2760_v12 = vsub.f32 1.0, %v2759_v5 }
 0xd4c   :  { %v2732_v55 = vmul.f32 %v2731_v38, %v2707_v40  ;;  %v2940_v38 = vld [vmem:[%s4788_s18 + $0x10] sm:$0xff]  ;;  %v2941_v40 = vld [vmem:[%s4788_s18 + $0x18] sm:$0xff] }
 0xd4d   :  { %3109 = vmatmul.msk.bf16.vlgmr.msra.gmra.mxu0 %vm1462_vm14, %v2792_v1  ;;  %v2761_v11 = vmul.f32 %v3321_v4, %v2760_v12  ;;  %v2945_v12 = vpack.c.bf16 %v2941_v40, %v2940_v38 }
 0xd4e   :  { %v3098_v23 = vclamps-f32 %v2732_v55, 1.0  ;;  %v2938_v55 = vld [vmem:[%s4788_s18] sm:$0xff] }
 0xd4f   :  { %v2762_v27 = vadd.f32 %v3321_v4, %v2761_v11  ;;  %2962 = vmatpush.bf16.msra.mxu1 %v2945_v12  ;;  %v2939_v11 = vld [vmem:[%s4788_s18 + $0x8] sm:$0xff] }
 0xd50   :  { %v2777_v36 = vadd.f32 1.0, %v3098_v23  ;;  %v2944_v61 = vpack.c.bf16 %v2939_v11, %v2938_v55 }
 0xd51   :  { %v2766_v29 = vsel %vm2765_vm5, %v3321_v4, %v2762_v27 }
 0xd52   :  { %v2771_v9 = vsel %vm2768_vm7, %v2770_v18, %v2766_v29  ;;  %v2781_v42 = vmul.f32 %v2777_v36, %v2609_v35 }
 0xd53   :  { %v2772_v13 = vmul.f32 %v2771_v9, %v2747_v52  ;;  %2963 = vmatpush.bf16.msra.mxu1 %v2944_v61 }
 0xd55   :  { %v3099_v49 = vclamps-f32 %v2772_v13, 1.0 }
 0xd57   :  { %v2778_v51 = vadd.f32 1.0, %v3099_v49 }
 0xd59   :  { %v2782_v57 = vmul.f32 %v2778_v51, %v2610_v53 }
 0xd5b   :  { %v2793_v34 = vpack.c.bf16 %v2782_v57, %v2781_v42 }
 0xd5d   :  { %3110 = vmatmul.msk.bf16.gmra.mxu0 %vm1462_vm14, %v2793_v34 }
 0xdca   :  { %v2818_v16 = vpop.f32.mrf.mxu0 }
 0xdcb   :  { %v2819_v22 = vadd.f32 %v3144_v56, %v2818_v16  ;;  %v3145_v16 = vld [vmem:[%s4781_s12 + $0x3] ss:$0 sm:$0xff] }
 0xdcd   :  { %v2828_v33 = vadd.f32 %v2819_v22, %v4552_v24 }
 0xdcf   :  { %v2836_v31 = vsel %vm78_vm0, %v2828_v33, 0.0 }
 0xdd0   :  { %2837 = vadd.xlane.f32.xlu0 %v2836_v31 }
 0xdd2   :  { %v2820_v2 = vpop.f32.mrf.mxu0 }
 0xdd3   :  { %v2821_v21 = vadd.f32 %v3144_v56, %v2820_v2 }
 0xdd5   :  { %v2829_v6 = vadd.f32 %v2821_v21, %v4554_v19 }
 0xdd7   :  { %v2839_v58 = vsel %vm78_vm0, %v2829_v6, 0.0 }
 0xdd8   :  { %2840 = vadd.xlane.f32.xlu1 %v2839_v58  ;;  %v3146_v58 = vld [vmem:[%s4782_s13 + $0x3] ss:$0 sm:$0xff] }
 0xdda   :  { %v2823_v63 = vpop.f32.mrf.mxu0 }
 0xddb   :  { %v2824_v3 = vadd.f32 %v3144_v56, %v2823_v63 }
 0xddd   :  { %v2830_v43 = vadd.f32 %v2824_v3, %v4561_v20 }
 0xddf   :  { %v2842_v48 = vsel %vm78_vm0, %v2830_v43, 0.0 }
 0xde0   :  { %2843 = vadd.xlane.f32.xlu2 %v2842_v48 }
 0xde2   :  { %v2825_v7 = vpop.f32.mrf.mxu0 }
 0xde3   :  { %v2826_v32 = vadd.f32 %v3144_v56, %v2825_v7 }
 0xde5   :  { %v2831_v24 = vadd.f32 %v2826_v32, %v4563_v47 }
 0xde7   :  { %v2845_v54 = vsel %vm78_vm0, %v2831_v24, 0.0 }
 0xde8   :  { %2846 = vadd.xlane.f32.xlu0 %v2845_v54 }
 0xe43   :  { %v2838_v17 = vpop.xlane.xlu0 %2837 }
 0xe44   :  { %v2848_v19 = vmul.f32 %v2838_v17, %v3910_v30 }
 0xe46   :  { %v2852_v10 = vsub.f32 %v2828_v33, %v2848_v19 }
 0xe48   :  { %v2856_v45 = vmul.f32 %v2852_v10, %v2852_v10 }
 0xe4a   :  { %v2860_v14 = vsel %vm78_vm0, %v2856_v45, 0.0 }
 0xe4b   :  { %v2841_v41 = vpop.xlane.xlu1 %2840  ;;  %2861 = vadd.xlane.f32.xlu1 %v2860_v14 }
 0xe4c   :  { %v2849_v20 = vmul.f32 %v2841_v41, %v3910_v30 }
 0xe4e   :  { %v4710_v62 = vsub.f32 %v2829_v6, %v2849_v20 }
 0xe50   :  { %v2857_v50 = vmul.f32 %v4710_v62, %v4710_v62 }
 0xe52   :  { %v2863_v47 = vsel %vm78_vm0, %v2857_v50, 0.0 }
 0xe53   :  { %2864 = vadd.xlane.f32.xlu2 %v2863_v47  ;;  %v2844_v46 = vpop.xlane.xlu2 %2843 }
 0xe54   :  { %v2850_v25 = vmul.f32 %v2844_v46, %v3910_v30 }
 0xe56   :  { %v4716_v0 = vsub.f32 %v2830_v43, %v2850_v25 }
 0xe58   :  { %v2858_v37 = vmul.f32 %v4716_v0, %v4716_v0 }
 0xe5a   :  { %v2866_v8 = vsel %vm78_vm0, %v2858_v37, 0.0 }
 0xe5b   :  { %2867 = vadd.xlane.f32.xlu0 %v2866_v8  ;;  %v2847_v1 = vpop.xlane.xlu0 %2846 }
 0xe5c   :  { %v2851_v59 = vmul.f32 %v2847_v1, %v3910_v30 }
 0xe5e   :  { %v4722_v28 = vsub.f32 %v2831_v24, %v2851_v59 }
 0xe60   :  { %v2859_v4 = vmul.f32 %v4722_v28, %v4722_v28 }
 0xe62   :  { %v2869_v15 = vsel %vm78_vm0, %v2859_v4, 0.0 }
 0xe63   :  { %2870 = vadd.xlane.f32.xlu1 %v2869_v15 }
 0xebe   :  { %v2862_v39 = vpop.xlane.xlu1 %2861 }
 0xebf   :  { %v2872_v44 = vmul.f32 %v2862_v39, %v3910_v30  ;;  %v3147_v39 = vld [vmem:[%s4787_s19] ss:$0 sm:$0xff] }
 0xec1   :  { %v2876_v5 = vadd.f32 1e-05, %v2872_v44 }
 0xec3   :  { %3322 = vrsqrt.f32 %v2876_v5  ;;  %vm2886_vm6 = vweird.f32 %v2876_v5 }
 0xec6   :  { %v2865_v60 = vpop.xlane.xlu2 %2864 }
 0xec7   :  { %v2873_v26 = vmul.f32 %v2865_v60, %v3910_v30 }
 0xec9   :  { %v3323_v27 = vpop.eup %3322  ;;  %v2877_v18 = vadd.f32 1e-05, %v2873_v26 }
 0xeca   :  { %v2881_v23 = vmul.f32 %v3323_v27, %v2876_v5  ;;  %vm2887_vm14 = vweird.f32 %v3323_v27 }
 0xecb   :  { %3324 = vrsqrt.f32 %v2877_v18  ;;  %vm2888_vm8 = vmor %vm2886_vm6, %vm2887_vm14  ;;  %vm2896_vm10 = vweird.f32 %v2877_v18 }
 0xecc   :  { %v2882_v52 = vmul.f32 %v3323_v27, %v2881_v23 }
 0xece   :  { %v2883_v29 = vmul.f32 0.5, %v2882_v52  ;;  %v2868_v35 = vpop.xlane.xlu0 %2867 }
 0xecf   :  { %v2874_v53 = vmul.f32 %v2868_v35, %v3910_v30 }
 0xed0   :  { %v2884_v9 = vsub.f32 1.5, %v2883_v29 }
 0xed1   :  { %v3325_v13 = vpop.eup %3324  ;;  %v2878_v42 = vadd.f32 1e-05, %v2874_v53 }
 0xed2   :  { %v2885_v36 = vmul.f32 %v3323_v27, %v2884_v9  ;;  %v2891_v49 = vmul.f32 %v3325_v13, %v2877_v18  ;;  %vm2897_vm9 = vweird.f32 %v3325_v13 }
 0xed3   :  { %3326 = vrsqrt.f32 %v2878_v42  ;;  %vm2898_vm11 = vmor %vm2896_vm10, %vm2897_vm9  ;;  %vm2906_vm13 = vweird.f32 %v2878_v42 }
 0xed4   :  { %v2892_v51 = vmul.f32 %v3325_v13, %v2891_v49  ;;  %v2889_v57 = vsel %vm2888_vm8, %v3323_v27, %v2885_v36 }
 0xed5   :  { %v2920_v22 = vmul.f32 %v2889_v57, %v2852_v10 }
 0xed6   :  { %v2893_v34 = vmul.f32 0.5, %v2892_v51  ;;  %v2871_v31 = vpop.xlane.xlu1 %2870 }
 0xed7   :  { %v2875_v2 = vmul.f32 %v2871_v31, %v3910_v30  ;;  %v2927_v63 = vmul.f32 %v3145_v16, %v2920_v22 }
 0xed8   :  { %v2894_v56 = vsub.f32 1.5, %v2893_v34 }
 0xed9   :  { %v3327_v6 = vpop.eup %3326  ;;  %v2879_v43 = vadd.f32 1e-05, %v2875_v2  ;;  %v2934_v24 = vadd.f32 %v3146_v58, %v2927_v63 }
 0xeda   :  { %v2895_v33 = vmul.f32 %v3325_v13, %v2894_v56  ;;  %v2901_v48 = vmul.f32 %v3327_v6, %v2878_v42  ;;  %vm2907_vm12 = vweird.f32 %v3327_v6 }
 0xedb   :  { %3328 = vrsqrt.f32 %v2879_v43  ;;  %vm2908_vm15 = vmor %vm2906_vm13, %vm2907_vm12  ;;  %vm2916_vm2 = vweird.f32 %v2879_v43 }
 0xedc   :  { %v2899_v21 = vsel %vm2898_vm11, %v3325_v13, %v2895_v33  ;;  %v2902_v32 = vmul.f32 %v3327_v6, %v2901_v48 }
 0xedd   :  { %v2921_v3 = vmul.f32 %v2899_v21, %v4710_v62 }
 0xede   :  { %v2903_v17 = vmul.f32 0.5, %v2902_v32 }
 0xedf   :  { %v2928_v7 = vmul.f32 %v3145_v16, %v2921_v3 }
 0xee0   :  { %v2904_v10 = vsub.f32 1.5, %v2903_v17 }
 0xee1   :  { %v2935_v54 = vadd.f32 %v3146_v58, %v2928_v7  ;;  %v3329_v30 = vpop.eup %3328 }
 0xee2   :  { %v2905_v45 = vmul.f32 %v3327_v6, %v2904_v10  ;;  %v2911_v14 = vmul.f32 %v3329_v30, %v2879_v43  ;;  %vm2917_vm1 = vweird.f32 %v3329_v30 }
 0xee3   :  { %v2942_v19 = vpack.c.bf16 %v2935_v54, %v2934_v24  ;;  %vm2918_vm3 = vmor %vm2916_vm2, %vm2917_vm1 }
 0xee4   :  { %v2912_v41 = vmul.f32 %v3329_v30, %v2911_v14  ;;  %v2909_v20 = vsel %vm2908_vm15, %v3327_v6, %v2905_v45 }
 0xee5   :  { %3113 = vmatmul.msk.bf16.vlgmr.msra.gmra.mxu1 %vm78_vm0, %v2942_v19  ;;  %v2922_v47 = vmul.f32 %v2909_v20, %v4716_v0 }
 0xee6   :  { %v2913_v62 = vmul.f32 0.5, %v2912_v41 }
 0xee7   :  { %v2929_v8 = vmul.f32 %v3145_v16, %v2922_v47 }
 0xee8   :  { %v2914_v50 = vsub.f32 1.5, %v2913_v62 }
 0xee9   :  { %v2936_v59 = vadd.f32 %v3146_v58, %v2929_v8 }
 0xeea   :  { %v2915_v46 = vmul.f32 %v3329_v30, %v2914_v50 }
 0xeec   :  { %v2919_v25 = vsel %vm2918_vm3, %v3329_v30, %v2915_v46 }
 0xeed   :  { %v2923_v37 = vmul.f32 %v2919_v25, %v4722_v28 }
 0xeef   :  { %v2930_v1 = vmul.f32 %v3145_v16, %v2923_v37 }
 0xef1   :  { %v2937_v4 = vadd.f32 %v3146_v58, %v2930_v1 }
 0xef3   :  { %v2943_v15 = vpack.c.bf16 %v2937_v4, %v2936_v59 }
 0xef5   :  { %3114 = vmatmul.msk.bf16.gmra.mxu1 %vm78_vm0, %v2943_v15 }
 0xf62   :  { %v2965_v44 = vpop.f32.mrf.mxu1 }
 0xf63   :  { %v2966_v0 = vadd.f32 %v3147_v39, %v2965_v44 }
 0xf65   :  { %2976 = vst.msk [vmem:[%s4789_s20] sm:$0xff] %vm2975_vm4, %v2966_v0 }
 0xf6a   :  { %v2967_v5 = vpop.f32.mrf.mxu1 }
 0xf6b   :  { %v2968_v28 = vadd.f32 %v3147_v39, %v2967_v5 }
 0xf6d   :  { %2977 = vst.msk [vmem:[%s4789_s20 + $0x8] sm:$0xff] %vm2975_vm4, %v2968_v28 }
 0xf72   :  { %v2970_v38 = vpop.f32.mrf.mxu1 }
 0xf73   :  { %v2971_v40 = vadd.f32 %v3147_v39, %v2970_v38 }
 0xf75   :  { %2978 = vst.msk [vmem:[%s4789_s20 + $0x10] sm:$0xff] %vm2975_vm4, %v2971_v40 }
 0xf7a   :  { %v2972_v12 = vpop.f32.mrf.mxu1 }
 0xf7b   :  { %v2973_v60 = vadd.f32 %v3147_v39, %v2972_v12 }
 0xf7d   :  { %2979 = vst.msk [vmem:[%s4789_s20 + $0x18] sm:$0xff] %vm2975_vm4, %v2973_v60 }

</bundles_post_ra>
